<compile_context>
chip_gen: v7x
topology: tpu7x:2x2x1
jax: 0.10.0
libtpu: 0.0.40
codegen_flags: <defaults>
</compile_context>

<pallas_src>
import functools

import jax
import jax.numpy as jnp
from jax import lax
from jax.experimental import pallas as pl
from jax.experimental.pallas import tpu as pltpu


def _lstm_kernel(num_layers, hidden_size, seq_len, batch_pad, *refs):
    # refs: x_flat, (w_ih, w_hh, b) * num_layers, fc_w, fc_b, out, xproj_scr
    x_ref = refs[0]
    layer_refs = refs[1:1 + 3 * num_layers]
    fc_w_ref = refs[1 + 3 * num_layers]
    fc_b_ref = refs[2 + 3 * num_layers]
    out_ref = refs[3 + 3 * num_layers]
    xproj_ref = refs[4 + 3 * num_layers]   # (T*B, 4H) VMEM scratch

    H = hidden_size
    G = 4 * H
    T = seq_len
    B = batch_pad
    L = num_layers

    # Small weights: load once, live for the whole (gridless) kernel.
    w_ih = [layer_refs[3 * l][...] for l in range(L)]       # (D_l, 4H)
    w_hh = [layer_refs[3 * l + 1][...] for l in range(L)]   # (H,   4H)
    bias = [layer_refs[3 * l + 2][...] for l in range(L)]   # (1,   4H)
    mm_dt = w_hh[0].dtype                                    # f32 or bf16

    # Layer-0 input projection, time-parallel: one MXU pass over the whole
    # sequence, bias folded in once.  Only the recurrent matmuls stay serial.
    xproj_ref[...] = (
        jnp.dot(x_ref[...].astype(mm_dt), w_ih[0],
                preferred_element_type=jnp.float32) + bias[0])

    # Hoist bias broadcasts for the upper layers out of the time loop
    # (JAX does not CSE broadcast_in_dim inside loops).
    bias_bc = [None] + [jnp.broadcast_to(bias[l], (B, G)) for l in range(1, L)]

    def cell(gates, c_prev):
        # Gate order [i, f, o, g]: ONE sigmoid over 3H lanes + ONE tanh.
        sig = jax.nn.sigmoid(gates[:, :3 * H])
        g_g = jnp.tanh(gates[:, 3 * H:])
        i_g = sig[:, 0:H]
        f_g = sig[:, H:2 * H]
        o_g = sig[:, 2 * H:3 * H]
        c_new = f_g * c_prev + i_g * g_g
        h_new = o_g * jnp.tanh(c_new)
        return h_new, c_new

    def wave_step(s, carry, active_layers):
        """One wavefront step: layer l (in active_layers) does timestep s - l.

        Layer l reads its input from the OLD carry of layer l-1 (its output at
        timestep s - l, produced at global step s - 1), so all active layers
        are mutually independent within a step and the scheduler can overlap
        their MXU/EUP/VPU latency.
        """
        new = list(carry)
        for l in active_layers:
            h_l, c_l = carry[l]
            if l == 0:
                if isinstance(s, int):
                    start = s * B
                else:
                    start = pl.multiple_of(s * B, B)      # B is a multiple of 8
                pre = xproj_ref[pl.ds(start, B), :]
                gates = pre + jnp.dot(h_l.astype(mm_dt), w_hh[0],
                                      preferred_element_type=jnp.float32)
            else:
                inp = carry[l - 1][0]                      # old carry only
                gates = (jnp.dot(inp.astype(mm_dt), w_ih[l],
                                 preferred_element_type=jnp.float32)
                         + jnp.dot(h_l.astype(mm_dt), w_hh[l],
                                   preferred_element_type=jnp.float32)
                         + bias_bc[l])
            new[l] = cell(gates, c_l)
        return tuple(new)

    zeros = jnp.zeros((B, H), jnp.float32)
    carry = tuple((zeros, zeros) for _ in range(L))

    # Wavefront prologue (layer l joins at global step l); unrolled in Python
    # so the steady-state loop needs no activity masks.
    for s in range(L - 1):
        carry = wave_step(s, carry, range(max(0, s - T + 1), min(L, s + 1)))

    # Steady state: all L layers active for global steps L-1 .. T-1.
    steps = T - (L - 1)
    unroll = True if steps <= 64 else 8
    carry = lax.fori_loop(L - 1, T,
                          lambda s, c: wave_step(s, c, range(L)),
                          carry, unroll=unroll)

    # Wavefront epilogue (layer l finishes at global step T-1+l).
    for s in range(T, T + L - 1):
        carry = wave_step(s, carry, range(s - T + 1, L))

    # Final FC over stacked per-layer final hidden states
    # (== h_out.view(-1, H)): one lane-dense (L*B, H)x(H, 128) matmul ->
    # single unmasked full-block store.
    h_all = jnp.concatenate([carry[l][0] for l in range(L)], axis=0)
    out_ref[...] = (jnp.dot(h_all.astype(fc_w_ref.dtype), fc_w_ref[...],
                            preferred_element_type=jnp.float32)
                    + fc_b_ref[...])


def _round_up(x, m):
    return ((x + m - 1) // m) * m


def prep_lstm_layer(w_ih, w_hh, b_ih, b_hh, hidden_size):
    """PyTorch-layout (4H, D)/(4H, H)/(4H,) -> kernel layout.

    Transposes weights, combines biases, and reorders gate blocks from
    PyTorch's [i, f, g, o] to the kernel's [i, f, o, g].
    """
    H = hidden_size
    perm = jnp.concatenate([jnp.arange(0, 2 * H),        # i, f
                            jnp.arange(3 * H, 4 * H),    # o
                            jnp.arange(2 * H, 3 * H)])   # g
    w_ih_k = w_ih[perm].T                                # (D, 4H)
    w_hh_k = w_hh[perm].T                                # (H, 4H)
    b_k = (b_ih + b_hh)[perm][None, :]                   # (1, 4H)
    return w_ih_k, w_hh_k, b_k


def lstm_forward(x, params, *, num_layers, hidden_size, num_classes,
                 matmul_dtype=jnp.float32):
    """x: (B, T, D) batch_first, as in the PyTorch module.

    matmul_dtype: jnp.float32 for exact parity with the f32 reference;
    jnp.bfloat16 recommended on v5e/v6e/v7x for native-MXU throughput
    (h/c state, gate math and accumulation stay f32 either way).
    """
    B, T, D = x.shape
    H = hidden_size
    G = 4 * H
    assert T >= num_layers, "wavefront schedule assumes seq_len >= num_layers"
    B_pad = _round_up(max(B, 8), 8)                   # sublane-dense batch
    NC_pad = _round_up(max(num_classes, 128), 128)    # lane-dense output store

    # (B, T, D) -> time-major, batch-padded, pre-flattened (T*B_pad, D):
    # avoids any in-kernel reshape/relayout of the lane-sparse input.
    x_tm = jnp.transpose(x, (1, 0, 2)).astype(jnp.float32)
    x_tm = jnp.pad(x_tm, ((0, 0), (0, B_pad - B), (0, 0)))
    x_flat = x_tm.reshape(T * B_pad, D)

    args = [x_flat]
    for l in range(num_layers):
        w_ih_k, w_hh_k, b_k = params["layers"][l]
        args += [w_ih_k.astype(matmul_dtype), w_hh_k.astype(matmul_dtype),
                 b_k.astype(jnp.float32)]

    fc_w_t, fc_b = params["fc"]            # (H, num_classes), (1, num_classes)
    fc_w_pad = (jnp.zeros((H, NC_pad), matmul_dtype)
                .at[:, :num_classes].set(fc_w_t.astype(matmul_dtype)))
    fc_b_pad = (jnp.zeros((1, NC_pad), jnp.float32)
                .at[:, :num_classes].set(fc_b.astype(jnp.float32)))
    args += [fc_w_pad, fc_b_pad]

    out_shape = jax.ShapeDtypeStruct((num_layers * B_pad, NC_pad), jnp.float32)

    # Scheduling hint so XLA overlaps the wrapper-side transpose/pad.
    flops = 2 * T * B_pad * D * G                          # layer-0 xproj
    flops += 2 * T * B_pad * H * G                         # layer-0 recurrence
    flops += (num_layers - 1) * 4 * T * B_pad * H * G      # upper layers
    flops += 2 * num_layers * B_pad * H * NC_pad           # final FC
    transcendentals = 5 * T * B_pad * H * num_layers
    bytes_accessed = int(sum(a.size * a.dtype.itemsize for a in args)
                         + num_layers * B_pad * NC_pad * 4)

    # Explicit VMEM plan: weights, x, the (T*B, 4H) xproj scratch and the
    # output are all resident.  Keep headroom, never below the default scoped
    # limit.  NOTE: for large T/H on v7x (64 MiB VMEM/TC), chunk xproj over T
    # with pltpu.emit_pipeline and stream per-layer weights from pl.ANY.
    resident = T * B_pad * G * 4 + bytes_accessed
    vmem_limit = int(min(96 * 2 ** 20, max(32 * 2 ** 20, 4 * resident)))

    kernel = functools.partial(_lstm_kernel, num_layers, hidden_size, T, B_pad)
    out_full = pl.pallas_call(
        kernel,
        out_shape=out_shape,
        scratch_shapes=[pltpu.VMEM((T * B_pad, G), jnp.float32)],
        compiler_params=pltpu.CompilerParams(vmem_limit_bytes=vmem_limit),
        cost_estimate=pl.CostEstimate(flops=flops,
                                      transcendentals=transcendentals,
                                      bytes_accessed=bytes_accessed),
    )(*args)

    out = out_full.reshape(num_layers, B_pad, NC_pad)[:, :B, :num_classes]
    return out.reshape(num_layers * B, num_classes)


def lstm_reference(x, raw_layers, fc_w, fc_b, *, hidden_size):
    """Pure-JAX reference using raw PyTorch-layout weights (gate order i,f,g,o)."""
    B, T, D = x.shape
    H = hidden_size
    inp = x
    h_finals = []
    for (w_ih, w_hh, b_ih, b_hh) in raw_layers:
        def step(carry, x_t, w_ih=w_ih, w_hh=w_hh, b=b_ih + b_hh):
            h, c = carry
            g = x_t @ w_ih.T + h @ w_hh.T + b
            i = jax.nn.sigmoid(g[:, :H])
            f = jax.nn.sigmoid(g[:, H:2 * H])
            gg = jnp.tanh(g[:, 2 * H:3 * H])
            o = jax.nn.sigmoid(g[:, 3 * H:])
            c = f * c + i * gg
            h = o * jnp.tanh(c)
            return (h, c), h

        carry = (jnp.zeros((B, H), jnp.float32), jnp.zeros((B, H), jnp.float32))
        (h, _), hs = lax.scan(step, carry, jnp.swapaxes(inp, 0, 1))
        inp = jnp.swapaxes(hs, 0, 1)
        h_finals.append(h)
    h_out = jnp.concatenate(h_finals, axis=0)   # == h_out.view(-1, H)
    return h_out @ fc_w.T + fc_b


if __name__ == "__main__":
    # Small shapes consistent with the PyTorch module (seq_length = 21).
    num_classes = 4
    input_size = 4
    hidden_size = 32
    num_layers = 2
    seq_length = 21
    batch = 2

    key = jax.random.PRNGKey(0)
    keys = iter(jax.random.split(key, 4 * num_layers + 3))

    # Deterministic init mirroring PyTorch's U(-1/sqrt(H), 1/sqrt(H)).
    k = 1.0 / float(hidden_size) ** 0.5
    raw_layers = []
    kernel_layers = []
    for l in range(num_layers):
        d_in = input_size if l == 0 else hidden_size
        w_ih = jax.random.uniform(next(keys), (4 * hidden_size, d_in),
                                  jnp.float32, -k, k)
        w_hh = jax.random.uniform(next(keys), (4 * hidden_size, hidden_size),
                                  jnp.float32, -k, k)
        b_ih = jax.random.uniform(next(keys), (4 * hidden_size,),
                                  jnp.float32, -k, k)
        b_hh = jax.random.uniform(next(keys), (4 * hidden_size,),
                                  jnp.float32, -k, k)
        raw_layers.append((w_ih, w_hh, b_ih, b_hh))
        kernel_layers.append(prep_lstm_layer(w_ih, w_hh, b_ih, b_hh,
                                             hidden_size))

    fc_w = jax.random.uniform(next(keys), (num_classes, hidden_size),
                              jnp.float32, -k, k)
    fc_b = jax.random.uniform(next(keys), (num_classes,), jnp.float32, -k, k)

    params = {"layers": kernel_layers, "fc": (fc_w.T, fc_b[None, :])}

    x = jax.random.normal(next(keys), (batch, seq_length, input_size),
                          jnp.float32)

    out = lstm_forward(x, params, num_layers=num_layers,
                       hidden_size=hidden_size, num_classes=num_classes)
    out = jax.block_until_ready(out)

    ref = lstm_reference(x, raw_layers, fc_w, fc_b, hidden_size=hidden_size)
    assert out.shape == (num_layers * batch, num_classes)
    assert jnp.allclose(out, ref, atol=1e-5, rtol=1e-5)
    print("KERNEL_OK")
</pallas_src>

<mosaic_0001>
module attributes {stable_mosaic.version = 11 : i64} {
  func.func @_lstm_kernel(%arg0: memref<168x4xf32, #tpu.memory_space<vmem>>, %arg1: memref<4x128xf32, #tpu.memory_space<vmem>>, %arg2: memref<32x128xf32, #tpu.memory_space<vmem>>, %arg3: memref<1x128xf32, #tpu.memory_space<vmem>>, %arg4: memref<32x128xf32, #tpu.memory_space<vmem>>, %arg5: memref<32x128xf32, #tpu.memory_space<vmem>>, %arg6: memref<1x128xf32, #tpu.memory_space<vmem>>, %arg7: memref<32x128xf32, #tpu.memory_space<vmem>>, %arg8: memref<1x128xf32, #tpu.memory_space<vmem>>, %arg9: memref<16x128xf32, #tpu.memory_space<vmem>>, %arg10: memref<168x128xf32, #tpu.memory_space<vmem>>) attributes {dimension_semantics = [], scalar_prefetch = 0 : i64, scratch_operands = 1 : i64, tpu.core_type = #tpu.core_type<tc>} {
    %c0 = arith.constant 0 : index
    %c0_0 = arith.constant 0 : index
    %0 = vector.load %arg1[%c0, %c0_0] : memref<4x128xf32, #tpu.memory_space<vmem>>, vector<4x128xf32>
    %c0_1 = arith.constant 0 : index
    %c0_2 = arith.constant 0 : index
    %1 = vector.load %arg4[%c0_1, %c0_2] : memref<32x128xf32, #tpu.memory_space<vmem>>, vector<32x128xf32>
    %c0_3 = arith.constant 0 : index
    %c0_4 = arith.constant 0 : index
    %2 = vector.load %arg2[%c0_3, %c0_4] : memref<32x128xf32, #tpu.memory_space<vmem>>, vector<32x128xf32>
    %c0_5 = arith.constant 0 : index
    %c0_6 = arith.constant 0 : index
    %3 = vector.load %arg5[%c0_5, %c0_6] : memref<32x128xf32, #tpu.memory_space<vmem>>, vector<32x128xf32>
    %c0_7 = arith.constant 0 : index
    %c0_8 = arith.constant 0 : index
    %4 = vector.load %arg3[%c0_7, %c0_8] : memref<1x128xf32, #tpu.memory_space<vmem>>, vector<1x128xf32>
    %c0_9 = arith.constant 0 : index
    %c0_10 = arith.constant 0 : index
    %5 = vector.load %arg6[%c0_9, %c0_10] : memref<1x128xf32, #tpu.memory_space<vmem>>, vector<1x128xf32>
    %c0_11 = arith.constant 0 : index
    %c0_12 = arith.constant 0 : index
    %6 = vector.load %arg0[%c0_11, %c0_12] : memref<168x4xf32, #tpu.memory_space<vmem>>, vector<168x4xf32>
    %cst = arith.constant dense<0.000000e+00> : vector<168x128xf32>
    %7 = tpu.matmul %6, %0, %cst {dimension_numbers = #tpu.dot_dimension_numbers<[1], [0], [0], [1], [0, 0, 1, 1], [], []>} : vector<168x4xf32>, vector<4x128xf32>, vector<168x128xf32> -> vector<168x128xf32>
    %8 = vector.broadcast %4 : vector<1x128xf32> to vector<168x128xf32>
    %9 = arith.addf %7, %8 : vector<168x128xf32>
    %c0_13 = arith.constant 0 : index
    %c0_14 = arith.constant 0 : index
    %10 = vector.load %arg10[%c0_13, %c0_14] : memref<168x128xf32, #tpu.memory_space<vmem>>, vector<168x128xf32>
    tpu.vector_store %arg10[%c0_13, %c0_14], %9 {strides = array<i32>} : memref<168x128xf32, #tpu.memory_space<vmem>>, vector<168x128xf32>,
    %11 = vector.shape_cast %5 : vector<1x128xf32> to vector<1x128xf32>
    %12 = vector.broadcast %11 : vector<1x128xf32> to vector<8x128xf32>
    %cst_15 = arith.constant 0.000000e+00 : f32
    %13 = vector.broadcast %cst_15 : f32 to vector<8x32xf32>
    %c0_16 = arith.constant 0 : index
    %c0_17 = arith.constant 0 : index
    %14 = vector.load %arg10[%c0_16, %c0_17] : memref<168x128xf32, #tpu.memory_space<vmem>>, vector<8x128xf32>
    %cst_18 = arith.constant dense<0.000000e+00> : vector<8x128xf32>
    %15 = tpu.matmul %13, %2, %cst_18 {dimension_numbers = #tpu.dot_dimension_numbers<[1], [0], [0], [1], [0, 0, 1, 1], [], []>} : vector<8x32xf32>, vector<32x128xf32>, vector<8x128xf32> -> vector<8x128xf32>
    %16 = arith.addf %14, %15 : vector<8x128xf32>
    %17 = vector.extract_strided_slice %16 {offsets = [0, 0], sizes = [8, 96], strides = [1, 1]} : vector<8x128xf32> to vector<8x96xf32>
    %18 = arith.negf %17 : vector<8x96xf32>
    %19 = math.exp %18 : vector<8x96xf32>
    %cst_19 = arith.constant 1.000000e+00 : f32
    %20 = vector.broadcast %cst_19 : f32 to vector<8x96xf32>
    %21 = arith.addf %20, %19 : vector<8x96xf32>
    %22 = arith.divf %20, %21 : vector<8x96xf32>
    %23 = vector.extract_strided_slice %16 {offsets = [0, 96], sizes = [8, 32], strides = [1, 1]} : vector<8x128xf32> to vector<8x32xf32>
    %24 = math.tanh %23 : vector<8x32xf32>
    %25 = vector.extract_strided_slice %22 {offsets = [0, 0], sizes = [8, 32], strides = [1, 1]} : vector<8x96xf32> to vector<8x32xf32>
    %26 = vector.extract_strided_slice %22 {offsets = [0, 32], sizes = [8, 32], strides = [1, 1]} : vector<8x96xf32> to vector<8x32xf32>
    %27 = vector.extract_strided_slice %22 {offsets = [0, 64], sizes = [8, 32], strides = [1, 1]} : vector<8x96xf32> to vector<8x32xf32>
    %28 = arith.mulf %26, %13 : vector<8x32xf32>
    %29 = arith.mulf %25, %24 : vector<8x32xf32>
    %30 = arith.addf %28, %29 : vector<8x32xf32>
    %31 = math.tanh %30 : vector<8x32xf32>
    %32 = arith.mulf %27, %31 : vector<8x32xf32>
    %c1_i32 = arith.constant 1 : i32
    %c8_i32 = arith.constant 8 : i32
    %33 = arith.muli %c1_i32, %c8_i32 : i32
    %34 = tpu.assume_multiple %33, 8 : i32
    %35 = arith.index_cast %34 : i32 to index
    %c0_20 = arith.constant 0 : index
    %36 = vector.load %arg10[%35, %c0_20] : memref<168x128xf32, #tpu.memory_space<vmem>>, vector<8x128xf32>
    %cst_21 = arith.constant dense<0.000000e+00> : vector<8x128xf32>
    %37 = tpu.matmul %32, %2, %cst_21 {dimension_numbers = #tpu.dot_dimension_numbers<[1], [0], [0], [1], [0, 0, 1, 1], [], []>} : vector<8x32xf32>, vector<32x128xf32>, vector<8x128xf32> -> vector<8x128xf32>
    %38 = arith.addf %36, %37 : vector<8x128xf32>
    %39 = vector.extract_strided_slice %38 {offsets = [0, 0], sizes = [8, 96], strides = [1, 1]} : vector<8x128xf32> to vector<8x96xf32>
    %40 = arith.negf %39 : vector<8x96xf32>
    %41 = math.exp %40 : vector<8x96xf32>
    %cst_22 = arith.constant 1.000000e+00 : f32
    %42 = vector.broadcast %cst_22 : f32 to vector<8x96xf32>
    %43 = arith.addf %42, %41 : vector<8x96xf32>
    %44 = arith.divf %42, %43 : vector<8x96xf32>
    %45 = vector.extract_strided_slice %38 {offsets = [0, 96], sizes = [8, 32], strides = [1, 1]} : vector<8x128xf32> to vector<8x32xf32>
    %46 = math.tanh %45 : vector<8x32xf32>
    %47 = vector.extract_strided_slice %44 {offsets = [0, 0], sizes = [8, 32], strides = [1, 1]} : vector<8x96xf32> to vector<8x32xf32>
    %48 = vector.extract_strided_slice %44 {offsets = [0, 32], sizes = [8, 32], strides = [1, 1]} : vector<8x96xf32> to vector<8x32xf32>
    %49 = vector.extract_strided_slice %44 {offsets = [0, 64], sizes = [8, 32], strides = [1, 1]} : vector<8x96xf32> to vector<8x32xf32>
    %50 = arith.mulf %48, %30 : vector<8x32xf32>
    %51 = arith.mulf %47, %46 : vector<8x32xf32>
    %52 = arith.addf %50, %51 : vector<8x32xf32>
    %53 = math.tanh %52 : vector<8x32xf32>
    %54 = arith.mulf %49, %53 : vector<8x32xf32>
    %cst_23 = arith.constant dense<0.000000e+00> : vector<8x128xf32>
    %55 = tpu.matmul %32, %1, %cst_23 {dimension_numbers = #tpu.dot_dimension_numbers<[1], [0], [0], [1], [0, 0, 1, 1], [], []>} : vector<8x32xf32>, vector<32x128xf32>, vector<8x128xf32> -> vector<8x128xf32>
    %cst_24 = arith.constant dense<0.000000e+00> : vector<8x128xf32>
    %56 = tpu.matmul %13, %3, %cst_24 {dimension_numbers = #tpu.dot_dimension_numbers<[1], [0], [0], [1], [0, 0, 1, 1], [], []>} : vector<8x32xf32>, vector<32x128xf32>, vector<8x128xf32> -> vector<8x128xf32>
    %57 = arith.addf %55, %56 : vector<8x128xf32>
    %58 = arith.addf %57, %12 : vector<8x128xf32>
    %59 = vector.extract_strided_slice %58 {offsets = [0, 0], sizes = [8, 96], strides = [1, 1]} : vector<8x128xf32> to vector<8x96xf32>
    %60 = arith.negf %59 : vector<8x96xf32>
    %61 = math.exp %60 : vector<8x96xf32>
    %cst_25 = arith.constant 1.000000e+00 : f32
    %62 = vector.broadcast %cst_25 : f32 to vector<8x96xf32>
    %63 = arith.addf %62, %61 : vector<8x96xf32>
    %64 = arith.divf %62, %63 : vector<8x96xf32>
    %65 = vector.extract_strided_slice %58 {offsets = [0, 96], sizes = [8, 32], strides = [1, 1]} : vector<8x128xf32> to vector<8x32xf32>
    %66 = math.tanh %65 : vector<8x32xf32>
    %67 = vector.extract_strided_slice %64 {offsets = [0, 0], sizes = [8, 32], strides = [1, 1]} : vector<8x96xf32> to vector<8x32xf32>
    %68 = vector.extract_strided_slice %64 {offsets = [0, 32], sizes = [8, 32], strides = [1, 1]} : vector<8x96xf32> to vector<8x32xf32>
    %69 = vector.extract_strided_slice %64 {offsets = [0, 64], sizes = [8, 32], strides = [1, 1]} : vector<8x96xf32> to vector<8x32xf32>
    %70 = arith.mulf %68, %13 : vector<8x32xf32>
    %71 = arith.mulf %67, %66 : vector<8x32xf32>
    %72 = arith.addf %70, %71 : vector<8x32xf32>
    %73 = math.tanh %72 : vector<8x32xf32>
    %74 = arith.mulf %69, %73 : vector<8x32xf32>
    %c2_i32 = arith.constant 2 : i32
    %c8_i32_26 = arith.constant 8 : i32
    %75 = arith.muli %c2_i32, %c8_i32_26 : i32
    %76 = tpu.assume_multiple %75, 8 : i32
    %77 = arith.index_cast %76 : i32 to index
    %c0_27 = arith.constant 0 : index
    %78 = vector.load %arg10[%77, %c0_27] : memref<168x128xf32, #tpu.memory_space<vmem>>, vector<8x128xf32>
    %cst_28 = arith.constant dense<0.000000e+00> : vector<8x128xf32>
    %79 = tpu.matmul %54, %2, %cst_28 {dimension_numbers = #tpu.dot_dimension_numbers<[1], [0], [0], [1], [0, 0, 1, 1], [], []>} : vector<8x32xf32>, vector<32x128xf32>, vector<8x128xf32> -> vector<8x128xf32>
    %80 = arith.addf %78, %79 : vector<8x128xf32>
    %81 = vector.extract_strided_slice %80 {offsets = [0, 0], sizes = [8, 96], strides = [1, 1]} : vector<8x128xf32> to vector<8x96xf32>
    %82 = arith.negf %81 : vector<8x96xf32>
    %83 = math.exp %82 : vector<8x96xf32>
    %cst_29 = arith.constant 1.000000e+00 : f32
    %84 = vector.broadcast %cst_29 : f32 to vector<8x96xf32>
    %85 = arith.addf %84, %83 : vector<8x96xf32>
    %86 = arith.divf %84, %85 : vector<8x96xf32>
    %87 = vector.extract_strided_slice %80 {offsets = [0, 96], sizes = [8, 32], strides = [1, 1]} : vector<8x128xf32> to vector<8x32xf32>
    %88 = math.tanh %87 : vector<8x32xf32>
    %89 = vector.extract_strided_slice %86 {offsets = [0, 0], sizes = [8, 32], strides = [1, 1]} : vector<8x96xf32> to vector<8x32xf32>
    %90 = vector.extract_strided_slice %86 {offsets = [0, 32], sizes = [8, 32], strides = [1, 1]} : vector<8x96xf32> to vector<8x32xf32>
    %91 = vector.extract_strided_slice %86 {offsets = [0, 64], sizes = [8, 32], strides = [1, 1]} : vector<8x96xf32> to vector<8x32xf32>
    %92 = arith.mulf %90, %52 : vector<8x32xf32>
    %93 = arith.mulf %89, %88 : vector<8x32xf32>
    %94 = arith.addf %92, %93 : vector<8x32xf32>
    %95 = math.tanh %94 : vector<8x32xf32>
    %96 = arith.mulf %91, %95 : vector<8x32xf32>
    %cst_30 = arith.constant dense<0.000000e+00> : vector<8x128xf32>
    %97 = tpu.matmul %54, %1, %cst_30 {dimension_numbers = #tpu.dot_dimension_numbers<[1], [0], [0], [1], [0, 0, 1, 1], [], []>} : vector<8x32xf32>, vector<32x128xf32>, vector<8x128xf32> -> vector<8x128xf32>
    %cst_31 = arith.constant dense<0.000000e+00> : vector<8x128xf32>
    %98 = tpu.matmul %74, %3, %cst_31 {dimension_numbers = #tpu.dot_dimension_numbers<[1], [0], [0], [1], [0, 0, 1, 1], [], []>} : vector<8x32xf32>, vector<32x128xf32>, vector<8x128xf32> -> vector<8x128xf32>
    %99 = arith.addf %97, %98 : vector<8x128xf32>
    %100 = arith.addf %99, %12 : vector<8x128xf32>
    %101 = vector.extract_strided_slice %100 {offsets = [0, 0], sizes = [8, 96], strides = [1, 1]} : vector<8x128xf32> to vector<8x96xf32>
    %102 = arith.negf %101 : vector<8x96xf32>
    %103 = math.exp %102 : vector<8x96xf32>
    %cst_32 = arith.constant 1.000000e+00 : f32
    %104 = vector.broadcast %cst_32 : f32 to vector<8x96xf32>
    %105 = arith.addf %104, %103 : vector<8x96xf32>
    %106 = arith.divf %104, %105 : vector<8x96xf32>
    %107 = vector.extract_strided_slice %100 {offsets = [0, 96], sizes = [8, 32], strides = [1, 1]} : vector<8x128xf32> to vector<8x32xf32>
    %108 = math.tanh %107 : vector<8x32xf32>
    %109 = vector.extract_strided_slice %106 {offsets = [0, 0], sizes = [8, 32], strides = [1, 1]} : vector<8x96xf32> to vector<8x32xf32>
    %110 = vector.extract_strided_slice %106 {offsets = [0, 32], sizes = [8, 32], strides = [1, 1]} : vector<8x96xf32> to vector<8x32xf32>
    %111 = vector.extract_strided_slice %106 {offsets = [0, 64], sizes = [8, 32], strides = [1, 1]} : vector<8x96xf32> to vector<8x32xf32>
    %112 = arith.mulf %110, %72 : vector<8x32xf32>
    %113 = arith.mulf %109, %108 : vector<8x32xf32>
    %114 = arith.addf %112, %113 : vector<8x32xf32>
    %115 = math.tanh %114 : vector<8x32xf32>
    %116 = arith.mulf %111, %115 : vector<8x32xf32>
    %c3_i32 = arith.constant 3 : i32
    %c8_i32_33 = arith.constant 8 : i32
    %117 = arith.muli %c3_i32, %c8_i32_33 : i32
    %118 = tpu.assume_multiple %117, 8 : i32
    %119 = arith.index_cast %118 : i32 to index
    %c0_34 = arith.constant 0 : index
    %120 = vector.load %arg10[%119, %c0_34] : memref<168x128xf32, #tpu.memory_space<vmem>>, vector<8x128xf32>
    %cst_35 = arith.constant dense<0.000000e+00> : vector<8x128xf32>
    %121 = tpu.matmul %96, %2, %cst_35 {dimension_numbers = #tpu.dot_dimension_numbers<[1], [0], [0], [1], [0, 0, 1, 1], [], []>} : vector<8x32xf32>, vector<32x128xf32>, vector<8x128xf32> -> vector<8x128xf32>
    %122 = arith.addf %120, %121 : vector<8x128xf32>
    %123 = vector.extract_strided_slice %122 {offsets = [0, 0], sizes = [8, 96], strides = [1, 1]} : vector<8x128xf32> to vector<8x96xf32>
    %124 = arith.negf %123 : vector<8x96xf32>
    %125 = math.exp %124 : vector<8x96xf32>
    %cst_36 = arith.constant 1.000000e+00 : f32
    %126 = vector.broadcast %cst_36 : f32 to vector<8x96xf32>
    %127 = arith.addf %126, %125 : vector<8x96xf32>
    %128 = arith.divf %126, %127 : vector<8x96xf32>
    %129 = vector.extract_strided_slice %122 {offsets = [0, 96], sizes = [8, 32], strides = [1, 1]} : vector<8x128xf32> to vector<8x32xf32>
    %130 = math.tanh %129 : vector<8x32xf32>
    %131 = vector.extract_strided_slice %128 {offsets = [0, 0], sizes = [8, 32], strides = [1, 1]} : vector<8x96xf32> to vector<8x32xf32>
    %132 = vector.extract_strided_slice %128 {offsets = [0, 32], sizes = [8, 32], strides = [1, 1]} : vector<8x96xf32> to vector<8x32xf32>
    %133 = vector.extract_strided_slice %128 {offsets = [0, 64], sizes = [8, 32], strides = [1, 1]} : vector<8x96xf32> to vector<8x32xf32>
    %134 = arith.mulf %132, %94 : vector<8x32xf32>
    %135 = arith.mulf %131, %130 : vector<8x32xf32>
    %136 = arith.addf %134, %135 : vector<8x32xf32>
    %137 = math.tanh %136 : vector<8x32xf32>
    %138 = arith.mulf %133, %137 : vector<8x32xf32>
    %cst_37 = arith.constant dense<0.000000e+00> : vector<8x128xf32>
    %139 = tpu.matmul %96, %1, %cst_37 {dimension_numbers = #tpu.dot_dimension_numbers<[1], [0], [0], [1], [0, 0, 1, 1], [], []>} : vector<8x32xf32>, vector<32x128xf32>, vector<8x128xf32> -> vector<8x128xf32>
    %cst_38 = arith.constant dense<0.000000e+00> : vector<8x128xf32>
    %140 = tpu.matmul %116, %3, %cst_38 {dimension_numbers = #tpu.dot_dimension_numbers<[1], [0], [0], [1], [0, 0, 1, 1], [], []>} : vector<8x32xf32>, vector<32x128xf32>, vector<8x128xf32> -> vector<8x128xf32>
    %141 = arith.addf %139, %140 : vector<8x128xf32>
    %142 = arith.addf %141, %12 : vector<8x128xf32>
    %143 = vector.extract_strided_slice %142 {offsets = [0, 0], sizes = [8, 96], strides = [1, 1]} : vector<8x128xf32> to vector<8x96xf32>
    %144 = arith.negf %143 : vector<8x96xf32>
    %145 = math.exp %144 : vector<8x96xf32>
    %cst_39 = arith.constant 1.000000e+00 : f32
    %146 = vector.broadcast %cst_39 : f32 to vector<8x96xf32>
    %147 = arith.addf %146, %145 : vector<8x96xf32>
    %148 = arith.divf %146, %147 : vector<8x96xf32>
    %149 = vector.extract_strided_slice %142 {offsets = [0, 96], sizes = [8, 32], strides = [1, 1]} : vector<8x128xf32> to vector<8x32xf32>
    %150 = math.tanh %149 : vector<8x32xf32>
    %151 = vector.extract_strided_slice %148 {offsets = [0, 0], sizes = [8, 32], strides = [1, 1]} : vector<8x96xf32> to vector<8x32xf32>
    %152 = vector.extract_strided_slice %148 {offsets = [0, 32], sizes = [8, 32], strides = [1, 1]} : vector<8x96xf32> to vector<8x32xf32>
    %153 = vector.extract_strided_slice %148 {offsets = [0, 64], sizes = [8, 32], strides = [1, 1]} : vector<8x96xf32> to vector<8x32xf32>
    %154 = arith.mulf %152, %114 : vector<8x32xf32>
    %155 = arith.mulf %151, %150 : vector<8x32xf32>
    %156 = arith.addf %154, %155 : vector<8x32xf32>
    %157 = math.tanh %156 : vector<8x32xf32>
    %158 = arith.mulf %153, %157 : vector<8x32xf32>
    %c4_i32 = arith.constant 4 : i32
    %c8_i32_40 = arith.constant 8 : i32
    %159 = arith.muli %c4_i32, %c8_i32_40 : i32
    %160 = tpu.assume_multiple %159, 8 : i32
    %161 = arith.index_cast %160 : i32 to index
    %c0_41 = arith.constant 0 : index
    %162 = vector.load %arg10[%161, %c0_41] : memref<168x128xf32, #tpu.memory_space<vmem>>, vector<8x128xf32>
    %cst_42 = arith.constant dense<0.000000e+00> : vector<8x128xf32>
    %163 = tpu.matmul %138, %2, %cst_42 {dimension_numbers = #tpu.dot_dimension_numbers<[1], [0], [0], [1], [0, 0, 1, 1], [], []>} : vector<8x32xf32>, vector<32x128xf32>, vector<8x128xf32> -> vector<8x128xf32>
    %164 = arith.addf %162, %163 : vector<8x128xf32>
    %165 = vector.extract_strided_slice %164 {offsets = [0, 0], sizes = [8, 96], strides = [1, 1]} : vector<8x128xf32> to vector<8x96xf32>
    %166 = arith.negf %165 : vector<8x96xf32>
    %167 = math.exp %166 : vector<8x96xf32>
    %cst_43 = arith.constant 1.000000e+00 : f32
    %168 = vector.broadcast %cst_43 : f32 to vector<8x96xf32>
    %169 = arith.addf %168, %167 : vector<8x96xf32>
    %170 = arith.divf %168, %169 : vector<8x96xf32>
    %171 = vector.extract_strided_slice %164 {offsets = [0, 96], sizes = [8, 32], strides = [1, 1]} : vector<8x128xf32> to vector<8x32xf32>
    %172 = math.tanh %171 : vector<8x32xf32>
    %173 = vector.extract_strided_slice %170 {offsets = [0, 0], sizes = [8, 32], strides = [1, 1]} : vector<8x96xf32> to vector<8x32xf32>
    %174 = vector.extract_strided_slice %170 {offsets = [0, 32], sizes = [8, 32], strides = [1, 1]} : vector<8x96xf32> to vector<8x32xf32>
    %175 = vector.extract_strided_slice %170 {offsets = [0, 64], sizes = [8, 32], strides = [1, 1]} : vector<8x96xf32> to vector<8x32xf32>
    %176 = arith.mulf %174, %136 : vector<8x32xf32>
    %177 = arith.mulf %173, %172 : vector<8x32xf32>
    %178 = arith.addf %176, %177 : vector<8x32xf32>
    %179 = math.tanh %178 : vector<8x32xf32>
    %180 = arith.mulf %175, %179 : vector<8x32xf32>
    %cst_44 = arith.constant dense<0.000000e+00> : vector<8x128xf32>
    %181 = tpu.matmul %138, %1, %cst_44 {dimension_numbers = #tpu.dot_dimension_numbers<[1], [0], [0], [1], [0, 0, 1, 1], [], []>} : vector<8x32xf32>, vector<32x128xf32>, vector<8x128xf32> -> vector<8x128xf32>
    %cst_45 = arith.constant dense<0.000000e+00> : vector<8x128xf32>
    %182 = tpu.matmul %158, %3, %cst_45 {dimension_numbers = #tpu.dot_dimension_numbers<[1], [0], [0], [1], [0, 0, 1, 1], [], []>} : vector<8x32xf32>, vector<32x128xf32>, vector<8x128xf32> -> vector<8x128xf32>
    %183 = arith.addf %181, %182 : vector<8x128xf32>
    %184 = arith.addf %183, %12 : vector<8x128xf32>
    %185 = vector.extract_strided_slice %184 {offsets = [0, 0], sizes = [8, 96], strides = [1, 1]} : vector<8x128xf32> to vector<8x96xf32>
    %186 = arith.negf %185 : vector<8x96xf32>
    %187 = math.exp %186 : vector<8x96xf32>
    %cst_46 = arith.constant 1.000000e+00 : f32
    %188 = vector.broadcast %cst_46 : f32 to vector<8x96xf32>
    %189 = arith.addf %188, %187 : vector<8x96xf32>
    %190 = arith.divf %188, %189 : vector<8x96xf32>
    %191 = vector.extract_strided_slice %184 {offsets = [0, 96], sizes = [8, 32], strides = [1, 1]} : vector<8x128xf32> to vector<8x32xf32>
    %192 = math.tanh %191 : vector<8x32xf32>
    %193 = vector.extract_strided_slice %190 {offsets = [0, 0], sizes = [8, 32], strides = [1, 1]} : vector<8x96xf32> to vector<8x32xf32>
    %194 = vector.extract_strided_slice %190 {offsets = [0, 32], sizes = [8, 32], strides = [1, 1]} : vector<8x96xf32> to vector<8x32xf32>
    %195 = vector.extract_strided_slice %190 {offsets = [0, 64], sizes = [8, 32], strides = [1, 1]} : vector<8x96xf32> to vector<8x32xf32>
    %196 = arith.mulf %194, %156 : vector<8x32xf32>
    %197 = arith.mulf %193, %192 : vector<8x32xf32>
    %198 = arith.addf %196, %197 : vector<8x32xf32>
    %199 = math.tanh %198 : vector<8x32xf32>
    %200 = arith.mulf %195, %199 : vector<8x32xf32>
    %c5_i32 = arith.constant 5 : i32
    %c8_i32_47 = arith.constant 8 : i32
    %201 = arith.muli %c5_i32, %c8_i32_47 : i32
    %202 = tpu.assume_multiple %201, 8 : i32
    %203 = arith.index_cast %202 : i32 to index
    %c0_48 = arith.constant 0 : index
    %204 = vector.load %arg10[%203, %c0_48] : memref<168x128xf32, #tpu.memory_space<vmem>>, vector<8x128xf32>
    %cst_49 = arith.constant dense<0.000000e+00> : vector<8x128xf32>
    %205 = tpu.matmul %180, %2, %cst_49 {dimension_numbers = #tpu.dot_dimension_numbers<[1], [0], [0], [1], [0, 0, 1, 1], [], []>} : vector<8x32xf32>, vector<32x128xf32>, vector<8x128xf32> -> vector<8x128xf32>
    %206 = arith.addf %204, %205 : vector<8x128xf32>
    %207 = vector.extract_strided_slice %206 {offsets = [0, 0], sizes = [8, 96], strides = [1, 1]} : vector<8x128xf32> to vector<8x96xf32>
    %208 = arith.negf %207 : vector<8x96xf32>
    %209 = math.exp %208 : vector<8x96xf32>
    %cst_50 = arith.constant 1.000000e+00 : f32
    %210 = vector.broadcast %cst_50 : f32 to vector<8x96xf32>
    %211 = arith.addf %210, %209 : vector<8x96xf32>
    %212 = arith.divf %210, %211 : vector<8x96xf32>
    %213 = vector.extract_strided_slice %206 {offsets = [0, 96], sizes = [8, 32], strides = [1, 1]} : vector<8x128xf32> to vector<8x32xf32>
    %214 = math.tanh %213 : vector<8x32xf32>
    %215 = vector.extract_strided_slice %212 {offsets = [0, 0], sizes = [8, 32], strides = [1, 1]} : vector<8x96xf32> to vector<8x32xf32>
    %216 = vector.extract_strided_slice %212 {offsets = [0, 32], sizes = [8, 32], strides = [1, 1]} : vector<8x96xf32> to vector<8x32xf32>
    %217 = vector.extract_strided_slice %212 {offsets = [0, 64], sizes = [8, 32], strides = [1, 1]} : vector<8x96xf32> to vector<8x32xf32>
    %218 = arith.mulf %216, %178 : vector<8x32xf32>
    %219 = arith.mulf %215, %214 : vector<8x32xf32>
    %220 = arith.addf %218, %219 : vector<8x32xf32>
    %221 = math.tanh %220 : vector<8x32xf32>
    %222 = arith.mulf %217, %221 : vector<8x32xf32>
    %cst_51 = arith.constant dense<0.000000e+00> : vector<8x128xf32>
    %223 = tpu.matmul %180, %1, %cst_51 {dimension_numbers = #tpu.dot_dimension_numbers<[1], [0], [0], [1], [0, 0, 1, 1], [], []>} : vector<8x32xf32>, vector<32x128xf32>, vector<8x128xf32> -> vector<8x128xf32>
    %cst_52 = arith.constant dense<0.000000e+00> : vector<8x128xf32>
    %224 = tpu.matmul %200, %3, %cst_52 {dimension_numbers = #tpu.dot_dimension_numbers<[1], [0], [0], [1], [0, 0, 1, 1], [], []>} : vector<8x32xf32>, vector<32x128xf32>, vector<8x128xf32> -> vector<8x128xf32>
    %225 = arith.addf %223, %224 : vector<8x128xf32>
    %226 = arith.addf %225, %12 : vector<8x128xf32>
    %227 = vector.extract_strided_slice %226 {offsets = [0, 0], sizes = [8, 96], strides = [1, 1]} : vector<8x128xf32> to vector<8x96xf32>
    %228 = arith.negf %227 : vector<8x96xf32>
    %229 = math.exp %228 : vector<8x96xf32>
    %cst_53 = arith.constant 1.000000e+00 : f32
    %230 = vector.broadcast %cst_53 : f32 to vector<8x96xf32>
    %231 = arith.addf %230, %229 : vector<8x96xf32>
    %232 = arith.divf %230, %231 : vector<8x96xf32>
    %233 = vector.extract_strided_slice %226 {offsets = [0, 96], sizes = [8, 32], strides = [1, 1]} : vector<8x128xf32> to vector<8x32xf32>
    %234 = math.tanh %233 : vector<8x32xf32>
    %235 = vector.extract_strided_slice %232 {offsets = [0, 0], sizes = [8, 32], strides = [1, 1]} : vector<8x96xf32> to vector<8x32xf32>
    %236 = vector.extract_strided_slice %232 {offsets = [0, 32], sizes = [8, 32], strides = [1, 1]} : vector<8x96xf32> to vector<8x32xf32>
    %237 = vector.extract_strided_slice %232 {offsets = [0, 64], sizes = [8, 32], strides = [1, 1]} : vector<8x96xf32> to vector<8x32xf32>
    %238 = arith.mulf %236, %198 : vector<8x32xf32>
    %239 = arith.mulf %235, %234 : vector<8x32xf32>
    %240 = arith.addf %238, %239 : vector<8x32xf32>
    %241 = math.tanh %240 : vector<8x32xf32>
    %242 = arith.mulf %237, %241 : vector<8x32xf32>
    %c6_i32 = arith.constant 6 : i32
    %c8_i32_54 = arith.constant 8 : i32
    %243 = arith.muli %c6_i32, %c8_i32_54 : i32
    %244 = tpu.assume_multiple %243, 8 : i32
    %245 = arith.index_cast %244 : i32 to index
    %c0_55 = arith.constant 0 : index
    %246 = vector.load %arg10[%245, %c0_55] : memref<168x128xf32, #tpu.memory_space<vmem>>, vector<8x128xf32>
    %cst_56 = arith.constant dense<0.000000e+00> : vector<8x128xf32>
    %247 = tpu.matmul %222, %2, %cst_56 {dimension_numbers = #tpu.dot_dimension_numbers<[1], [0], [0], [1], [0, 0, 1, 1], [], []>} : vector<8x32xf32>, vector<32x128xf32>, vector<8x128xf32> -> vector<8x128xf32>
    %248 = arith.addf %246, %247 : vector<8x128xf32>
    %249 = vector.extract_strided_slice %248 {offsets = [0, 0], sizes = [8, 96], strides = [1, 1]} : vector<8x128xf32> to vector<8x96xf32>
    %250 = arith.negf %249 : vector<8x96xf32>
    %251 = math.exp %250 : vector<8x96xf32>
    %cst_57 = arith.constant 1.000000e+00 : f32
    %252 = vector.broadcast %cst_57 : f32 to vector<8x96xf32>
    %253 = arith.addf %252, %251 : vector<8x96xf32>
    %254 = arith.divf %252, %253 : vector<8x96xf32>
    %255 = vector.extract_strided_slice %248 {offsets = [0, 96], sizes = [8, 32], strides = [1, 1]} : vector<8x128xf32> to vector<8x32xf32>
    %256 = math.tanh %255 : vector<8x32xf32>
    %257 = vector.extract_strided_slice %254 {offsets = [0, 0], sizes = [8, 32], strides = [1, 1]} : vector<8x96xf32> to vector<8x32xf32>
    %258 = vector.extract_strided_slice %254 {offsets = [0, 32], sizes = [8, 32], strides = [1, 1]} : vector<8x96xf32> to vector<8x32xf32>
    %259 = vector.extract_strided_slice %254 {offsets = [0, 64], sizes = [8, 32], strides = [1, 1]} : vector<8x96xf32> to vector<8x32xf32>
    %260 = arith.mulf %258, %220 : vector<8x32xf32>
    %261 = arith.mulf %257, %256 : vector<8x32xf32>
    %262 = arith.addf %260, %261 : vector<8x32xf32>
    %263 = math.tanh %262 : vector<8x32xf32>
    %264 = arith.mulf %259, %263 : vector<8x32xf32>
    %cst_58 = arith.constant dense<0.000000e+00> : vector<8x128xf32>
    %265 = tpu.matmul %222, %1, %cst_58 {dimension_numbers = #tpu.dot_dimension_numbers<[1], [0], [0], [1], [0, 0, 1, 1], [], []>} : vector<8x32xf32>, vector<32x128xf32>, vector<8x128xf32> -> vector<8x128xf32>
    %cst_59 = arith.constant dense<0.000000e+00> : vector<8x128xf32>
    %266 = tpu.matmul %242, %3, %cst_59 {dimension_numbers = #tpu.dot_dimension_numbers<[1], [0], [0], [1], [0, 0, 1, 1], [], []>} : vector<8x32xf32>, vector<32x128xf32>, vector<8x128xf32> -> vector<8x128xf32>
    %267 = arith.addf %265, %266 : vector<8x128xf32>
    %268 = arith.addf %267, %12 : vector<8x128xf32>
    %269 = vector.extract_strided_slice %268 {offsets = [0, 0], sizes = [8, 96], strides = [1, 1]} : vector<8x128xf32> to vector<8x96xf32>
    %270 = arith.negf %269 : vector<8x96xf32>
    %271 = math.exp %270 : vector<8x96xf32>
    %cst_60 = arith.constant 1.000000e+00 : f32
    %272 = vector.broadcast %cst_60 : f32 to vector<8x96xf32>
    %273 = arith.addf %272, %271 : vector<8x96xf32>
    %274 = arith.divf %272, %273 : vector<8x96xf32>
    %275 = vector.extract_strided_slice %268 {offsets = [0, 96], sizes = [8, 32], strides = [1, 1]} : vector<8x128xf32> to vector<8x32xf32>
    %276 = math.tanh %275 : vector<8x32xf32>
    %277 = vector.extract_strided_slice %274 {offsets = [0, 0], sizes = [8, 32], strides = [1, 1]} : vector<8x96xf32> to vector<8x32xf32>
    %278 = vector.extract_strided_slice %274 {offsets = [0, 32], sizes = [8, 32], strides = [1, 1]} : vector<8x96xf32> to vector<8x32xf32>
    %279 = vector.extract_strided_slice %274 {offsets = [0, 64], sizes = [8, 32], strides = [1, 1]} : vector<8x96xf32> to vector<8x32xf32>
    %280 = arith.mulf %278, %240 : vector<8x32xf32>
    %281 = arith.mulf %277, %276 : vector<8x32xf32>
    %282 = arith.addf %280, %281 : vector<8x32xf32>
    %283 = math.tanh %282 : vector<8x32xf32>
    %284 = arith.mulf %279, %283 : vector<8x32xf32>
    %c7_i32 = arith.constant 7 : i32
    %c8_i32_61 = arith.constant 8 : i32
    %285 = arith.muli %c7_i32, %c8_i32_61 : i32
    %286 = tpu.assume_multiple %285, 8 : i32
    %287 = arith.index_cast %286 : i32 to index
    %c0_62 = arith.constant 0 : index
    %288 = vector.load %arg10[%287, %c0_62] : memref<168x128xf32, #tpu.memory_space<vmem>>, vector<8x128xf32>
    %cst_63 = arith.constant dense<0.000000e+00> : vector<8x128xf32>
    %289 = tpu.matmul %264, %2, %cst_63 {dimension_numbers = #tpu.dot_dimension_numbers<[1], [0], [0], [1], [0, 0, 1, 1], [], []>} : vector<8x32xf32>, vector<32x128xf32>, vector<8x128xf32> -> vector<8x128xf32>
    %290 = arith.addf %288, %289 : vector<8x128xf32>
    %291 = vector.extract_strided_slice %290 {offsets = [0, 0], sizes = [8, 96], strides = [1, 1]} : vector<8x128xf32> to vector<8x96xf32>
    %292 = arith.negf %291 : vector<8x96xf32>
    %293 = math.exp %292 : vector<8x96xf32>
    %cst_64 = arith.constant 1.000000e+00 : f32
    %294 = vector.broadcast %cst_64 : f32 to vector<8x96xf32>
    %295 = arith.addf %294, %293 : vector<8x96xf32>
    %296 = arith.divf %294, %295 : vector<8x96xf32>
    %297 = vector.extract_strided_slice %290 {offsets = [0, 96], sizes = [8, 32], strides = [1, 1]} : vector<8x128xf32> to vector<8x32xf32>
    %298 = math.tanh %297 : vector<8x32xf32>
    %299 = vector.extract_strided_slice %296 {offsets = [0, 0], sizes = [8, 32], strides = [1, 1]} : vector<8x96xf32> to vector<8x32xf32>
    %300 = vector.extract_strided_slice %296 {offsets = [0, 32], sizes = [8, 32], strides = [1, 1]} : vector<8x96xf32> to vector<8x32xf32>
    %301 = vector.extract_strided_slice %296 {offsets = [0, 64], sizes = [8, 32], strides = [1, 1]} : vector<8x96xf32> to vector<8x32xf32>
    %302 = arith.mulf %300, %262 : vector<8x32xf32>
    %303 = arith.mulf %299, %298 : vector<8x32xf32>
    %304 = arith.addf %302, %303 : vector<8x32xf32>
    %305 = math.tanh %304 : vector<8x32xf32>
    %306 = arith.mulf %301, %305 : vector<8x32xf32>
    %cst_65 = arith.constant dense<0.000000e+00> : vector<8x128xf32>
    %307 = tpu.matmul %264, %1, %cst_65 {dimension_numbers = #tpu.dot_dimension_numbers<[1], [0], [0], [1], [0, 0, 1, 1], [], []>} : vector<8x32xf32>, vector<32x128xf32>, vector<8x128xf32> -> vector<8x128xf32>
    %cst_66 = arith.constant dense<0.000000e+00> : vector<8x128xf32>
    %308 = tpu.matmul %284, %3, %cst_66 {dimension_numbers = #tpu.dot_dimension_numbers<[1], [0], [0], [1], [0, 0, 1, 1], [], []>} : vector<8x32xf32>, vector<32x128xf32>, vector<8x128xf32> -> vector<8x128xf32>
    %309 = arith.addf %307, %308 : vector<8x128xf32>
    %310 = arith.addf %309, %12 : vector<8x128xf32>
    %311 = vector.extract_strided_slice %310 {offsets = [0, 0], sizes = [8, 96], strides = [1, 1]} : vector<8x128xf32> to vector<8x96xf32>
    %312 = arith.negf %311 : vector<8x96xf32>
    %313 = math.exp %312 : vector<8x96xf32>
    %cst_67 = arith.constant 1.000000e+00 : f32
    %314 = vector.broadcast %cst_67 : f32 to vector<8x96xf32>
    %315 = arith.addf %314, %313 : vector<8x96xf32>
    %316 = arith.divf %314, %315 : vector<8x96xf32>
    %317 = vector.extract_strided_slice %310 {offsets = [0, 96], sizes = [8, 32], strides = [1, 1]} : vector<8x128xf32> to vector<8x32xf32>
    %318 = math.tanh %317 : vector<8x32xf32>
    %319 = vector.extract_strided_slice %316 {offsets = [0, 0], sizes = [8, 32], strides = [1, 1]} : vector<8x96xf32> to vector<8x32xf32>
    %320 = vector.extract_strided_slice %316 {offsets = [0, 32], sizes = [8, 32], strides = [1, 1]} : vector<8x96xf32> to vector<8x32xf32>
    %321 = vector.extract_strided_slice %316 {offsets = [0, 64], sizes = [8, 32], strides = [1, 1]} : vector<8x96xf32> to vector<8x32xf32>
    %322 = arith.mulf %320, %282 : vector<8x32xf32>
    %323 = arith.mulf %319, %318 : vector<8x32xf32>
    %324 = arith.addf %322, %323 : vector<8x32xf32>
    %325 = math.tanh %324 : vector<8x32xf32>
    %326 = arith.mulf %321, %325 : vector<8x32xf32>
    %c8_i32_68 = arith.constant 8 : i32
    %c8_i32_69 = arith.constant 8 : i32
    %327 = arith.muli %c8_i32_68, %c8_i32_69 : i32
    %328 = tpu.assume_multiple %327, 8 : i32
    %329 = arith.index_cast %328 : i32 to index
    %c0_70 = arith.constant 0 : index
    %330 = vector.load %arg10[%329, %c0_70] : memref<168x128xf32, #tpu.memory_space<vmem>>, vector<8x128xf32>
    %cst_71 = arith.constant dense<0.000000e+00> : vector<8x128xf32>
    %331 = tpu.matmul %306, %2, %cst_71 {dimension_numbers = #tpu.dot_dimension_numbers<[1], [0], [0], [1], [0, 0, 1, 1], [], []>} : vector<8x32xf32>, vector<32x128xf32>, vector<8x128xf32> -> vector<8x128xf32>
    %332 = arith.addf %330, %331 : vector<8x128xf32>
    %333 = vector.extract_strided_slice %332 {offsets = [0, 0], sizes = [8, 96], strides = [1, 1]} : vector<8x128xf32> to vector<8x96xf32>
    %334 = arith.negf %333 : vector<8x96xf32>
    %335 = math.exp %334 : vector<8x96xf32>
    %cst_72 = arith.constant 1.000000e+00 : f32
    %336 = vector.broadcast %cst_72 : f32 to vector<8x96xf32>
    %337 = arith.addf %336, %335 : vector<8x96xf32>
    %338 = arith.divf %336, %337 : vector<8x96xf32>
    %339 = vector.extract_strided_slice %332 {offsets = [0, 96], sizes = [8, 32], strides = [1, 1]} : vector<8x128xf32> to vector<8x32xf32>
    %340 = math.tanh %339 : vector<8x32xf32>
    %341 = vector.extract_strided_slice %338 {offsets = [0, 0], sizes = [8, 32], strides = [1, 1]} : vector<8x96xf32> to vector<8x32xf32>
    %342 = vector.extract_strided_slice %338 {offsets = [0, 32], sizes = [8, 32], strides = [1, 1]} : vector<8x96xf32> to vector<8x32xf32>
    %343 = vector.extract_strided_slice %338 {offsets = [0, 64], sizes = [8, 32], strides = [1, 1]} : vector<8x96xf32> to vector<8x32xf32>
    %344 = arith.mulf %342, %304 : vector<8x32xf32>
    %345 = arith.mulf %341, %340 : vector<8x32xf32>
    %346 = arith.addf %344, %345 : vector<8x32xf32>
    %347 = math.tanh %346 : vector<8x32xf32>
    %348 = arith.mulf %343, %347 : vector<8x32xf32>
    %cst_73 = arith.constant dense<0.000000e+00> : vector<8x128xf32>
    %349 = tpu.matmul %306, %1, %cst_73 {dimension_numbers = #tpu.dot_dimension_numbers<[1], [0], [0], [1], [0, 0, 1, 1], [], []>} : vector<8x32xf32>, vector<32x128xf32>, vector<8x128xf32> -> vector<8x128xf32>
    %cst_74 = arith.constant dense<0.000000e+00> : vector<8x128xf32>
    %350 = tpu.matmul %326, %3, %cst_74 {dimension_numbers = #tpu.dot_dimension_numbers<[1], [0], [0], [1], [0, 0, 1, 1], [], []>} : vector<8x32xf32>, vector<32x128xf32>, vector<8x128xf32> -> vector<8x128xf32>
    %351 = arith.addf %349, %350 : vector<8x128xf32>
    %352 = arith.addf %351, %12 : vector<8x128xf32>
    %353 = vector.extract_strided_slice %352 {offsets = [0, 0], sizes = [8, 96], strides = [1, 1]} : vector<8x128xf32> to vector<8x96xf32>
    %354 = arith.negf %353 : vector<8x96xf32>
    %355 = math.exp %354 : vector<8x96xf32>
    %cst_75 = arith.constant 1.000000e+00 : f32
    %356 = vector.broadcast %cst_75 : f32 to vector<8x96xf32>
    %357 = arith.addf %356, %355 : vector<8x96xf32>
    %358 = arith.divf %356, %357 : vector<8x96xf32>
    %359 = vector.extract_strided_slice %352 {offsets = [0, 96], sizes = [8, 32], strides = [1, 1]} : vector<8x128xf32> to vector<8x32xf32>
    %360 = math.tanh %359 : vector<8x32xf32>
    %361 = vector.extract_strided_slice %358 {offsets = [0, 0], sizes = [8, 32], strides = [1, 1]} : vector<8x96xf32> to vector<8x32xf32>
    %362 = vector.extract_strided_slice %358 {offsets = [0, 32], sizes = [8, 32], strides = [1, 1]} : vector<8x96xf32> to vector<8x32xf32>
    %363 = vector.extract_strided_slice %358 {offsets = [0, 64], sizes = [8, 32], strides = [1, 1]} : vector<8x96xf32> to vector<8x32xf32>
    %364 = arith.mulf %362, %324 : vector<8x32xf32>
    %365 = arith.mulf %361, %360 : vector<8x32xf32>
    %366 = arith.addf %364, %365 : vector<8x32xf32>
    %367 = math.tanh %366 : vector<8x32xf32>
    %368 = arith.mulf %363, %367 : vector<8x32xf32>
    %c9_i32 = arith.constant 9 : i32
    %c8_i32_76 = arith.constant 8 : i32
    %369 = arith.muli %c9_i32, %c8_i32_76 : i32
    %370 = tpu.assume_multiple %369, 8 : i32
    %371 = arith.index_cast %370 : i32 to index
    %c0_77 = arith.constant 0 : index
    %372 = vector.load %arg10[%371, %c0_77] : memref<168x128xf32, #tpu.memory_space<vmem>>, vector<8x128xf32>
    %cst_78 = arith.constant dense<0.000000e+00> : vector<8x128xf32>
    %373 = tpu.matmul %348, %2, %cst_78 {dimension_numbers = #tpu.dot_dimension_numbers<[1], [0], [0], [1], [0, 0, 1, 1], [], []>} : vector<8x32xf32>, vector<32x128xf32>, vector<8x128xf32> -> vector<8x128xf32>
    %374 = arith.addf %372, %373 : vector<8x128xf32>
    %375 = vector.extract_strided_slice %374 {offsets = [0, 0], sizes = [8, 96], strides = [1, 1]} : vector<8x128xf32> to vector<8x96xf32>
    %376 = arith.negf %375 : vector<8x96xf32>
    %377 = math.exp %376 : vector<8x96xf32>
    %cst_79 = arith.constant 1.000000e+00 : f32
    %378 = vector.broadcast %cst_79 : f32 to vector<8x96xf32>
    %379 = arith.addf %378, %377 : vector<8x96xf32>
    %380 = arith.divf %378, %379 : vector<8x96xf32>
    %381 = vector.extract_strided_slice %374 {offsets = [0, 96], sizes = [8, 32], strides = [1, 1]} : vector<8x128xf32> to vector<8x32xf32>
    %382 = math.tanh %381 : vector<8x32xf32>
    %383 = vector.extract_strided_slice %380 {offsets = [0, 0], sizes = [8, 32], strides = [1, 1]} : vector<8x96xf32> to vector<8x32xf32>
    %384 = vector.extract_strided_slice %380 {offsets = [0, 32], sizes = [8, 32], strides = [1, 1]} : vector<8x96xf32> to vector<8x32xf32>
    %385 = vector.extract_strided_slice %380 {offsets = [0, 64], sizes = [8, 32], strides = [1, 1]} : vector<8x96xf32> to vector<8x32xf32>
    %386 = arith.mulf %384, %346 : vector<8x32xf32>
    %387 = arith.mulf %383, %382 : vector<8x32xf32>
    %388 = arith.addf %386, %387 : vector<8x32xf32>
    %389 = math.tanh %388 : vector<8x32xf32>
    %390 = arith.mulf %385, %389 : vector<8x32xf32>
    %cst_80 = arith.constant dense<0.000000e+00> : vector<8x128xf32>
    %391 = tpu.matmul %348, %1, %cst_80 {dimension_numbers = #tpu.dot_dimension_numbers<[1], [0], [0], [1], [0, 0, 1, 1], [], []>} : vector<8x32xf32>, vector<32x128xf32>, vector<8x128xf32> -> vector<8x128xf32>
    %cst_81 = arith.constant dense<0.000000e+00> : vector<8x128xf32>
    %392 = tpu.matmul %368, %3, %cst_81 {dimension_numbers = #tpu.dot_dimension_numbers<[1], [0], [0], [1], [0, 0, 1, 1], [], []>} : vector<8x32xf32>, vector<32x128xf32>, vector<8x128xf32> -> vector<8x128xf32>
    %393 = arith.addf %391, %392 : vector<8x128xf32>
    %394 = arith.addf %393, %12 : vector<8x128xf32>
    %395 = vector.extract_strided_slice %394 {offsets = [0, 0], sizes = [8, 96], strides = [1, 1]} : vector<8x128xf32> to vector<8x96xf32>
    %396 = arith.negf %395 : vector<8x96xf32>
    %397 = math.exp %396 : vector<8x96xf32>
    %cst_82 = arith.constant 1.000000e+00 : f32
    %398 = vector.broadcast %cst_82 : f32 to vector<8x96xf32>
    %399 = arith.addf %398, %397 : vector<8x96xf32>
    %400 = arith.divf %398, %399 : vector<8x96xf32>
    %401 = vector.extract_strided_slice %394 {offsets = [0, 96], sizes = [8, 32], strides = [1, 1]} : vector<8x128xf32> to vector<8x32xf32>
    %402 = math.tanh %401 : vector<8x32xf32>
    %403 = vector.extract_strided_slice %400 {offsets = [0, 0], sizes = [8, 32], strides = [1, 1]} : vector<8x96xf32> to vector<8x32xf32>
    %404 = vector.extract_strided_slice %400 {offsets = [0, 32], sizes = [8, 32], strides = [1, 1]} : vector<8x96xf32> to vector<8x32xf32>
    %405 = vector.extract_strided_slice %400 {offsets = [0, 64], sizes = [8, 32], strides = [1, 1]} : vector<8x96xf32> to vector<8x32xf32>
    %406 = arith.mulf %404, %366 : vector<8x32xf32>
    %407 = arith.mulf %403, %402 : vector<8x32xf32>
    %408 = arith.addf %406, %407 : vector<8x32xf32>
    %409 = math.tanh %408 : vector<8x32xf32>
    %410 = arith.mulf %405, %409 : vector<8x32xf32>
    %c10_i32 = arith.constant 10 : i32
    %c8_i32_83 = arith.constant 8 : i32
    %411 = arith.muli %c10_i32, %c8_i32_83 : i32
    %412 = tpu.assume_multiple %411, 8 : i32
    %413 = arith.index_cast %412 : i32 to index
    %c0_84 = arith.constant 0 : index
    %414 = vector.load %arg10[%413, %c0_84] : memref<168x128xf32, #tpu.memory_space<vmem>>, vector<8x128xf32>
    %cst_85 = arith.constant dense<0.000000e+00> : vector<8x128xf32>
    %415 = tpu.matmul %390, %2, %cst_85 {dimension_numbers = #tpu.dot_dimension_numbers<[1], [0], [0], [1], [0, 0, 1, 1], [], []>} : vector<8x32xf32>, vector<32x128xf32>, vector<8x128xf32> -> vector<8x128xf32>
    %416 = arith.addf %414, %415 : vector<8x128xf32>
    %417 = vector.extract_strided_slice %416 {offsets = [0, 0], sizes = [8, 96], strides = [1, 1]} : vector<8x128xf32> to vector<8x96xf32>
    %418 = arith.negf %417 : vector<8x96xf32>
    %419 = math.exp %418 : vector<8x96xf32>
    %cst_86 = arith.constant 1.000000e+00 : f32
    %420 = vector.broadcast %cst_86 : f32 to vector<8x96xf32>
    %421 = arith.addf %420, %419 : vector<8x96xf32>
    %422 = arith.divf %420, %421 : vector<8x96xf32>
    %423 = vector.extract_strided_slice %416 {offsets = [0, 96], sizes = [8, 32], strides = [1, 1]} : vector<8x128xf32> to vector<8x32xf32>
    %424 = math.tanh %423 : vector<8x32xf32>
    %425 = vector.extract_strided_slice %422 {offsets = [0, 0], sizes = [8, 32], strides = [1, 1]} : vector<8x96xf32> to vector<8x32xf32>
    %426 = vector.extract_strided_slice %422 {offsets = [0, 32], sizes = [8, 32], strides = [1, 1]} : vector<8x96xf32> to vector<8x32xf32>
    %427 = vector.extract_strided_slice %422 {offsets = [0, 64], sizes = [8, 32], strides = [1, 1]} : vector<8x96xf32> to vector<8x32xf32>
    %428 = arith.mulf %426, %388 : vector<8x32xf32>
    %429 = arith.mulf %425, %424 : vector<8x32xf32>
    %430 = arith.addf %428, %429 : vector<8x32xf32>
    %431 = math.tanh %430 : vector<8x32xf32>
    %432 = arith.mulf %427, %431 : vector<8x32xf32>
    %cst_87 = arith.constant dense<0.000000e+00> : vector<8x128xf32>
    %433 = tpu.matmul %390, %1, %cst_87 {dimension_numbers = #tpu.dot_dimension_numbers<[1], [0], [0], [1], [0, 0, 1, 1], [], []>} : vector<8x32xf32>, vector<32x128xf32>, vector<8x128xf32> -> vector<8x128xf32>
    %cst_88 = arith.constant dense<0.000000e+00> : vector<8x128xf32>
    %434 = tpu.matmul %410, %3, %cst_88 {dimension_numbers = #tpu.dot_dimension_numbers<[1], [0], [0], [1], [0, 0, 1, 1], [], []>} : vector<8x32xf32>, vector<32x128xf32>, vector<8x128xf32> -> vector<8x128xf32>
    %435 = arith.addf %433, %434 : vector<8x128xf32>
    %436 = arith.addf %435, %12 : vector<8x128xf32>
    %437 = vector.extract_strided_slice %436 {offsets = [0, 0], sizes = [8, 96], strides = [1, 1]} : vector<8x128xf32> to vector<8x96xf32>
    %438 = arith.negf %437 : vector<8x96xf32>
    %439 = math.exp %438 : vector<8x96xf32>
    %cst_89 = arith.constant 1.000000e+00 : f32
    %440 = vector.broadcast %cst_89 : f32 to vector<8x96xf32>
    %441 = arith.addf %440, %439 : vector<8x96xf32>
    %442 = arith.divf %440, %441 : vector<8x96xf32>
    %443 = vector.extract_strided_slice %436 {offsets = [0, 96], sizes = [8, 32], strides = [1, 1]} : vector<8x128xf32> to vector<8x32xf32>
    %444 = math.tanh %443 : vector<8x32xf32>
    %445 = vector.extract_strided_slice %442 {offsets = [0, 0], sizes = [8, 32], strides = [1, 1]} : vector<8x96xf32> to vector<8x32xf32>
    %446 = vector.extract_strided_slice %442 {offsets = [0, 32], sizes = [8, 32], strides = [1, 1]} : vector<8x96xf32> to vector<8x32xf32>
    %447 = vector.extract_strided_slice %442 {offsets = [0, 64], sizes = [8, 32], strides = [1, 1]} : vector<8x96xf32> to vector<8x32xf32>
    %448 = arith.mulf %446, %408 : vector<8x32xf32>
    %449 = arith.mulf %445, %444 : vector<8x32xf32>
    %450 = arith.addf %448, %449 : vector<8x32xf32>
    %451 = math.tanh %450 : vector<8x32xf32>
    %452 = arith.mulf %447, %451 : vector<8x32xf32>
    %c11_i32 = arith.constant 11 : i32
    %c8_i32_90 = arith.constant 8 : i32
    %453 = arith.muli %c11_i32, %c8_i32_90 : i32
    %454 = tpu.assume_multiple %453, 8 : i32
    %455 = arith.index_cast %454 : i32 to index
    %c0_91 = arith.constant 0 : index
    %456 = vector.load %arg10[%455, %c0_91] : memref<168x128xf32, #tpu.memory_space<vmem>>, vector<8x128xf32>
    %cst_92 = arith.constant dense<0.000000e+00> : vector<8x128xf32>
    %457 = tpu.matmul %432, %2, %cst_92 {dimension_numbers = #tpu.dot_dimension_numbers<[1], [0], [0], [1], [0, 0, 1, 1], [], []>} : vector<8x32xf32>, vector<32x128xf32>, vector<8x128xf32> -> vector<8x128xf32>
    %458 = arith.addf %456, %457 : vector<8x128xf32>
    %459 = vector.extract_strided_slice %458 {offsets = [0, 0], sizes = [8, 96], strides = [1, 1]} : vector<8x128xf32> to vector<8x96xf32>
    %460 = arith.negf %459 : vector<8x96xf32>
    %461 = math.exp %460 : vector<8x96xf32>
    %cst_93 = arith.constant 1.000000e+00 : f32
    %462 = vector.broadcast %cst_93 : f32 to vector<8x96xf32>
    %463 = arith.addf %462, %461 : vector<8x96xf32>
    %464 = arith.divf %462, %463 : vector<8x96xf32>
    %465 = vector.extract_strided_slice %458 {offsets = [0, 96], sizes = [8, 32], strides = [1, 1]} : vector<8x128xf32> to vector<8x32xf32>
    %466 = math.tanh %465 : vector<8x32xf32>
    %467 = vector.extract_strided_slice %464 {offsets = [0, 0], sizes = [8, 32], strides = [1, 1]} : vector<8x96xf32> to vector<8x32xf32>
    %468 = vector.extract_strided_slice %464 {offsets = [0, 32], sizes = [8, 32], strides = [1, 1]} : vector<8x96xf32> to vector<8x32xf32>
    %469 = vector.extract_strided_slice %464 {offsets = [0, 64], sizes = [8, 32], strides = [1, 1]} : vector<8x96xf32> to vector<8x32xf32>
    %470 = arith.mulf %468, %430 : vector<8x32xf32>
    %471 = arith.mulf %467, %466 : vector<8x32xf32>
    %472 = arith.addf %470, %471 : vector<8x32xf32>
    %473 = math.tanh %472 : vector<8x32xf32>
    %474 = arith.mulf %469, %473 : vector<8x32xf32>
    %cst_94 = arith.constant dense<0.000000e+00> : vector<8x128xf32>
    %475 = tpu.matmul %432, %1, %cst_94 {dimension_numbers = #tpu.dot_dimension_numbers<[1], [0], [0], [1], [0, 0, 1, 1], [], []>} : vector<8x32xf32>, vector<32x128xf32>, vector<8x128xf32> -> vector<8x128xf32>
    %cst_95 = arith.constant dense<0.000000e+00> : vector<8x128xf32>
    %476 = tpu.matmul %452, %3, %cst_95 {dimension_numbers = #tpu.dot_dimension_numbers<[1], [0], [0], [1], [0, 0, 1, 1], [], []>} : vector<8x32xf32>, vector<32x128xf32>, vector<8x128xf32> -> vector<8x128xf32>
    %477 = arith.addf %475, %476 : vector<8x128xf32>
    %478 = arith.addf %477, %12 : vector<8x128xf32>
    %479 = vector.extract_strided_slice %478 {offsets = [0, 0], sizes = [8, 96], strides = [1, 1]} : vector<8x128xf32> to vector<8x96xf32>
    %480 = arith.negf %479 : vector<8x96xf32>
    %481 = math.exp %480 : vector<8x96xf32>
    %cst_96 = arith.constant 1.000000e+00 : f32
    %482 = vector.broadcast %cst_96 : f32 to vector<8x96xf32>
    %483 = arith.addf %482, %481 : vector<8x96xf32>
    %484 = arith.divf %482, %483 : vector<8x96xf32>
    %485 = vector.extract_strided_slice %478 {offsets = [0, 96], sizes = [8, 32], strides = [1, 1]} : vector<8x128xf32> to vector<8x32xf32>
    %486 = math.tanh %485 : vector<8x32xf32>
    %487 = vector.extract_strided_slice %484 {offsets = [0, 0], sizes = [8, 32], strides = [1, 1]} : vector<8x96xf32> to vector<8x32xf32>
    %488 = vector.extract_strided_slice %484 {offsets = [0, 32], sizes = [8, 32], strides = [1, 1]} : vector<8x96xf32> to vector<8x32xf32>
    %489 = vector.extract_strided_slice %484 {offsets = [0, 64], sizes = [8, 32], strides = [1, 1]} : vector<8x96xf32> to vector<8x32xf32>
    %490 = arith.mulf %488, %450 : vector<8x32xf32>
    %491 = arith.mulf %487, %486 : vector<8x32xf32>
    %492 = arith.addf %490, %491 : vector<8x32xf32>
    %493 = math.tanh %492 : vector<8x32xf32>
    %494 = arith.mulf %489, %493 : vector<8x32xf32>
    %c12_i32 = arith.constant 12 : i32
    %c8_i32_97 = arith.constant 8 : i32
    %495 = arith.muli %c12_i32, %c8_i32_97 : i32
    %496 = tpu.assume_multiple %495, 8 : i32
    %497 = arith.index_cast %496 : i32 to index
    %c0_98 = arith.constant 0 : index
    %498 = vector.load %arg10[%497, %c0_98] : memref<168x128xf32, #tpu.memory_space<vmem>>, vector<8x128xf32>
    %cst_99 = arith.constant dense<0.000000e+00> : vector<8x128xf32>
    %499 = tpu.matmul %474, %2, %cst_99 {dimension_numbers = #tpu.dot_dimension_numbers<[1], [0], [0], [1], [0, 0, 1, 1], [], []>} : vector<8x32xf32>, vector<32x128xf32>, vector<8x128xf32> -> vector<8x128xf32>
    %500 = arith.addf %498, %499 : vector<8x128xf32>
    %501 = vector.extract_strided_slice %500 {offsets = [0, 0], sizes = [8, 96], strides = [1, 1]} : vector<8x128xf32> to vector<8x96xf32>
    %502 = arith.negf %501 : vector<8x96xf32>
    %503 = math.exp %502 : vector<8x96xf32>
    %cst_100 = arith.constant 1.000000e+00 : f32
    %504 = vector.broadcast %cst_100 : f32 to vector<8x96xf32>
    %505 = arith.addf %504, %503 : vector<8x96xf32>
    %506 = arith.divf %504, %505 : vector<8x96xf32>
    %507 = vector.extract_strided_slice %500 {offsets = [0, 96], sizes = [8, 32], strides = [1, 1]} : vector<8x128xf32> to vector<8x32xf32>
    %508 = math.tanh %507 : vector<8x32xf32>
    %509 = vector.extract_strided_slice %506 {offsets = [0, 0], sizes = [8, 32], strides = [1, 1]} : vector<8x96xf32> to vector<8x32xf32>
    %510 = vector.extract_strided_slice %506 {offsets = [0, 32], sizes = [8, 32], strides = [1, 1]} : vector<8x96xf32> to vector<8x32xf32>
    %511 = vector.extract_strided_slice %506 {offsets = [0, 64], sizes = [8, 32], strides = [1, 1]} : vector<8x96xf32> to vector<8x32xf32>
    %512 = arith.mulf %510, %472 : vector<8x32xf32>
    %513 = arith.mulf %509, %508 : vector<8x32xf32>
    %514 = arith.addf %512, %513 : vector<8x32xf32>
    %515 = math.tanh %514 : vector<8x32xf32>
    %516 = arith.mulf %511, %515 : vector<8x32xf32>
    %cst_101 = arith.constant dense<0.000000e+00> : vector<8x128xf32>
    %517 = tpu.matmul %474, %1, %cst_101 {dimension_numbers = #tpu.dot_dimension_numbers<[1], [0], [0], [1], [0, 0, 1, 1], [], []>} : vector<8x32xf32>, vector<32x128xf32>, vector<8x128xf32> -> vector<8x128xf32>
    %cst_102 = arith.constant dense<0.000000e+00> : vector<8x128xf32>
    %518 = tpu.matmul %494, %3, %cst_102 {dimension_numbers = #tpu.dot_dimension_numbers<[1], [0], [0], [1], [0, 0, 1, 1], [], []>} : vector<8x32xf32>, vector<32x128xf32>, vector<8x128xf32> -> vector<8x128xf32>
    %519 = arith.addf %517, %518 : vector<8x128xf32>
    %520 = arith.addf %519, %12 : vector<8x128xf32>
    %521 = vector.extract_strided_slice %520 {offsets = [0, 0], sizes = [8, 96], strides = [1, 1]} : vector<8x128xf32> to vector<8x96xf32>
    %522 = arith.negf %521 : vector<8x96xf32>
    %523 = math.exp %522 : vector<8x96xf32>
    %cst_103 = arith.constant 1.000000e+00 : f32
    %524 = vector.broadcast %cst_103 : f32 to vector<8x96xf32>
    %525 = arith.addf %524, %523 : vector<8x96xf32>
    %526 = arith.divf %524, %525 : vector<8x96xf32>
    %527 = vector.extract_strided_slice %520 {offsets = [0, 96], sizes = [8, 32], strides = [1, 1]} : vector<8x128xf32> to vector<8x32xf32>
    %528 = math.tanh %527 : vector<8x32xf32>
    %529 = vector.extract_strided_slice %526 {offsets = [0, 0], sizes = [8, 32], strides = [1, 1]} : vector<8x96xf32> to vector<8x32xf32>
    %530 = vector.extract_strided_slice %526 {offsets = [0, 32], sizes = [8, 32], strides = [1, 1]} : vector<8x96xf32> to vector<8x32xf32>
    %531 = vector.extract_strided_slice %526 {offsets = [0, 64], sizes = [8, 32], strides = [1, 1]} : vector<8x96xf32> to vector<8x32xf32>
    %532 = arith.mulf %530, %492 : vector<8x32xf32>
    %533 = arith.mulf %529, %528 : vector<8x32xf32>
    %534 = arith.addf %532, %533 : vector<8x32xf32>
    %535 = math.tanh %534 : vector<8x32xf32>
    %536 = arith.mulf %531, %535 : vector<8x32xf32>
    %c13_i32 = arith.constant 13 : i32
    %c8_i32_104 = arith.constant 8 : i32
    %537 = arith.muli %c13_i32, %c8_i32_104 : i32
    %538 = tpu.assume_multiple %537, 8 : i32
    %539 = arith.index_cast %538 : i32 to index
    %c0_105 = arith.constant 0 : index
    %540 = vector.load %arg10[%539, %c0_105] : memref<168x128xf32, #tpu.memory_space<vmem>>, vector<8x128xf32>
    %cst_106 = arith.constant dense<0.000000e+00> : vector<8x128xf32>
    %541 = tpu.matmul %516, %2, %cst_106 {dimension_numbers = #tpu.dot_dimension_numbers<[1], [0], [0], [1], [0, 0, 1, 1], [], []>} : vector<8x32xf32>, vector<32x128xf32>, vector<8x128xf32> -> vector<8x128xf32>
    %542 = arith.addf %540, %541 : vector<8x128xf32>
    %543 = vector.extract_strided_slice %542 {offsets = [0, 0], sizes = [8, 96], strides = [1, 1]} : vector<8x128xf32> to vector<8x96xf32>
    %544 = arith.negf %543 : vector<8x96xf32>
    %545 = math.exp %544 : vector<8x96xf32>
    %cst_107 = arith.constant 1.000000e+00 : f32
    %546 = vector.broadcast %cst_107 : f32 to vector<8x96xf32>
    %547 = arith.addf %546, %545 : vector<8x96xf32>
    %548 = arith.divf %546, %547 : vector<8x96xf32>
    %549 = vector.extract_strided_slice %542 {offsets = [0, 96], sizes = [8, 32], strides = [1, 1]} : vector<8x128xf32> to vector<8x32xf32>
    %550 = math.tanh %549 : vector<8x32xf32>
    %551 = vector.extract_strided_slice %548 {offsets = [0, 0], sizes = [8, 32], strides = [1, 1]} : vector<8x96xf32> to vector<8x32xf32>
    %552 = vector.extract_strided_slice %548 {offsets = [0, 32], sizes = [8, 32], strides = [1, 1]} : vector<8x96xf32> to vector<8x32xf32>
    %553 = vector.extract_strided_slice %548 {offsets = [0, 64], sizes = [8, 32], strides = [1, 1]} : vector<8x96xf32> to vector<8x32xf32>
    %554 = arith.mulf %552, %514 : vector<8x32xf32>
    %555 = arith.mulf %551, %550 : vector<8x32xf32>
    %556 = arith.addf %554, %555 : vector<8x32xf32>
    %557 = math.tanh %556 : vector<8x32xf32>
    %558 = arith.mulf %553, %557 : vector<8x32xf32>
    %cst_108 = arith.constant dense<0.000000e+00> : vector<8x128xf32>
    %559 = tpu.matmul %516, %1, %cst_108 {dimension_numbers = #tpu.dot_dimension_numbers<[1], [0], [0], [1], [0, 0, 1, 1], [], []>} : vector<8x32xf32>, vector<32x128xf32>, vector<8x128xf32> -> vector<8x128xf32>
    %cst_109 = arith.constant dense<0.000000e+00> : vector<8x128xf32>
    %560 = tpu.matmul %536, %3, %cst_109 {dimension_numbers = #tpu.dot_dimension_numbers<[1], [0], [0], [1], [0, 0, 1, 1], [], []>} : vector<8x32xf32>, vector<32x128xf32>, vector<8x128xf32> -> vector<8x128xf32>
    %561 = arith.addf %559, %560 : vector<8x128xf32>
    %562 = arith.addf %561, %12 : vector<8x128xf32>
    %563 = vector.extract_strided_slice %562 {offsets = [0, 0], sizes = [8, 96], strides = [1, 1]} : vector<8x128xf32> to vector<8x96xf32>
    %564 = arith.negf %563 : vector<8x96xf32>
    %565 = math.exp %564 : vector<8x96xf32>
    %cst_110 = arith.constant 1.000000e+00 : f32
    %566 = vector.broadcast %cst_110 : f32 to vector<8x96xf32>
    %567 = arith.addf %566, %565 : vector<8x96xf32>
    %568 = arith.divf %566, %567 : vector<8x96xf32>
    %569 = vector.extract_strided_slice %562 {offsets = [0, 96], sizes = [8, 32], strides = [1, 1]} : vector<8x128xf32> to vector<8x32xf32>
    %570 = math.tanh %569 : vector<8x32xf32>
    %571 = vector.extract_strided_slice %568 {offsets = [0, 0], sizes = [8, 32], strides = [1, 1]} : vector<8x96xf32> to vector<8x32xf32>
    %572 = vector.extract_strided_slice %568 {offsets = [0, 32], sizes = [8, 32], strides = [1, 1]} : vector<8x96xf32> to vector<8x32xf32>
    %573 = vector.extract_strided_slice %568 {offsets = [0, 64], sizes = [8, 32], strides = [1, 1]} : vector<8x96xf32> to vector<8x32xf32>
    %574 = arith.mulf %572, %534 : vector<8x32xf32>
    %575 = arith.mulf %571, %570 : vector<8x32xf32>
    %576 = arith.addf %574, %575 : vector<8x32xf32>
    %577 = math.tanh %576 : vector<8x32xf32>
    %578 = arith.mulf %573, %577 : vector<8x32xf32>
    %c14_i32 = arith.constant 14 : i32
    %c8_i32_111 = arith.constant 8 : i32
    %579 = arith.muli %c14_i32, %c8_i32_111 : i32
    %580 = tpu.assume_multiple %579, 8 : i32
    %581 = arith.index_cast %580 : i32 to index
    %c0_112 = arith.constant 0 : index
    %582 = vector.load %arg10[%581, %c0_112] : memref<168x128xf32, #tpu.memory_space<vmem>>, vector<8x128xf32>
    %cst_113 = arith.constant dense<0.000000e+00> : vector<8x128xf32>
    %583 = tpu.matmul %558, %2, %cst_113 {dimension_numbers = #tpu.dot_dimension_numbers<[1], [0], [0], [1], [0, 0, 1, 1], [], []>} : vector<8x32xf32>, vector<32x128xf32>, vector<8x128xf32> -> vector<8x128xf32>
    %584 = arith.addf %582, %583 : vector<8x128xf32>
    %585 = vector.extract_strided_slice %584 {offsets = [0, 0], sizes = [8, 96], strides = [1, 1]} : vector<8x128xf32> to vector<8x96xf32>
    %586 = arith.negf %585 : vector<8x96xf32>
    %587 = math.exp %586 : vector<8x96xf32>
    %cst_114 = arith.constant 1.000000e+00 : f32
    %588 = vector.broadcast %cst_114 : f32 to vector<8x96xf32>
    %589 = arith.addf %588, %587 : vector<8x96xf32>
    %590 = arith.divf %588, %589 : vector<8x96xf32>
    %591 = vector.extract_strided_slice %584 {offsets = [0, 96], sizes = [8, 32], strides = [1, 1]} : vector<8x128xf32> to vector<8x32xf32>
    %592 = math.tanh %591 : vector<8x32xf32>
    %593 = vector.extract_strided_slice %590 {offsets = [0, 0], sizes = [8, 32], strides = [1, 1]} : vector<8x96xf32> to vector<8x32xf32>
    %594 = vector.extract_strided_slice %590 {offsets = [0, 32], sizes = [8, 32], strides = [1, 1]} : vector<8x96xf32> to vector<8x32xf32>
    %595 = vector.extract_strided_slice %590 {offsets = [0, 64], sizes = [8, 32], strides = [1, 1]} : vector<8x96xf32> to vector<8x32xf32>
    %596 = arith.mulf %594, %556 : vector<8x32xf32>
    %597 = arith.mulf %593, %592 : vector<8x32xf32>
    %598 = arith.addf %596, %597 : vector<8x32xf32>
    %599 = math.tanh %598 : vector<8x32xf32>
    %600 = arith.mulf %595, %599 : vector<8x32xf32>
    %cst_115 = arith.constant dense<0.000000e+00> : vector<8x128xf32>
    %601 = tpu.matmul %558, %1, %cst_115 {dimension_numbers = #tpu.dot_dimension_numbers<[1], [0], [0], [1], [0, 0, 1, 1], [], []>} : vector<8x32xf32>, vector<32x128xf32>, vector<8x128xf32> -> vector<8x128xf32>
    %cst_116 = arith.constant dense<0.000000e+00> : vector<8x128xf32>
    %602 = tpu.matmul %578, %3, %cst_116 {dimension_numbers = #tpu.dot_dimension_numbers<[1], [0], [0], [1], [0, 0, 1, 1], [], []>} : vector<8x32xf32>, vector<32x128xf32>, vector<8x128xf32> -> vector<8x128xf32>
    %603 = arith.addf %601, %602 : vector<8x128xf32>
    %604 = arith.addf %603, %12 : vector<8x128xf32>
    %605 = vector.extract_strided_slice %604 {offsets = [0, 0], sizes = [8, 96], strides = [1, 1]} : vector<8x128xf32> to vector<8x96xf32>
    %606 = arith.negf %605 : vector<8x96xf32>
    %607 = math.exp %606 : vector<8x96xf32>
    %cst_117 = arith.constant 1.000000e+00 : f32
    %608 = vector.broadcast %cst_117 : f32 to vector<8x96xf32>
    %609 = arith.addf %608, %607 : vector<8x96xf32>
    %610 = arith.divf %608, %609 : vector<8x96xf32>
    %611 = vector.extract_strided_slice %604 {offsets = [0, 96], sizes = [8, 32], strides = [1, 1]} : vector<8x128xf32> to vector<8x32xf32>
    %612 = math.tanh %611 : vector<8x32xf32>
    %613 = vector.extract_strided_slice %610 {offsets = [0, 0], sizes = [8, 32], strides = [1, 1]} : vector<8x96xf32> to vector<8x32xf32>
    %614 = vector.extract_strided_slice %610 {offsets = [0, 32], sizes = [8, 32], strides = [1, 1]} : vector<8x96xf32> to vector<8x32xf32>
    %615 = vector.extract_strided_slice %610 {offsets = [0, 64], sizes = [8, 32], strides = [1, 1]} : vector<8x96xf32> to vector<8x32xf32>
    %616 = arith.mulf %614, %576 : vector<8x32xf32>
    %617 = arith.mulf %613, %612 : vector<8x32xf32>
    %618 = arith.addf %616, %617 : vector<8x32xf32>
    %619 = math.tanh %618 : vector<8x32xf32>
    %620 = arith.mulf %615, %619 : vector<8x32xf32>
    %c15_i32 = arith.constant 15 : i32
    %c8_i32_118 = arith.constant 8 : i32
    %621 = arith.muli %c15_i32, %c8_i32_118 : i32
    %622 = tpu.assume_multiple %621, 8 : i32
    %623 = arith.index_cast %622 : i32 to index
    %c0_119 = arith.constant 0 : index
    %624 = vector.load %arg10[%623, %c0_119] : memref<168x128xf32, #tpu.memory_space<vmem>>, vector<8x128xf32>
    %cst_120 = arith.constant dense<0.000000e+00> : vector<8x128xf32>
    %625 = tpu.matmul %600, %2, %cst_120 {dimension_numbers = #tpu.dot_dimension_numbers<[1], [0], [0], [1], [0, 0, 1, 1], [], []>} : vector<8x32xf32>, vector<32x128xf32>, vector<8x128xf32> -> vector<8x128xf32>
    %626 = arith.addf %624, %625 : vector<8x128xf32>
    %627 = vector.extract_strided_slice %626 {offsets = [0, 0], sizes = [8, 96], strides = [1, 1]} : vector<8x128xf32> to vector<8x96xf32>
    %628 = arith.negf %627 : vector<8x96xf32>
    %629 = math.exp %628 : vector<8x96xf32>
    %cst_121 = arith.constant 1.000000e+00 : f32
    %630 = vector.broadcast %cst_121 : f32 to vector<8x96xf32>
    %631 = arith.addf %630, %629 : vector<8x96xf32>
    %632 = arith.divf %630, %631 : vector<8x96xf32>
    %633 = vector.extract_strided_slice %626 {offsets = [0, 96], sizes = [8, 32], strides = [1, 1]} : vector<8x128xf32> to vector<8x32xf32>
    %634 = math.tanh %633 : vector<8x32xf32>
    %635 = vector.extract_strided_slice %632 {offsets = [0, 0], sizes = [8, 32], strides = [1, 1]} : vector<8x96xf32> to vector<8x32xf32>
    %636 = vector.extract_strided_slice %632 {offsets = [0, 32], sizes = [8, 32], strides = [1, 1]} : vector<8x96xf32> to vector<8x32xf32>
    %637 = vector.extract_strided_slice %632 {offsets = [0, 64], sizes = [8, 32], strides = [1, 1]} : vector<8x96xf32> to vector<8x32xf32>
    %638 = arith.mulf %636, %598 : vector<8x32xf32>
    %639 = arith.mulf %635, %634 : vector<8x32xf32>
    %640 = arith.addf %638, %639 : vector<8x32xf32>
    %641 = math.tanh %640 : vector<8x32xf32>
    %642 = arith.mulf %637, %641 : vector<8x32xf32>
    %cst_122 = arith.constant dense<0.000000e+00> : vector<8x128xf32>
    %643 = tpu.matmul %600, %1, %cst_122 {dimension_numbers = #tpu.dot_dimension_numbers<[1], [0], [0], [1], [0, 0, 1, 1], [], []>} : vector<8x32xf32>, vector<32x128xf32>, vector<8x128xf32> -> vector<8x128xf32>
    %cst_123 = arith.constant dense<0.000000e+00> : vector<8x128xf32>
    %644 = tpu.matmul %620, %3, %cst_123 {dimension_numbers = #tpu.dot_dimension_numbers<[1], [0], [0], [1], [0, 0, 1, 1], [], []>} : vector<8x32xf32>, vector<32x128xf32>, vector<8x128xf32> -> vector<8x128xf32>
    %645 = arith.addf %643, %644 : vector<8x128xf32>
    %646 = arith.addf %645, %12 : vector<8x128xf32>
    %647 = vector.extract_strided_slice %646 {offsets = [0, 0], sizes = [8, 96], strides = [1, 1]} : vector<8x128xf32> to vector<8x96xf32>
    %648 = arith.negf %647 : vector<8x96xf32>
    %649 = math.exp %648 : vector<8x96xf32>
    %cst_124 = arith.constant 1.000000e+00 : f32
    %650 = vector.broadcast %cst_124 : f32 to vector<8x96xf32>
    %651 = arith.addf %650, %649 : vector<8x96xf32>
    %652 = arith.divf %650, %651 : vector<8x96xf32>
    %653 = vector.extract_strided_slice %646 {offsets = [0, 96], sizes = [8, 32], strides = [1, 1]} : vector<8x128xf32> to vector<8x32xf32>
    %654 = math.tanh %653 : vector<8x32xf32>
    %655 = vector.extract_strided_slice %652 {offsets = [0, 0], sizes = [8, 32], strides = [1, 1]} : vector<8x96xf32> to vector<8x32xf32>
    %656 = vector.extract_strided_slice %652 {offsets = [0, 32], sizes = [8, 32], strides = [1, 1]} : vector<8x96xf32> to vector<8x32xf32>
    %657 = vector.extract_strided_slice %652 {offsets = [0, 64], sizes = [8, 32], strides = [1, 1]} : vector<8x96xf32> to vector<8x32xf32>
    %658 = arith.mulf %656, %618 : vector<8x32xf32>
    %659 = arith.mulf %655, %654 : vector<8x32xf32>
    %660 = arith.addf %658, %659 : vector<8x32xf32>
    %661 = math.tanh %660 : vector<8x32xf32>
    %662 = arith.mulf %657, %661 : vector<8x32xf32>
    %c16_i32 = arith.constant 16 : i32
    %c8_i32_125 = arith.constant 8 : i32
    %663 = arith.muli %c16_i32, %c8_i32_125 : i32
    %664 = tpu.assume_multiple %663, 8 : i32
    %665 = arith.index_cast %664 : i32 to index
    %c0_126 = arith.constant 0 : index
    %666 = vector.load %arg10[%665, %c0_126] : memref<168x128xf32, #tpu.memory_space<vmem>>, vector<8x128xf32>
    %cst_127 = arith.constant dense<0.000000e+00> : vector<8x128xf32>
    %667 = tpu.matmul %642, %2, %cst_127 {dimension_numbers = #tpu.dot_dimension_numbers<[1], [0], [0], [1], [0, 0, 1, 1], [], []>} : vector<8x32xf32>, vector<32x128xf32>, vector<8x128xf32> -> vector<8x128xf32>
    %668 = arith.addf %666, %667 : vector<8x128xf32>
    %669 = vector.extract_strided_slice %668 {offsets = [0, 0], sizes = [8, 96], strides = [1, 1]} : vector<8x128xf32> to vector<8x96xf32>
    %670 = arith.negf %669 : vector<8x96xf32>
    %671 = math.exp %670 : vector<8x96xf32>
    %cst_128 = arith.constant 1.000000e+00 : f32
    %672 = vector.broadcast %cst_128 : f32 to vector<8x96xf32>
    %673 = arith.addf %672, %671 : vector<8x96xf32>
    %674 = arith.divf %672, %673 : vector<8x96xf32>
    %675 = vector.extract_strided_slice %668 {offsets = [0, 96], sizes = [8, 32], strides = [1, 1]} : vector<8x128xf32> to vector<8x32xf32>
    %676 = math.tanh %675 : vector<8x32xf32>
    %677 = vector.extract_strided_slice %674 {offsets = [0, 0], sizes = [8, 32], strides = [1, 1]} : vector<8x96xf32> to vector<8x32xf32>
    %678 = vector.extract_strided_slice %674 {offsets = [0, 32], sizes = [8, 32], strides = [1, 1]} : vector<8x96xf32> to vector<8x32xf32>
    %679 = vector.extract_strided_slice %674 {offsets = [0, 64], sizes = [8, 32], strides = [1, 1]} : vector<8x96xf32> to vector<8x32xf32>
    %680 = arith.mulf %678, %640 : vector<8x32xf32>
    %681 = arith.mulf %677, %676 : vector<8x32xf32>
    %682 = arith.addf %680, %681 : vector<8x32xf32>
    %683 = math.tanh %682 : vector<8x32xf32>
    %684 = arith.mulf %679, %683 : vector<8x32xf32>
    %cst_129 = arith.constant dense<0.000000e+00> : vector<8x128xf32>
    %685 = tpu.matmul %642, %1, %cst_129 {dimension_numbers = #tpu.dot_dimension_numbers<[1], [0], [0], [1], [0, 0, 1, 1], [], []>} : vector<8x32xf32>, vector<32x128xf32>, vector<8x128xf32> -> vector<8x128xf32>
    %cst_130 = arith.constant dense<0.000000e+00> : vector<8x128xf32>
    %686 = tpu.matmul %662, %3, %cst_130 {dimension_numbers = #tpu.dot_dimension_numbers<[1], [0], [0], [1], [0, 0, 1, 1], [], []>} : vector<8x32xf32>, vector<32x128xf32>, vector<8x128xf32> -> vector<8x128xf32>
    %687 = arith.addf %685, %686 : vector<8x128xf32>
    %688 = arith.addf %687, %12 : vector<8x128xf32>
    %689 = vector.extract_strided_slice %688 {offsets = [0, 0], sizes = [8, 96], strides = [1, 1]} : vector<8x128xf32> to vector<8x96xf32>
    %690 = arith.negf %689 : vector<8x96xf32>
    %691 = math.exp %690 : vector<8x96xf32>
    %cst_131 = arith.constant 1.000000e+00 : f32
    %692 = vector.broadcast %cst_131 : f32 to vector<8x96xf32>
    %693 = arith.addf %692, %691 : vector<8x96xf32>
    %694 = arith.divf %692, %693 : vector<8x96xf32>
    %695 = vector.extract_strided_slice %688 {offsets = [0, 96], sizes = [8, 32], strides = [1, 1]} : vector<8x128xf32> to vector<8x32xf32>
    %696 = math.tanh %695 : vector<8x32xf32>
    %697 = vector.extract_strided_slice %694 {offsets = [0, 0], sizes = [8, 32], strides = [1, 1]} : vector<8x96xf32> to vector<8x32xf32>
    %698 = vector.extract_strided_slice %694 {offsets = [0, 32], sizes = [8, 32], strides = [1, 1]} : vector<8x96xf32> to vector<8x32xf32>
    %699 = vector.extract_strided_slice %694 {offsets = [0, 64], sizes = [8, 32], strides = [1, 1]} : vector<8x96xf32> to vector<8x32xf32>
    %700 = arith.mulf %698, %660 : vector<8x32xf32>
    %701 = arith.mulf %697, %696 : vector<8x32xf32>
    %702 = arith.addf %700, %701 : vector<8x32xf32>
    %703 = math.tanh %702 : vector<8x32xf32>
    %704 = arith.mulf %699, %703 : vector<8x32xf32>
    %c17_i32 = arith.constant 17 : i32
    %c8_i32_132 = arith.constant 8 : i32
    %705 = arith.muli %c17_i32, %c8_i32_132 : i32
    %706 = tpu.assume_multiple %705, 8 : i32
    %707 = arith.index_cast %706 : i32 to index
    %c0_133 = arith.constant 0 : index
    %708 = vector.load %arg10[%707, %c0_133] : memref<168x128xf32, #tpu.memory_space<vmem>>, vector<8x128xf32>
    %cst_134 = arith.constant dense<0.000000e+00> : vector<8x128xf32>
    %709 = tpu.matmul %684, %2, %cst_134 {dimension_numbers = #tpu.dot_dimension_numbers<[1], [0], [0], [1], [0, 0, 1, 1], [], []>} : vector<8x32xf32>, vector<32x128xf32>, vector<8x128xf32> -> vector<8x128xf32>
    %710 = arith.addf %708, %709 : vector<8x128xf32>
    %711 = vector.extract_strided_slice %710 {offsets = [0, 0], sizes = [8, 96], strides = [1, 1]} : vector<8x128xf32> to vector<8x96xf32>
    %712 = arith.negf %711 : vector<8x96xf32>
    %713 = math.exp %712 : vector<8x96xf32>
    %cst_135 = arith.constant 1.000000e+00 : f32
    %714 = vector.broadcast %cst_135 : f32 to vector<8x96xf32>
    %715 = arith.addf %714, %713 : vector<8x96xf32>
    %716 = arith.divf %714, %715 : vector<8x96xf32>
    %717 = vector.extract_strided_slice %710 {offsets = [0, 96], sizes = [8, 32], strides = [1, 1]} : vector<8x128xf32> to vector<8x32xf32>
    %718 = math.tanh %717 : vector<8x32xf32>
    %719 = vector.extract_strided_slice %716 {offsets = [0, 0], sizes = [8, 32], strides = [1, 1]} : vector<8x96xf32> to vector<8x32xf32>
    %720 = vector.extract_strided_slice %716 {offsets = [0, 32], sizes = [8, 32], strides = [1, 1]} : vector<8x96xf32> to vector<8x32xf32>
    %721 = vector.extract_strided_slice %716 {offsets = [0, 64], sizes = [8, 32], strides = [1, 1]} : vector<8x96xf32> to vector<8x32xf32>
    %722 = arith.mulf %720, %682 : vector<8x32xf32>
    %723 = arith.mulf %719, %718 : vector<8x32xf32>
    %724 = arith.addf %722, %723 : vector<8x32xf32>
    %725 = math.tanh %724 : vector<8x32xf32>
    %726 = arith.mulf %721, %725 : vector<8x32xf32>
    %cst_136 = arith.constant dense<0.000000e+00> : vector<8x128xf32>
    %727 = tpu.matmul %684, %1, %cst_136 {dimension_numbers = #tpu.dot_dimension_numbers<[1], [0], [0], [1], [0, 0, 1, 1], [], []>} : vector<8x32xf32>, vector<32x128xf32>, vector<8x128xf32> -> vector<8x128xf32>
    %cst_137 = arith.constant dense<0.000000e+00> : vector<8x128xf32>
    %728 = tpu.matmul %704, %3, %cst_137 {dimension_numbers = #tpu.dot_dimension_numbers<[1], [0], [0], [1], [0, 0, 1, 1], [], []>} : vector<8x32xf32>, vector<32x128xf32>, vector<8x128xf32> -> vector<8x128xf32>
    %729 = arith.addf %727, %728 : vector<8x128xf32>
    %730 = arith.addf %729, %12 : vector<8x128xf32>
    %731 = vector.extract_strided_slice %730 {offsets = [0, 0], sizes = [8, 96], strides = [1, 1]} : vector<8x128xf32> to vector<8x96xf32>
    %732 = arith.negf %731 : vector<8x96xf32>
    %733 = math.exp %732 : vector<8x96xf32>
    %cst_138 = arith.constant 1.000000e+00 : f32
    %734 = vector.broadcast %cst_138 : f32 to vector<8x96xf32>
    %735 = arith.addf %734, %733 : vector<8x96xf32>
    %736 = arith.divf %734, %735 : vector<8x96xf32>
    %737 = vector.extract_strided_slice %730 {offsets = [0, 96], sizes = [8, 32], strides = [1, 1]} : vector<8x128xf32> to vector<8x32xf32>
    %738 = math.tanh %737 : vector<8x32xf32>
    %739 = vector.extract_strided_slice %736 {offsets = [0, 0], sizes = [8, 32], strides = [1, 1]} : vector<8x96xf32> to vector<8x32xf32>
    %740 = vector.extract_strided_slice %736 {offsets = [0, 32], sizes = [8, 32], strides = [1, 1]} : vector<8x96xf32> to vector<8x32xf32>
    %741 = vector.extract_strided_slice %736 {offsets = [0, 64], sizes = [8, 32], strides = [1, 1]} : vector<8x96xf32> to vector<8x32xf32>
    %742 = arith.mulf %740, %702 : vector<8x32xf32>
    %743 = arith.mulf %739, %738 : vector<8x32xf32>
    %744 = arith.addf %742, %743 : vector<8x32xf32>
    %745 = math.tanh %744 : vector<8x32xf32>
    %746 = arith.mulf %741, %745 : vector<8x32xf32>
    %c18_i32 = arith.constant 18 : i32
    %c8_i32_139 = arith.constant 8 : i32
    %747 = arith.muli %c18_i32, %c8_i32_139 : i32
    %748 = tpu.assume_multiple %747, 8 : i32
    %749 = arith.index_cast %748 : i32 to index
    %c0_140 = arith.constant 0 : index
    %750 = vector.load %arg10[%749, %c0_140] : memref<168x128xf32, #tpu.memory_space<vmem>>, vector<8x128xf32>
    %cst_141 = arith.constant dense<0.000000e+00> : vector<8x128xf32>
    %751 = tpu.matmul %726, %2, %cst_141 {dimension_numbers = #tpu.dot_dimension_numbers<[1], [0], [0], [1], [0, 0, 1, 1], [], []>} : vector<8x32xf32>, vector<32x128xf32>, vector<8x128xf32> -> vector<8x128xf32>
    %752 = arith.addf %750, %751 : vector<8x128xf32>
    %753 = vector.extract_strided_slice %752 {offsets = [0, 0], sizes = [8, 96], strides = [1, 1]} : vector<8x128xf32> to vector<8x96xf32>
    %754 = arith.negf %753 : vector<8x96xf32>
    %755 = math.exp %754 : vector<8x96xf32>
    %cst_142 = arith.constant 1.000000e+00 : f32
    %756 = vector.broadcast %cst_142 : f32 to vector<8x96xf32>
    %757 = arith.addf %756, %755 : vector<8x96xf32>
    %758 = arith.divf %756, %757 : vector<8x96xf32>
    %759 = vector.extract_strided_slice %752 {offsets = [0, 96], sizes = [8, 32], strides = [1, 1]} : vector<8x128xf32> to vector<8x32xf32>
    %760 = math.tanh %759 : vector<8x32xf32>
    %761 = vector.extract_strided_slice %758 {offsets = [0, 0], sizes = [8, 32], strides = [1, 1]} : vector<8x96xf32> to vector<8x32xf32>
    %762 = vector.extract_strided_slice %758 {offsets = [0, 32], sizes = [8, 32], strides = [1, 1]} : vector<8x96xf32> to vector<8x32xf32>
    %763 = vector.extract_strided_slice %758 {offsets = [0, 64], sizes = [8, 32], strides = [1, 1]} : vector<8x96xf32> to vector<8x32xf32>
    %764 = arith.mulf %762, %724 : vector<8x32xf32>
    %765 = arith.mulf %761, %760 : vector<8x32xf32>
    %766 = arith.addf %764, %765 : vector<8x32xf32>
    %767 = math.tanh %766 : vector<8x32xf32>
    %768 = arith.mulf %763, %767 : vector<8x32xf32>
    %cst_143 = arith.constant dense<0.000000e+00> : vector<8x128xf32>
    %769 = tpu.matmul %726, %1, %cst_143 {dimension_numbers = #tpu.dot_dimension_numbers<[1], [0], [0], [1], [0, 0, 1, 1], [], []>} : vector<8x32xf32>, vector<32x128xf32>, vector<8x128xf32> -> vector<8x128xf32>
    %cst_144 = arith.constant dense<0.000000e+00> : vector<8x128xf32>
    %770 = tpu.matmul %746, %3, %cst_144 {dimension_numbers = #tpu.dot_dimension_numbers<[1], [0], [0], [1], [0, 0, 1, 1], [], []>} : vector<8x32xf32>, vector<32x128xf32>, vector<8x128xf32> -> vector<8x128xf32>
    %771 = arith.addf %769, %770 : vector<8x128xf32>
    %772 = arith.addf %771, %12 : vector<8x128xf32>
    %773 = vector.extract_strided_slice %772 {offsets = [0, 0], sizes = [8, 96], strides = [1, 1]} : vector<8x128xf32> to vector<8x96xf32>
    %774 = arith.negf %773 : vector<8x96xf32>
    %775 = math.exp %774 : vector<8x96xf32>
    %cst_145 = arith.constant 1.000000e+00 : f32
    %776 = vector.broadcast %cst_145 : f32 to vector<8x96xf32>
    %777 = arith.addf %776, %775 : vector<8x96xf32>
    %778 = arith.divf %776, %777 : vector<8x96xf32>
    %779 = vector.extract_strided_slice %772 {offsets = [0, 96], sizes = [8, 32], strides = [1, 1]} : vector<8x128xf32> to vector<8x32xf32>
    %780 = math.tanh %779 : vector<8x32xf32>
    %781 = vector.extract_strided_slice %778 {offsets = [0, 0], sizes = [8, 32], strides = [1, 1]} : vector<8x96xf32> to vector<8x32xf32>
    %782 = vector.extract_strided_slice %778 {offsets = [0, 32], sizes = [8, 32], strides = [1, 1]} : vector<8x96xf32> to vector<8x32xf32>
    %783 = vector.extract_strided_slice %778 {offsets = [0, 64], sizes = [8, 32], strides = [1, 1]} : vector<8x96xf32> to vector<8x32xf32>
    %784 = arith.mulf %782, %744 : vector<8x32xf32>
    %785 = arith.mulf %781, %780 : vector<8x32xf32>
    %786 = arith.addf %784, %785 : vector<8x32xf32>
    %787 = math.tanh %786 : vector<8x32xf32>
    %788 = arith.mulf %783, %787 : vector<8x32xf32>
    %c19_i32 = arith.constant 19 : i32
    %c8_i32_146 = arith.constant 8 : i32
    %789 = arith.muli %c19_i32, %c8_i32_146 : i32
    %790 = tpu.assume_multiple %789, 8 : i32
    %791 = arith.index_cast %790 : i32 to index
    %c0_147 = arith.constant 0 : index
    %792 = vector.load %arg10[%791, %c0_147] : memref<168x128xf32, #tpu.memory_space<vmem>>, vector<8x128xf32>
    %cst_148 = arith.constant dense<0.000000e+00> : vector<8x128xf32>
    %793 = tpu.matmul %768, %2, %cst_148 {dimension_numbers = #tpu.dot_dimension_numbers<[1], [0], [0], [1], [0, 0, 1, 1], [], []>} : vector<8x32xf32>, vector<32x128xf32>, vector<8x128xf32> -> vector<8x128xf32>
    %794 = arith.addf %792, %793 : vector<8x128xf32>
    %795 = vector.extract_strided_slice %794 {offsets = [0, 0], sizes = [8, 96], strides = [1, 1]} : vector<8x128xf32> to vector<8x96xf32>
    %796 = arith.negf %795 : vector<8x96xf32>
    %797 = math.exp %796 : vector<8x96xf32>
    %cst_149 = arith.constant 1.000000e+00 : f32
    %798 = vector.broadcast %cst_149 : f32 to vector<8x96xf32>
    %799 = arith.addf %798, %797 : vector<8x96xf32>
    %800 = arith.divf %798, %799 : vector<8x96xf32>
    %801 = vector.extract_strided_slice %794 {offsets = [0, 96], sizes = [8, 32], strides = [1, 1]} : vector<8x128xf32> to vector<8x32xf32>
    %802 = math.tanh %801 : vector<8x32xf32>
    %803 = vector.extract_strided_slice %800 {offsets = [0, 0], sizes = [8, 32], strides = [1, 1]} : vector<8x96xf32> to vector<8x32xf32>
    %804 = vector.extract_strided_slice %800 {offsets = [0, 32], sizes = [8, 32], strides = [1, 1]} : vector<8x96xf32> to vector<8x32xf32>
    %805 = vector.extract_strided_slice %800 {offsets = [0, 64], sizes = [8, 32], strides = [1, 1]} : vector<8x96xf32> to vector<8x32xf32>
    %806 = arith.mulf %804, %766 : vector<8x32xf32>
    %807 = arith.mulf %803, %802 : vector<8x32xf32>
    %808 = arith.addf %806, %807 : vector<8x32xf32>
    %809 = math.tanh %808 : vector<8x32xf32>
    %810 = arith.mulf %805, %809 : vector<8x32xf32>
    %cst_150 = arith.constant dense<0.000000e+00> : vector<8x128xf32>
    %811 = tpu.matmul %768, %1, %cst_150 {dimension_numbers = #tpu.dot_dimension_numbers<[1], [0], [0], [1], [0, 0, 1, 1], [], []>} : vector<8x32xf32>, vector<32x128xf32>, vector<8x128xf32> -> vector<8x128xf32>
    %cst_151 = arith.constant dense<0.000000e+00> : vector<8x128xf32>
    %812 = tpu.matmul %788, %3, %cst_151 {dimension_numbers = #tpu.dot_dimension_numbers<[1], [0], [0], [1], [0, 0, 1, 1], [], []>} : vector<8x32xf32>, vector<32x128xf32>, vector<8x128xf32> -> vector<8x128xf32>
    %813 = arith.addf %811, %812 : vector<8x128xf32>
    %814 = arith.addf %813, %12 : vector<8x128xf32>
    %815 = vector.extract_strided_slice %814 {offsets = [0, 0], sizes = [8, 96], strides = [1, 1]} : vector<8x128xf32> to vector<8x96xf32>
    %816 = arith.negf %815 : vector<8x96xf32>
    %817 = math.exp %816 : vector<8x96xf32>
    %cst_152 = arith.constant 1.000000e+00 : f32
    %818 = vector.broadcast %cst_152 : f32 to vector<8x96xf32>
    %819 = arith.addf %818, %817 : vector<8x96xf32>
    %820 = arith.divf %818, %819 : vector<8x96xf32>
    %821 = vector.extract_strided_slice %814 {offsets = [0, 96], sizes = [8, 32], strides = [1, 1]} : vector<8x128xf32> to vector<8x32xf32>
    %822 = math.tanh %821 : vector<8x32xf32>
    %823 = vector.extract_strided_slice %820 {offsets = [0, 0], sizes = [8, 32], strides = [1, 1]} : vector<8x96xf32> to vector<8x32xf32>
    %824 = vector.extract_strided_slice %820 {offsets = [0, 32], sizes = [8, 32], strides = [1, 1]} : vector<8x96xf32> to vector<8x32xf32>
    %825 = vector.extract_strided_slice %820 {offsets = [0, 64], sizes = [8, 32], strides = [1, 1]} : vector<8x96xf32> to vector<8x32xf32>
    %826 = arith.mulf %824, %786 : vector<8x32xf32>
    %827 = arith.mulf %823, %822 : vector<8x32xf32>
    %828 = arith.addf %826, %827 : vector<8x32xf32>
    %829 = math.tanh %828 : vector<8x32xf32>
    %830 = arith.mulf %825, %829 : vector<8x32xf32>
    %c20_i32 = arith.constant 20 : i32
    %c8_i32_153 = arith.constant 8 : i32
    %831 = arith.muli %c20_i32, %c8_i32_153 : i32
    %832 = tpu.assume_multiple %831, 8 : i32
    %833 = arith.index_cast %832 : i32 to index
    %c0_154 = arith.constant 0 : index
    %834 = vector.load %arg10[%833, %c0_154] : memref<168x128xf32, #tpu.memory_space<vmem>>, vector<8x128xf32>
    %cst_155 = arith.constant dense<0.000000e+00> : vector<8x128xf32>
    %835 = tpu.matmul %810, %2, %cst_155 {dimension_numbers = #tpu.dot_dimension_numbers<[1], [0], [0], [1], [0, 0, 1, 1], [], []>} : vector<8x32xf32>, vector<32x128xf32>, vector<8x128xf32> -> vector<8x128xf32>
    %836 = arith.addf %834, %835 : vector<8x128xf32>
    %837 = vector.extract_strided_slice %836 {offsets = [0, 0], sizes = [8, 96], strides = [1, 1]} : vector<8x128xf32> to vector<8x96xf32>
    %838 = arith.negf %837 : vector<8x96xf32>
    %839 = math.exp %838 : vector<8x96xf32>
    %cst_156 = arith.constant 1.000000e+00 : f32
    %840 = vector.broadcast %cst_156 : f32 to vector<8x96xf32>
    %841 = arith.addf %840, %839 : vector<8x96xf32>
    %842 = arith.divf %840, %841 : vector<8x96xf32>
    %843 = vector.extract_strided_slice %836 {offsets = [0, 96], sizes = [8, 32], strides = [1, 1]} : vector<8x128xf32> to vector<8x32xf32>
    %844 = math.tanh %843 : vector<8x32xf32>
    %845 = vector.extract_strided_slice %842 {offsets = [0, 0], sizes = [8, 32], strides = [1, 1]} : vector<8x96xf32> to vector<8x32xf32>
    %846 = vector.extract_strided_slice %842 {offsets = [0, 32], sizes = [8, 32], strides = [1, 1]} : vector<8x96xf32> to vector<8x32xf32>
    %847 = vector.extract_strided_slice %842 {offsets = [0, 64], sizes = [8, 32], strides = [1, 1]} : vector<8x96xf32> to vector<8x32xf32>
    %848 = arith.mulf %846, %808 : vector<8x32xf32>
    %849 = arith.mulf %845, %844 : vector<8x32xf32>
    %850 = arith.addf %848, %849 : vector<8x32xf32>
    %851 = math.tanh %850 : vector<8x32xf32>
    %852 = arith.mulf %847, %851 : vector<8x32xf32>
    %cst_157 = arith.constant dense<0.000000e+00> : vector<8x128xf32>
    %853 = tpu.matmul %810, %1, %cst_157 {dimension_numbers = #tpu.dot_dimension_numbers<[1], [0], [0], [1], [0, 0, 1, 1], [], []>} : vector<8x32xf32>, vector<32x128xf32>, vector<8x128xf32> -> vector<8x128xf32>
    %cst_158 = arith.constant dense<0.000000e+00> : vector<8x128xf32>
    %854 = tpu.matmul %830, %3, %cst_158 {dimension_numbers = #tpu.dot_dimension_numbers<[1], [0], [0], [1], [0, 0, 1, 1], [], []>} : vector<8x32xf32>, vector<32x128xf32>, vector<8x128xf32> -> vector<8x128xf32>
    %855 = arith.addf %853, %854 : vector<8x128xf32>
    %856 = arith.addf %855, %12 : vector<8x128xf32>
    %857 = vector.extract_strided_slice %856 {offsets = [0, 0], sizes = [8, 96], strides = [1, 1]} : vector<8x128xf32> to vector<8x96xf32>
    %858 = arith.negf %857 : vector<8x96xf32>
    %859 = math.exp %858 : vector<8x96xf32>
    %cst_159 = arith.constant 1.000000e+00 : f32
    %860 = vector.broadcast %cst_159 : f32 to vector<8x96xf32>
    %861 = arith.addf %860, %859 : vector<8x96xf32>
    %862 = arith.divf %860, %861 : vector<8x96xf32>
    %863 = vector.extract_strided_slice %856 {offsets = [0, 96], sizes = [8, 32], strides = [1, 1]} : vector<8x128xf32> to vector<8x32xf32>
    %864 = math.tanh %863 : vector<8x32xf32>
    %865 = vector.extract_strided_slice %862 {offsets = [0, 0], sizes = [8, 32], strides = [1, 1]} : vector<8x96xf32> to vector<8x32xf32>
    %866 = vector.extract_strided_slice %862 {offsets = [0, 32], sizes = [8, 32], strides = [1, 1]} : vector<8x96xf32> to vector<8x32xf32>
    %867 = vector.extract_strided_slice %862 {offsets = [0, 64], sizes = [8, 32], strides = [1, 1]} : vector<8x96xf32> to vector<8x32xf32>
    %868 = arith.mulf %866, %828 : vector<8x32xf32>
    %869 = arith.mulf %865, %864 : vector<8x32xf32>
    %870 = arith.addf %868, %869 : vector<8x32xf32>
    %871 = math.tanh %870 : vector<8x32xf32>
    %872 = arith.mulf %867, %871 : vector<8x32xf32>
    %c20_i32_160 = arith.constant 20 : i32
    %cst_161 = arith.constant dense<0.000000e+00> : vector<8x128xf32>
    %873 = tpu.matmul %852, %1, %cst_161 {dimension_numbers = #tpu.dot_dimension_numbers<[1], [0], [0], [1], [0, 0, 1, 1], [], []>} : vector<8x32xf32>, vector<32x128xf32>, vector<8x128xf32> -> vector<8x128xf32>
    %cst_162 = arith.constant dense<0.000000e+00> : vector<8x128xf32>
    %874 = tpu.matmul %872, %3, %cst_162 {dimension_numbers = #tpu.dot_dimension_numbers<[1], [0], [0], [1], [0, 0, 1, 1], [], []>} : vector<8x32xf32>, vector<32x128xf32>, vector<8x128xf32> -> vector<8x128xf32>
    %875 = arith.addf %873, %874 : vector<8x128xf32>
    %876 = arith.addf %875, %12 : vector<8x128xf32>
    %877 = vector.extract_strided_slice %876 {offsets = [0, 0], sizes = [8, 96], strides = [1, 1]} : vector<8x128xf32> to vector<8x96xf32>
    %878 = arith.negf %877 : vector<8x96xf32>
    %879 = math.exp %878 : vector<8x96xf32>
    %cst_163 = arith.constant 1.000000e+00 : f32
    %880 = vector.broadcast %cst_163 : f32 to vector<8x96xf32>
    %881 = arith.addf %880, %879 : vector<8x96xf32>
    %882 = arith.divf %880, %881 : vector<8x96xf32>
    %883 = vector.extract_strided_slice %876 {offsets = [0, 96], sizes = [8, 32], strides = [1, 1]} : vector<8x128xf32> to vector<8x32xf32>
    %884 = math.tanh %883 : vector<8x32xf32>
    %885 = vector.extract_strided_slice %882 {offsets = [0, 0], sizes = [8, 32], strides = [1, 1]} : vector<8x96xf32> to vector<8x32xf32>
    %886 = vector.extract_strided_slice %882 {offsets = [0, 32], sizes = [8, 32], strides = [1, 1]} : vector<8x96xf32> to vector<8x32xf32>
    %887 = vector.extract_strided_slice %882 {offsets = [0, 64], sizes = [8, 32], strides = [1, 1]} : vector<8x96xf32> to vector<8x32xf32>
    %888 = arith.mulf %886, %870 : vector<8x32xf32>
    %889 = arith.mulf %885, %884 : vector<8x32xf32>
    %890 = arith.addf %888, %889 : vector<8x32xf32>
    %891 = math.tanh %890 : vector<8x32xf32>
    %892 = arith.mulf %887, %891 : vector<8x32xf32>
    %893 = tpu.concatenate %852, %892 in 0 : vector<8x32xf32>, vector<8x32xf32> -> vector<16x32xf32>
    %c0_164 = arith.constant 0 : index
    %c0_165 = arith.constant 0 : index
    %894 = vector.load %arg7[%c0_164, %c0_165] : memref<32x128xf32, #tpu.memory_space<vmem>>, vector<32x128xf32>
    %cst_166 = arith.constant dense<0.000000e+00> : vector<16x128xf32>
    %895 = tpu.matmul %893, %894, %cst_166 {dimension_numbers = #tpu.dot_dimension_numbers<[1], [0], [0], [1], [0, 0, 1, 1], [], []>} : vector<16x32xf32>, vector<32x128xf32>, vector<16x128xf32> -> vector<16x128xf32>
    %c0_167 = arith.constant 0 : index
    %c0_168 = arith.constant 0 : index
    %896 = vector.load %arg8[%c0_167, %c0_168] : memref<1x128xf32, #tpu.memory_space<vmem>>, vector<1x128xf32>
    %897 = vector.broadcast %896 : vector<1x128xf32> to vector<16x128xf32>
    %898 = arith.addf %895, %897 : vector<16x128xf32>
    %c0_169 = arith.constant 0 : index
    %c0_170 = arith.constant 0 : index
    %899 = vector.load %arg9[%c0_169, %c0_170] : memref<16x128xf32, #tpu.memory_space<vmem>>, vector<16x128xf32>
    tpu.vector_store %arg9[%c0_169, %c0_170], %898 {strides = array<i32>} : memref<16x128xf32, #tpu.memory_space<vmem>>, vector<16x128xf32>,
    return
  }
}

</mosaic_0001>

<bundles_post_ra>
// kernel: tpu_custom_call.1
= control target key start
LH: loop header
LB: loop body
LE: loop exit
PB: predicated region body
PF: predicated region fallthrough
CT: control target
= control target key end

     0   :  { %vm139_vm0 = vcmask 1043456   ;;  %v8222_v2 = vmov 0.0   ;;  %vm8223_vm1 = vmmov 0   ;;  %vm75_vm2 = vcmask 31744   ;;  %s9324_s0 = inlined_call_operand.vmem [shape: f32[168,4], index: 0, kind: input, shape index: {}]   ;;  %s9325_s1 = inlined_call_operand.vmem [shape: f32[4,128], index: 1, kind: input, shape index: {}]   ;;  %s9326_s2 = inlined_call_operand.vmem [shape: f32[32,128], index: 2, kind: input, shape index: {}]   ;;  %s9327_s3 = inlined_call_operand.vmem [shape: f32[1,128], index: 3, kind: input, shape index: {}]   ;;  %s9328_s4 = inlined_call_operand.vmem [shape: f32[32,128], index: 4, kind: input, shape index: {}]   ;;  %s9329_s5 = inlined_call_operand.vmem [shape: f32[32,128], index: 5, kind: input, shape index: {}]   ;;  %s9330_s6 = inlined_call_operand.vmem [shape: f32[1,128], index: 6, kind: input, shape index: {}]   ;;  %s9331_s7 = inlined_call_operand.vmem [shape: f32[32,128], index: 7, kind: input, shape index: {}]   ;;  %s9332_s8 = inlined_call_operand.vmem [shape: f32[1,128], index: 8, kind: input, shape index: {}]   ;;  %s9333_s9 = inlined_call_operand.hbm [shape: f32[16,128], index: 9, kind: output, shape index: {}]  }
   0x1   :  { %v33_v0 = vld [vmem:[%s9325_s1] sm:$0xf]  ;;  %6632 = vmatprep.subr.mxu0 %v8222_v2  ;;  %6634 = vmatprep.mubr.msk.f32.mxu0 %vm8223_vm1, %v8222_v2  ;;  %v39_v4 = vld [vmem:[%s9326_s2 + $0x8] sm:$0xff]  ;;  %v8224_v6 = vmov 0.0|0.0   ;;  %v40_v8 = vld [vmem:[%s9326_s2 + $0x10] sm:$0xff] }
   0x2   :  { %v48_v1 = vld [vmem:[%s9324_s0] sm:$0xff]  ;;  %6633 = vmatpush3.msk.msra.mxu0 %vm139_vm0, %v33_v0  ;;  %7413 = vmatprep.subr.bf16.mxu1 %v8224_v6  ;;  %v49_v7 = vld [vmem:[%s9324_s0 + $0x8] sm:$0xff]  ;;  %v41_v9 = vld [vmem:[%s9326_s2 + $0x18] sm:$0xff] }
   0x3   :  { %v38_v3 = vld [vmem:[%s9326_s2] sm:$0xff]  ;;  %6635 = vmatmul.mubr.msk.f32.vlgmr.msra.gmra.mrb[0].mxu0 %vm75_vm2, %v48_v1  ;;  %7401 = vmatprep.subr.bf16.mxu0 %v8224_v6  ;;  %v8315_v10 = vpack.c.bf16 %v41_v9, %v40_v8  ;;  %v50_v11 = vld [vmem:[%s9324_s0 + $0x10] sm:$0xff] }
   0x4   :  { %v8295_v5 = vpack.c.bf16 %v39_v4, %v38_v3  ;;  %6637 = vmatprep.mubr.msk.f32.mxu0 %vm8223_vm1, %v8222_v2  ;;  %6727 = vmatprep.mubr.msk.f32.mxu1 %vm8223_vm1, %v8222_v2 }
   0x6   :  { %7403 = vmatpush3.bf16.msra.mxu0 %v8295_v5 }
   0x7   :  { %7404 = vmatprep.subr.bf16.mxu0 %v8224_v6  ;;  %6638 = vmatmul.mubr.msk.f32.gmra.mrb[2].mxu0 %vm75_vm2, %v49_v7 }
   0x8   :  { %6640 = vmatprep.mubr.msk.f32.mxu0 %vm8223_vm1, %v8222_v2 }
   0xa   :  { %7406 = vmatpush3.bf16.msra.mxu0 %v8315_v10 }
   0xb   :  { %7407 = vmatprep.subr.bf16.mxu0 %v8224_v6 }
   0xc   :  { %14 = vsyncpa [#allocation4], 0  ;;  %6641 = vmatmul.mubr.msk.f32.gmra.mrb[4].mxu0 %vm75_vm2, %v50_v11  ;;  %v51_v12 = vld [vmem:[%s9324_s0 + $0x18] sm:$0xff]  ;;  %v52_v13 = vld [vmem:[%s9324_s0 + $0x20] sm:$0xff]  ;;  %s8225_s16 = smov 32   ;;  %vm341_vm3 = vcmask 261120  }
   0xd   :  { %6643 = vmatprep.mubr.msk.f32.mxu0 %vm8223_vm1, %v8222_v2  ;;  %v53_v14 = vld [vmem:[%s9324_s0 + $0x28] sm:$0xff]  ;;  %v54_v15 = vld [vmem:[%s9324_s0 + $0x30] sm:$0xff]  ;;  %v55_v16 = vld [vmem:[%s9324_s0 + $0x38] sm:$0xff] }
   0xe   :  { %v56_v17 = vld [vmem:[%s9324_s0 + $0x40] sm:$0xff]  ;;  %v57_v18 = vld [vmem:[%s9324_s0 + $0x48] sm:$0xff]  ;;  %v58_v19 = vld [vmem:[%s9324_s0 + $0x50] sm:$0xff] }
   0xf   :  { %v59_v20 = vld [vmem:[%s9324_s0 + $0x58] sm:$0xff]  ;;  %v60_v21 = vld [vmem:[%s9324_s0 + $0x60] sm:$0xff]  ;;  %v61_v22 = vld [vmem:[%s9324_s0 + $0x68] sm:$0xff] }
  0x10   :  { %6644 = vmatmul.mubr.msk.f32.gmra.mrb[6].mxu0 %vm75_vm2, %v51_v12  ;;  %v62_v23 = vld [vmem:[%s9324_s0 + $0x70] sm:$0xff]  ;;  %v63_v24 = vld [vmem:[%s9324_s0 + $0x78] sm:$0xff]  ;;  %v64_v25 = vld [vmem:[%s9324_s0 + $0x80] sm:$0xff] }
  0x11   :  { %6646 = vmatprep.mubr.msk.f32.mxu0 %vm8223_vm1, %v8222_v2  ;;  %v65_v26 = vld [vmem:[%s9324_s0 + $0x88] sm:$0xff]  ;;  %v66_v27 = vld [vmem:[%s9324_s0 + $0x90] sm:$0xff]  ;;  %v67_v28 = vld [vmem:[%s9324_s0 + $0x98] sm:$0xff] }
  0x12   :  { %v68_v29 = vld [vmem:[%s9324_s0 + $0xa0] sm:$0xff]  ;;  %v43_v45 = vld [vmem:[%s9329_s5 + $0x8] sm:$0xff]  ;;  %v44_v46 = vld [vmem:[%s9329_s5 + $0x10] sm:$0xff] }
  0x13   :  { %v8446_v30 = vld [vmem:[%s9327_s3] ss:$0 sm:$0xff]  ;;  %v45_v48 = vld [vmem:[%s9329_s5 + $0x18] sm:$0xff]  ;;  %v35_v51 = vld [vmem:[%s9328_s4 + $0x8] sm:$0xff] }
  0x14   :  { %6647 = vmatmul.mubr.msk.f32.gmra.mrb[8].mxu0 %vm75_vm2, %v52_v13  ;;  %v42_v44 = vld [vmem:[%s9329_s5] sm:$0xff]  ;;  %v8469_v49 = vpack.c.bf16 %v45_v48, %v44_v46  ;;  %v36_v53 = vld [vmem:[%s9328_s4 + $0x10] sm:$0xff]  ;;  %v37_v54 = vld [vmem:[%s9328_s4 + $0x18] sm:$0xff] }
  0x15   :  { %6649 = vmatprep.mubr.msk.f32.mxu0 %vm8223_vm1, %v8222_v2  ;;  %v8463_v47 = vpack.c.bf16 %v43_v45, %v42_v44  ;;  %v34_v50 = vld [vmem:[%s9328_s4] sm:$0xff]  ;;  %v8491_v56 = vpack.c.bf16 %v37_v54, %v36_v53  ;;  %s8226_s4 = smov 64  }
  0x16   :  { %v8479_v52 = vpack.c.bf16 %v35_v51, %v34_v50  ;;  %v8516_v63 = vld [vmem:[%s9330_s6] ss:$0 sm:$0xff] }
  0x17   :  { %7415 = vmatpush3.bf16.msra.mxu1 %v8463_v47 }
  0x18   :  { %6650 = vmatmul.mubr.msk.f32.gmra.mrb[10].mxu0 %vm75_vm2, %v53_v14  ;;  %7416 = vmatprep.subr.bf16.mxu1 %v8224_v6 }
  0x19   :  { %6652 = vmatprep.mubr.msk.f32.mxu0 %vm8223_vm1, %v8222_v2 }
  0x1b   :  { %7418 = vmatpush3.bf16.msra.mxu1 %v8469_v49 }
  0x1c   :  { %6653 = vmatmul.mubr.msk.f32.gmra.mrb[12].mxu0 %vm75_vm2, %v54_v15  ;;  %7419 = vmatprep.subr.bf16.mxu1 %v8224_v6 }
  0x1d   :  { %6655 = vmatprep.mubr.msk.f32.mxu0 %vm8223_vm1, %v8222_v2 }
  0x1e   :  { %6728 = vmatmul.mubr.f32.vlgmr.msra.gmra.mrb[0].mxu1 %v8222_v2 }
  0x1f   :  { %7421 = vmatpush3.bf16.msra.mxu1 %v8479_v52  ;;  %6738 = vmatprep.mubr.msk.f32.mxu1 %vm8223_vm1, %v8222_v2 }
  0x20   :  { %6656 = vmatmul.mubr.msk.f32.gmra.mrb[14].mxu0 %vm75_vm2, %v55_v16  ;;  %7422 = vmatprep.subr.bf16.mxu1 %v8224_v6 }
  0x21   :  { %6658 = vmatprep.mubr.msk.f32.mxu0 %vm8223_vm1, %v8222_v2 }
  0x23   :  { %7424 = vmatpush3.bf16.msra.mxu1 %v8491_v56 }
  0x24   :  { %6659 = vmatmul.mubr.msk.f32.gmra.mrb[16].mxu0 %vm75_vm2, %v56_v17  ;;  %7431 = vmatprep.subr.bf16.mxu1 %v8224_v6 }
  0x25   :  { %6661 = vmatprep.mubr.msk.f32.mxu0 %vm8223_vm1, %v8222_v2 }
  0x28   :  { %6662 = vmatmul.mubr.msk.f32.gmra.mrb[18].mxu0 %vm75_vm2, %v57_v18 }
  0x29   :  { %6664 = vmatprep.mubr.msk.f32.mxu0 %vm8223_vm1, %v8222_v2 }
  0x2c   :  { %6665 = vmatmul.mubr.msk.f32.gmra.mrb[20].mxu0 %vm75_vm2, %v58_v19 }
  0x2d   :  { %6667 = vmatprep.mubr.msk.f32.mxu0 %vm8223_vm1, %v8222_v2 }
  0x30   :  { %6668 = vmatmul.mubr.msk.f32.gmra.mrb[22].mxu0 %vm75_vm2, %v59_v20 }
  0x31   :  { %6670 = vmatprep.mubr.msk.f32.mxu0 %vm8223_vm1, %v8222_v2 }
  0x34   :  { %6671 = vmatmul.mubr.msk.f32.gmra.mrb[24].mxu0 %vm75_vm2, %v60_v21 }
  0x35   :  { %6673 = vmatprep.mubr.msk.f32.mxu0 %vm8223_vm1, %v8222_v2 }
  0x38   :  { %6674 = vmatmul.mubr.msk.f32.gmra.mrb[26].mxu0 %vm75_vm2, %v61_v22 }
  0x39   :  { %6676 = vmatprep.mubr.msk.f32.mxu0 %vm8223_vm1, %v8222_v2 }
  0x3c   :  { %6677 = vmatmul.mubr.msk.f32.gmra.mrb[28].mxu0 %vm75_vm2, %v62_v23 }
  0x3d   :  { %6679 = vmatprep.mubr.msk.f32.mxu0 %vm8223_vm1, %v8222_v2 }
  0x40   :  { %6680 = vmatmul.mubr.msk.f32.gmra.mrb[30].mxu0 %vm75_vm2, %v63_v24 }
  0x41   :  { %6682 = vmatprep.mubr.msk.f32.mxu0 %vm8223_vm1, %v8222_v2 }
  0x44   :  { %6683 = vmatmul.mubr.msk.f32.gmra.mrb[32].mxu0 %vm75_vm2, %v64_v25 }
  0x45   :  { %6685 = vmatprep.mubr.msk.f32.mxu0 %vm8223_vm1, %v8222_v2 }
  0x48   :  { %6686 = vmatmul.mubr.msk.f32.gmra.mrb[34].mxu0 %vm75_vm2, %v65_v26 }
  0x49   :  { %6688 = vmatprep.mubr.msk.f32.mxu0 %vm8223_vm1, %v8222_v2 }
  0x4c   :  { %6689 = vmatmul.mubr.msk.f32.gmra.mrb[36].mxu0 %vm75_vm2, %v66_v27 }
  0x4d   :  { %6691 = vmatprep.mubr.msk.f32.mxu0 %vm8223_vm1, %v8222_v2 }
  0x50   :  { %6692 = vmatmul.mubr.msk.f32.gmra.mrb[38].mxu0 %vm75_vm2, %v67_v28 }
  0x51   :  { %6694 = vmatprep.mubr.msk.f32.mxu0 %vm8223_vm1, %v8222_v2 }
  0x54   :  { %6695 = vmatmul.mubr.msk.f32.gmra.mrb[40].mxu0 %vm75_vm2, %v68_v29 }
  0x55   :  { %6705 = vmatprep.mubr.msk.f32.mxu0 %vm8223_vm1, %v8222_v2 }
  0x58   :  { %6706 = vmatmul.mubr.f32.vlgmr.msra.gmra.mrb[0].mxu0 %v8222_v2 }
  0x59   :  { %7409 = vmatpush3.bf16.msra.mxu0 %v8295_v5  ;;  %6716 = vmatprep.mubr.msk.f32.mxu0 %vm8223_vm1, %v8222_v2 }
  0x5a   :  { %7410 = vmatprep.subr.bf16.mxu0 %v8224_v6 }
  0x5d   :  { %7412 = vmatpush3.bf16.msra.mxu0 %v8315_v10 }
  0x5e   :  { %7425 = vmatprep.subr.bf16.mxu0 %v8224_v6 }
  0xf1   :  { %v608_v59 = vpop.f32.mrb[0].mxu1 }
  0xf2   :  { %v6729_v60 = vpop.f32.mrb[1].mxu1 }
 0x12b   :  { %v411_v31 = vpop.f32.mrb[0].mxu0 }
 0x12c   :  { %v7787_v32 = vadd.f32 %v8446_v30, %v411_v31  ;;  %v6707_v33 = vpop.f32.mrb[1].mxu0 }
 0x12e   :  { %7858 = vtanh.f32 %v7787_v32  ;;  %v6183_v35 = vmul.f32 -1.442695, %v7787_v32 }
 0x130   :  { %7860 = vpow2.f32 %v6183_v35 }
 0x138   :  { %v7859_v34 = vpop.eup %7858 }
 0x139   :  { %425 = vrot.lane.b32.xlu0 %v7859_v34, %s8225_s16 }
 0x13a   :  { %v7861_v36 = vpop.eup %7860 }
 0x13b   :  { %v419_v37 = vadd.f32 1.0, %v7861_v36 }
 0x13d   :  { %7862 = vrcp.f32 %v419_v37 }
 0x147   :  { %v7863_v38 = vpop.eup %7862 }
 0x148   :  { %v423_v41 = vmul.f32 0.0, %v7863_v38 }
 0x1ab   :  { %v426_v39 = vpop.permute.xlu0 %425 }
 0x1ac   :  { %v428_v40 = vmul.f32 %v7863_v38, %v426_v39 }
 0x1ae   :  { %430 = vrot.lane.b32.xlu0 %v428_v40, %s8225_s16 }
 0x220   :  { %v431_v42 = vpop.permute.xlu0 %430 }
 0x221   :  { %v8451_v43 = vadd.f32 %v431_v42, %v423_v41 }
 0x223   :  { %7864 = vtanh.f32 %v8451_v43 }
 0x22d   :  { %v7865_v55 = vpop.eup %7864 }
 0x22e   :  { %436 = vrot.lane.b32.xlu1 %v7865_v55, %s8225_s16 }
 0x2a0   :  { %v437_v57 = vpop.permute.xlu1 %436 }
 0x2a1   :  { %v439_v58 = vmul.f32 %v7863_v38, %v437_v57 }
 0x2a3   :  { %443 = vrot.lane.b32.xlu1 %v439_v58, %s8226_s4 }
 0x315   :  { %v444_v61 = vpop.permute.xlu1 %443 }
 0x316   :  { %6717 = vmatmul.mubr.msk.f32.vlgmr.msra.gmra.mrb[2].mxu0 %vm341_vm3, %v444_v61  ;;  %6739 = vmatmul.mubr.msk.f32.vlgmr.msra.gmra.mrb[2].mxu1 %vm341_vm3, %v444_v61 }
 0x317   :  { %7427 = vmatpush3.bf16.msra.mxu0 %v8295_v5  ;;  %7433 = vmatpush3.bf16.msra.mxu1 %v8463_v47 }
 0x318   :  { %7428 = vmatprep.subr.bf16.mxu0 %v8224_v6  ;;  %7434 = vmatprep.subr.bf16.mxu1 %v8224_v6 }
 0x319   :  { %6749 = vmatprep.mubr.msk.f32.mxu0 %vm8223_vm1, %v8222_v2  ;;  %6760 = vmatprep.mubr.msk.f32.mxu1 %vm8223_vm1, %v8222_v2 }
 0x31b   :  { %7430 = vmatpush3.bf16.msra.mxu0 %v8315_v10  ;;  %7436 = vmatpush3.bf16.msra.mxu1 %v8469_v49 }
 0x31c   :  { %7437 = vmatprep.subr.bf16.mxu1 %v8224_v6  ;;  %7443 = vmatprep.subr.bf16.mxu0 %v8224_v6 }
 0x3e9   :  { %v513_v62 = vpop.f32.mrb[2].mxu0  ;;  %v678_v0 = vpop.f32.mrb[2].mxu1 }
 0x3ea   :  { %v7788_v1 = vadd.f32 %v8446_v30, %v513_v62  ;;  %v679_v3 = vadd.f32 %v678_v0, %v608_v59  ;;  %v6718_v4 = vpop.f32.mrb[3].mxu0  ;;  %v6740_v7 = vpop.f32.mrb[3].mxu1 }
 0x3ec   :  { %7866 = vtanh.f32 %v7788_v1  ;;  %v682_v8 = vadd.f32 %v8516_v63, %v679_v3  ;;  %v6185_v12 = vmul.f32 -1.442695, %v7788_v1 }
 0x3ee   :  { %7868 = vtanh.f32 %v682_v8  ;;  %v6187_v13 = vmul.f32 -1.442695, %v682_v8 }
 0x3ef   :  { %7870 = vpow2.f32 %v6185_v12 }
 0x3f0   :  { %7872 = vpow2.f32 %v6187_v13 }
 0x3f6   :  { %v7867_v9 = vpop.eup %7866 }
 0x3f7   :  { %527 = vrot.lane.b32.xlu1 %v7867_v9, %s8225_s16 }
 0x3f8   :  { %v7869_v11 = vpop.eup %7868 }
 0x3f9   :  { %692 = vrot.lane.b32.xlu0 %v7869_v11, %s8225_s16  ;;  %v7871_v14 = vpop.eup %7870 }
 0x3fa   :  { %v7873_v15 = vpop.eup %7872  ;;  %v521_v16 = vadd.f32 1.0, %v7871_v14 }
 0x3fb   :  { %v686_v17 = vadd.f32 1.0, %v7873_v15 }
 0x3fc   :  { %7874 = vrcp.f32 %v521_v16 }
 0x3fd   :  { %7876 = vrcp.f32 %v686_v17 }
 0x406   :  { %v7875_v18 = vpop.eup %7874 }
 0x407   :  { %v7877_v21 = vpop.eup %7876  ;;  %v525_v24 = vmul.f32 %v7875_v18, %v8451_v43 }
 0x408   :  { %v690_v27 = vmul.f32 0.0, %v7877_v21 }
 0x469   :  { %v528_v19 = vpop.permute.xlu1 %527 }
 0x46a   :  { %v530_v20 = vmul.f32 %v7875_v18, %v528_v19 }
 0x46b   :  { %v693_v22 = vpop.permute.xlu0 %692 }
 0x46c   :  { %532 = vrot.lane.b32.xlu1 %v530_v20, %s8225_s16  ;;  %v695_v23 = vmul.f32 %v7877_v21, %v693_v22 }
 0x46e   :  { %697 = vrot.lane.b32.xlu0 %v695_v23, %s8225_s16 }
 0x4de   :  { %v533_v25 = vpop.permute.xlu1 %532 }
 0x4df   :  { %v8525_v26 = vadd.f32 %v533_v25, %v525_v24 }
 0x4e0   :  { %v698_v28 = vpop.permute.xlu0 %697 }
 0x4e1   :  { %7878 = vtanh.f32 %v8525_v26  ;;  %v8528_v29 = vadd.f32 %v698_v28, %v690_v27 }
 0x4e3   :  { %7880 = vtanh.f32 %v8528_v29 }
 0x4eb   :  { %v7879_v31 = vpop.eup %7878 }
 0x4ec   :  { %538 = vrot.lane.b32.xlu1 %v7879_v31, %s8225_s16 }
 0x4ed   :  { %v7881_v32 = vpop.eup %7880 }
 0x4ee   :  { %703 = vrot.lane.b32.xlu0 %v7881_v32, %s8225_s16 }
 0x55e   :  { %v539_v33 = vpop.permute.xlu1 %538 }
 0x55f   :  { %v541_v34 = vmul.f32 %v7875_v18, %v539_v33 }
 0x560   :  { %v704_v35 = vpop.permute.xlu0 %703 }
 0x561   :  { %710 = vrot.lane.b32.xlu1 %v541_v34, %s8226_s4  ;;  %v706_v36 = vmul.f32 %v7877_v21, %v704_v35 }
 0x563   :  { %810 = vrot.lane.b32.xlu0 %v706_v36, %s8226_s4 }
 0x5d3   :  { %v711_v37 = vpop.permute.xlu1 %710 }
 0x5d4   :  { %6750 = vmatmul.mubr.msk.f32.vlgmr.msra.gmra.mrb[4].mxu0 %vm341_vm3, %v711_v37 }
 0x5d5   :  { %7445 = vmatpush3.bf16.msra.mxu0 %v8295_v5  ;;  %6782 = vmatprep.mubr.msk.f32.mxu0 %vm8223_vm1, %v8222_v2  ;;  %v811_v38 = vpop.permute.xlu0 %810 }
 0x5d6   :  { %7446 = vmatprep.subr.bf16.mxu0 %v8224_v6  ;;  %6761 = vmatmul.mubr.msk.f32.vlgmr.msra.gmra.mrb[4].mxu1 %vm341_vm3, %v811_v38 }
 0x5d7   :  { %7439 = vmatpush3.bf16.msra.mxu1 %v8479_v52  ;;  %6771 = vmatprep.mubr.msk.f32.mxu1 %vm8223_vm1, %v8222_v2 }
 0x5d8   :  { %7440 = vmatprep.subr.bf16.mxu1 %v8224_v6 }
 0x5d9   :  { %7448 = vmatpush3.bf16.msra.mxu0 %v8315_v10 }
 0x5da   :  { %7461 = vmatprep.subr.bf16.mxu0 %v8224_v6 }
 0x5db   :  { %7442 = vmatpush3.bf16.msra.mxu1 %v8491_v56 }
 0x5dc   :  { %7449 = vmatprep.subr.bf16.mxu1 %v8224_v6 }
 0x5de   :  { %6772 = vmatmul.mubr.msk.f32.vlgmr.msra.gmra.mrb[6].mxu1 %vm341_vm3, %v711_v37 }
 0x5df   :  { %7451 = vmatpush3.bf16.msra.mxu1 %v8463_v47  ;;  %6793 = vmatprep.mubr.msk.f32.mxu1 %vm8223_vm1, %v8222_v2 }
 0x5e0   :  { %7452 = vmatprep.subr.bf16.mxu1 %v8224_v6 }
 0x5e3   :  { %7454 = vmatpush3.bf16.msra.mxu1 %v8469_v49 }
 0x5e4   :  { %7455 = vmatprep.subr.bf16.mxu1 %v8224_v6 }
 0x6a7   :  { %v780_v39 = vpop.f32.mrb[4].mxu0 }
 0x6a8   :  { %v7789_v40 = vadd.f32 %v8446_v30, %v780_v39  ;;  %v6751_v41 = vpop.f32.mrb[5].mxu0 }
 0x6a9   :  { %v880_v42 = vpop.f32.mrb[4].mxu1 }
 0x6aa   :  { %7882 = vtanh.f32 %v7789_v40  ;;  %v6762_v43 = vpop.f32.mrb[5].mxu1  ;;  %v6189_v53 = vmul.f32 -1.442695, %v7789_v40 }
 0x6b1   :  { %v950_v44 = vpop.f32.mrb[6].mxu1 }
 0x6b2   :  { %v951_v45 = vadd.f32 %v950_v44, %v880_v42  ;;  %v6773_v46 = vpop.f32.mrb[7].mxu1 }
 0x6b4   :  { %v7883_v48 = vpop.eup %7882  ;;  %v954_v50 = vadd.f32 %v8516_v63, %v951_v45 }
 0x6b5   :  { %794 = vrot.lane.b32.xlu1 %v7883_v48, %s8225_s16 }
 0x6b6   :  { %7884 = vtanh.f32 %v954_v50  ;;  %v6192_v54 = vmul.f32 -1.442695, %v954_v50 }
 0x6b7   :  { %7886 = vpow2.f32 %v6189_v53 }
 0x6b8   :  { %7888 = vpow2.f32 %v6192_v54 }
 0x6c0   :  { %v7885_v51 = vpop.eup %7884 }
 0x6c1   :  { %964 = vrot.lane.b32.xlu0 %v7885_v51, %s8225_s16  ;;  %v7887_v55 = vpop.eup %7886 }
 0x6c2   :  { %v788_v57 = vadd.f32 1.0, %v7887_v55  ;;  %v7889_v58 = vpop.eup %7888 }
 0x6c3   :  { %v958_v59 = vadd.f32 1.0, %v7889_v58 }
 0x6c4   :  { %7890 = vrcp.f32 %v788_v57 }
 0x6c5   :  { %7892 = vrcp.f32 %v958_v59 }
 0x6ce   :  { %v7891_v60 = vpop.eup %7890 }
 0x6cf   :  { %v7893_v0 = vpop.eup %7892  ;;  %v792_v4 = vmul.f32 %v7891_v60, %v8525_v26 }
 0x6d0   :  { %v962_v9 = vmul.f32 %v7893_v0, %v8528_v29 }
 0x727   :  { %v795_v61 = vpop.permute.xlu1 %794 }
 0x728   :  { %v797_v62 = vmul.f32 %v7891_v60, %v795_v61 }
 0x72a   :  { %799 = vrot.lane.b32.xlu1 %v797_v62, %s8225_s16 }
 0x733   :  { %v965_v1 = vpop.permute.xlu0 %964 }
 0x734   :  { %v967_v3 = vmul.f32 %v7893_v0, %v965_v1 }
 0x736   :  { %969 = vrot.lane.b32.xlu0 %v967_v3, %s8225_s16 }
 0x79c   :  { %v800_v7 = vpop.permute.xlu1 %799 }
 0x79d   :  { %v8563_v8 = vadd.f32 %v800_v7, %v792_v4 }
 0x79f   :  { %7894 = vtanh.f32 %v8563_v8 }
 0x7a8   :  { %v970_v12 = vpop.permute.xlu0 %969 }
 0x7a9   :  { %v7895_v11 = vpop.eup %7894  ;;  %v8567_v13 = vadd.f32 %v970_v12, %v962_v9 }
 0x7aa   :  { %805 = vrot.lane.b32.xlu1 %v7895_v11, %s8225_s16 }
 0x7ab   :  { %7896 = vtanh.f32 %v8567_v13 }
 0x7b5   :  { %v7897_v14 = vpop.eup %7896 }
 0x7b6   :  { %975 = vrot.lane.b32.xlu0 %v7897_v14, %s8225_s16 }
 0x81c   :  { %v806_v15 = vpop.permute.xlu1 %805 }
 0x81d   :  { %v808_v16 = vmul.f32 %v7891_v60, %v806_v15 }
 0x81f   :  { %982 = vrot.lane.b32.xlu1 %v808_v16, %s8226_s4 }
 0x828   :  { %v976_v17 = vpop.permute.xlu0 %975 }
 0x829   :  { %v978_v18 = vmul.f32 %v7893_v0, %v976_v17 }
 0x82b   :  { %1082 = vrot.lane.b32.xlu0 %v978_v18, %s8226_s4 }
 0x891   :  { %v983_v19 = vpop.permute.xlu1 %982 }
 0x892   :  { %6783 = vmatmul.mubr.msk.f32.vlgmr.msra.gmra.mrb[6].mxu0 %vm341_vm3, %v983_v19 }
 0x893   :  { %7463 = vmatpush3.bf16.msra.mxu0 %v8295_v5  ;;  %6815 = vmatprep.mubr.msk.f32.mxu0 %vm8223_vm1, %v8222_v2 }
 0x894   :  { %7464 = vmatprep.subr.bf16.mxu0 %v8224_v6 }
 0x897   :  { %7466 = vmatpush3.bf16.msra.mxu0 %v8315_v10 }
 0x898   :  { %7479 = vmatprep.subr.bf16.mxu0 %v8224_v6 }
 0x89d   :  { %v1083_v20 = vpop.permute.xlu0 %1082 }
 0x89e   :  { %6794 = vmatmul.mubr.msk.f32.vlgmr.msra.gmra.mrb[8].mxu1 %vm341_vm3, %v1083_v20 }
 0x89f   :  { %7457 = vmatpush3.bf16.msra.mxu1 %v8479_v52  ;;  %6804 = vmatprep.mubr.msk.f32.mxu1 %vm8223_vm1, %v8222_v2 }
 0x8a0   :  { %7458 = vmatprep.subr.bf16.mxu1 %v8224_v6 }
 0x8a3   :  { %7460 = vmatpush3.bf16.msra.mxu1 %v8491_v56 }
 0x8a4   :  { %7467 = vmatprep.subr.bf16.mxu1 %v8224_v6 }
 0x8a6   :  { %6805 = vmatmul.mubr.msk.f32.vlgmr.msra.gmra.mrb[10].mxu1 %vm341_vm3, %v983_v19 }
 0x8a7   :  { %7469 = vmatpush3.bf16.msra.mxu1 %v8463_v47  ;;  %6826 = vmatprep.mubr.msk.f32.mxu1 %vm8223_vm1, %v8222_v2 }
 0x8a8   :  { %7470 = vmatprep.subr.bf16.mxu1 %v8224_v6 }
 0x8ab   :  { %7472 = vmatpush3.bf16.msra.mxu1 %v8469_v49 }
 0x8ac   :  { %7473 = vmatprep.subr.bf16.mxu1 %v8224_v6 }
 0x965   :  { %v1052_v21 = vpop.f32.mrb[6].mxu0 }
 0x966   :  { %v7790_v22 = vadd.f32 %v8446_v30, %v1052_v21  ;;  %v6784_v23 = vpop.f32.mrb[7].mxu0 }
 0x968   :  { %7898 = vtanh.f32 %v7790_v22  ;;  %v6194_v33 = vmul.f32 -1.442695, %v7790_v22 }
 0x971   :  { %v1152_v25 = vpop.f32.mrb[8].mxu1 }
 0x972   :  { %v7899_v24 = vpop.eup %7898  ;;  %v6795_v26 = vpop.f32.mrb[9].mxu1 }
 0x973   :  { %1066 = vrot.lane.b32.xlu1 %v7899_v24, %s8225_s16 }
 0x979   :  { %v1222_v27 = vpop.f32.mrb[10].mxu1 }
 0x97a   :  { %v1223_v28 = vadd.f32 %v1222_v27, %v1152_v25  ;;  %v6806_v29 = vpop.f32.mrb[11].mxu1 }
 0x97c   :  { %v1226_v31 = vadd.f32 %v8516_v63, %v1223_v28 }
 0x97e   :  { %7900 = vtanh.f32 %v1226_v31  ;;  %v6197_v36 = vmul.f32 -1.442695, %v1226_v31 }
 0x97f   :  { %7902 = vpow2.f32 %v6194_v33 }
 0x988   :  { %v7901_v32 = vpop.eup %7900 }
 0x989   :  { %1236 = vrot.lane.b32.xlu0 %v7901_v32, %s8225_s16  ;;  %v7903_v34 = vpop.eup %7902 }
 0x98a   :  { %v1060_v35 = vadd.f32 1.0, %v7903_v34 }
 0x98c   :  { %7904 = vrcp.f32 %v1060_v35 }
 0x98d   :  { %7906 = vpow2.f32 %v6197_v36 }
 0x996   :  { %v7905_v37 = vpop.eup %7904 }
 0x997   :  { %v7907_v40 = vpop.eup %7906  ;;  %v1064_v45 = vmul.f32 %v7905_v37, %v8563_v8 }
 0x998   :  { %v1230_v41 = vadd.f32 1.0, %v7907_v40 }
 0x99a   :  { %7908 = vrcp.f32 %v1230_v41 }
 0x9a4   :  { %v7909_v42 = vpop.eup %7908 }
 0x9a5   :  { %v1234_v51 = vmul.f32 %v7909_v42, %v8567_v13 }
 0x9e5   :  { %v1067_v38 = vpop.permute.xlu1 %1066 }
 0x9e6   :  { %v1069_v39 = vmul.f32 %v7905_v37, %v1067_v38 }
 0x9e8   :  { %1071 = vrot.lane.b32.xlu1 %v1069_v39, %s8225_s16 }
 0x9fb   :  { %v1237_v43 = vpop.permute.xlu0 %1236 }
 0x9fc   :  { %v1239_v44 = vmul.f32 %v7909_v42, %v1237_v43 }
 0x9fe   :  { %1241 = vrot.lane.b32.xlu0 %v1239_v44, %s8225_s16 }
 0xa5a   :  { %v1072_v46 = vpop.permute.xlu1 %1071 }
 0xa5b   :  { %v8602_v48 = vadd.f32 %v1072_v46, %v1064_v45 }
 0xa5d   :  { %7910 = vtanh.f32 %v8602_v48 }
 0xa67   :  { %v7911_v50 = vpop.eup %7910 }
 0xa68   :  { %1077 = vrot.lane.b32.xlu1 %v7911_v50, %s8225_s16 }
 0xa70   :  { %v1242_v53 = vpop.permute.xlu0 %1241 }
 0xa71   :  { %v8607_v54 = vadd.f32 %v1242_v53, %v1234_v51 }
 0xa73   :  { %7912 = vtanh.f32 %v8607_v54 }
 0xa7d   :  { %v7913_v55 = vpop.eup %7912 }
 0xa7e   :  { %1247 = vrot.lane.b32.xlu0 %v7913_v55, %s8225_s16 }
 0xada   :  { %v1078_v57 = vpop.permute.xlu1 %1077 }
 0xadb   :  { %v1080_v58 = vmul.f32 %v7905_v37, %v1078_v57 }
 0xadd   :  { %1254 = vrot.lane.b32.xlu1 %v1080_v58, %s8226_s4 }
 0xaf0   :  { %v1248_v59 = vpop.permute.xlu0 %1247 }
 0xaf1   :  { %v1250_v60 = vmul.f32 %v7909_v42, %v1248_v59 }
 0xaf3   :  { %1354 = vrot.lane.b32.xlu0 %v1250_v60, %s8226_s4 }
 0xb4f   :  { %v1255_v61 = vpop.permute.xlu1 %1254 }
 0xb50   :  { %6816 = vmatmul.mubr.msk.f32.vlgmr.msra.gmra.mrb[8].mxu0 %vm341_vm3, %v1255_v61 }
 0xb51   :  { %7481 = vmatpush3.bf16.msra.mxu0 %v8295_v5  ;;  %6848 = vmatprep.mubr.msk.f32.mxu0 %vm8223_vm1, %v8222_v2 }
 0xb52   :  { %7482 = vmatprep.subr.bf16.mxu0 %v8224_v6 }
 0xb55   :  { %7484 = vmatpush3.bf16.msra.mxu0 %v8315_v10 }
 0xb56   :  { %7497 = vmatprep.subr.bf16.mxu0 %v8224_v6 }
 0xb65   :  { %v1355_v62 = vpop.permute.xlu0 %1354 }
 0xb66   :  { %6827 = vmatmul.mubr.msk.f32.vlgmr.msra.gmra.mrb[12].mxu1 %vm341_vm3, %v1355_v62 }
 0xb67   :  { %7475 = vmatpush3.bf16.msra.mxu1 %v8479_v52  ;;  %6837 = vmatprep.mubr.msk.f32.mxu1 %vm8223_vm1, %v8222_v2 }
 0xb68   :  { %7476 = vmatprep.subr.bf16.mxu1 %v8224_v6 }
 0xb6b   :  { %7478 = vmatpush3.bf16.msra.mxu1 %v8491_v56 }
 0xb6c   :  { %7485 = vmatprep.subr.bf16.mxu1 %v8224_v6 }
 0xb6e   :  { %6838 = vmatmul.mubr.msk.f32.vlgmr.msra.gmra.mrb[14].mxu1 %vm341_vm3, %v1255_v61 }
 0xb6f   :  { %7487 = vmatpush3.bf16.msra.mxu1 %v8463_v47  ;;  %6859 = vmatprep.mubr.msk.f32.mxu1 %vm8223_vm1, %v8222_v2 }
 0xb70   :  { %7488 = vmatprep.subr.bf16.mxu1 %v8224_v6 }
 0xb73   :  { %7490 = vmatpush3.bf16.msra.mxu1 %v8469_v49 }
 0xb74   :  { %7491 = vmatprep.subr.bf16.mxu1 %v8224_v6 }
 0xc23   :  { %v1324_v0 = vpop.f32.mrb[8].mxu0 }
 0xc24   :  { %v7791_v1 = vadd.f32 %v8446_v30, %v1324_v0  ;;  %v6817_v3 = vpop.f32.mrb[9].mxu0 }
 0xc26   :  { %7914 = vtanh.f32 %v7791_v1  ;;  %v6199_v15 = vmul.f32 -1.442695, %v7791_v1 }
 0xc30   :  { %v7915_v4 = vpop.eup %7914 }
 0xc31   :  { %1338 = vrot.lane.b32.xlu1 %v7915_v4, %s8225_s16 }
 0xc39   :  { %v1424_v7 = vpop.f32.mrb[12].mxu1 }
 0xc3a   :  { %v6828_v8 = vpop.f32.mrb[13].mxu1 }
 0xc41   :  { %v1494_v9 = vpop.f32.mrb[14].mxu1 }
 0xc42   :  { %v1495_v11 = vadd.f32 %v1494_v9, %v1424_v7  ;;  %v6839_v12 = vpop.f32.mrb[15].mxu1 }
 0xc44   :  { %v1498_v13 = vadd.f32 %v8516_v63, %v1495_v11 }
 0xc46   :  { %7916 = vtanh.f32 %v1498_v13  ;;  %v6202_v21 = vmul.f32 -1.442695, %v1498_v13 }
 0xc47   :  { %7918 = vpow2.f32 %v6199_v15 }
 0xc50   :  { %v7917_v14 = vpop.eup %7916 }
 0xc51   :  { %1508 = vrot.lane.b32.xlu0 %v7917_v14, %s8225_s16  ;;  %v7919_v16 = vpop.eup %7918 }
 0xc52   :  { %v1332_v17 = vadd.f32 1.0, %v7919_v16 }
 0xc54   :  { %7920 = vrcp.f32 %v1332_v17 }
 0xc55   :  { %7922 = vpow2.f32 %v6202_v21 }
 0xc5e   :  { %v7921_v18 = vpop.eup %7920 }
 0xc5f   :  { %v7923_v22 = vpop.eup %7922  ;;  %v1336_v27 = vmul.f32 %v7921_v18, %v8602_v48 }
 0xc60   :  { %v1502_v23 = vadd.f32 1.0, %v7923_v22 }
 0xc62   :  { %7924 = vrcp.f32 %v1502_v23 }
 0xc6c   :  { %v7925_v24 = vpop.eup %7924 }
 0xc6d   :  { %v1506_v32 = vmul.f32 %v7925_v24, %v8607_v54 }
 0xca3   :  { %v1339_v19 = vpop.permute.xlu1 %1338 }
 0xca4   :  { %v1341_v20 = vmul.f32 %v7921_v18, %v1339_v19 }
 0xca6   :  { %1343 = vrot.lane.b32.xlu1 %v1341_v20, %s8225_s16 }
 0xcc3   :  { %v1509_v25 = vpop.permute.xlu0 %1508 }
 0xcc4   :  { %v1511_v26 = vmul.f32 %v7925_v24, %v1509_v25 }
 0xcc6   :  { %1513 = vrot.lane.b32.xlu0 %v1511_v26, %s8225_s16 }
 0xd18   :  { %v1344_v28 = vpop.permute.xlu1 %1343 }
 0xd19   :  { %v8641_v29 = vadd.f32 %v1344_v28, %v1336_v27 }
 0xd1b   :  { %7926 = vtanh.f32 %v8641_v29 }
 0xd25   :  { %v7927_v31 = vpop.eup %7926 }
 0xd26   :  { %1349 = vrot.lane.b32.xlu1 %v7927_v31, %s8225_s16 }
 0xd38   :  { %v1514_v33 = vpop.permute.xlu0 %1513 }
 0xd39   :  { %v8646_v34 = vadd.f32 %v1514_v33, %v1506_v32 }
 0xd3b   :  { %7928 = vtanh.f32 %v8646_v34 }
 0xd45   :  { %v7929_v35 = vpop.eup %7928 }
 0xd46   :  { %1519 = vrot.lane.b32.xlu0 %v7929_v35, %s8225_s16 }
 0xd98   :  { %v1350_v36 = vpop.permute.xlu1 %1349 }
 0xd99   :  { %v1352_v37 = vmul.f32 %v7921_v18, %v1350_v36 }
 0xd9b   :  { %1526 = vrot.lane.b32.xlu1 %v1352_v37, %s8226_s4 }
 0xdb8   :  { %v1520_v38 = vpop.permute.xlu0 %1519 }
 0xdb9   :  { %v1522_v39 = vmul.f32 %v7925_v24, %v1520_v38 }
 0xdbb   :  { %1626 = vrot.lane.b32.xlu0 %v1522_v39, %s8226_s4 }
 0xe0d   :  { %v1527_v40 = vpop.permute.xlu1 %1526 }
 0xe0e   :  { %6849 = vmatmul.mubr.msk.f32.vlgmr.msra.gmra.mrb[10].mxu0 %vm341_vm3, %v1527_v40 }
 0xe0f   :  { %7499 = vmatpush3.bf16.msra.mxu0 %v8295_v5  ;;  %6881 = vmatprep.mubr.msk.f32.mxu0 %vm8223_vm1, %v8222_v2 }
 0xe10   :  { %7500 = vmatprep.subr.bf16.mxu0 %v8224_v6 }
 0xe13   :  { %7502 = vmatpush3.bf16.msra.mxu0 %v8315_v10 }
 0xe14   :  { %7515 = vmatprep.subr.bf16.mxu0 %v8224_v6 }
 0xe2d   :  { %v1627_v41 = vpop.permute.xlu0 %1626 }
 0xe2e   :  { %6860 = vmatmul.mubr.msk.f32.vlgmr.msra.gmra.mrb[16].mxu1 %vm341_vm3, %v1627_v41 }
 0xe2f   :  { %7493 = vmatpush3.bf16.msra.mxu1 %v8479_v52  ;;  %6870 = vmatprep.mubr.msk.f32.mxu1 %vm8223_vm1, %v8222_v2 }
 0xe30   :  { %7494 = vmatprep.subr.bf16.mxu1 %v8224_v6 }
 0xe33   :  { %7496 = vmatpush3.bf16.msra.mxu1 %v8491_v56 }
 0xe34   :  { %7503 = vmatprep.subr.bf16.mxu1 %v8224_v6 }
 0xe36   :  { %6871 = vmatmul.mubr.msk.f32.vlgmr.msra.gmra.mrb[18].mxu1 %vm341_vm3, %v1527_v40 }
 0xe37   :  { %7505 = vmatpush3.bf16.msra.mxu1 %v8463_v47  ;;  %6892 = vmatprep.mubr.msk.f32.mxu1 %vm8223_vm1, %v8222_v2 }
 0xe38   :  { %7506 = vmatprep.subr.bf16.mxu1 %v8224_v6 }
 0xe3b   :  { %7508 = vmatpush3.bf16.msra.mxu1 %v8469_v49 }
 0xe3c   :  { %7509 = vmatprep.subr.bf16.mxu1 %v8224_v6 }
 0xee1   :  { %v1596_v42 = vpop.f32.mrb[10].mxu0 }
 0xee2   :  { %v7792_v43 = vadd.f32 %v8446_v30, %v1596_v42  ;;  %v6850_v44 = vpop.f32.mrb[11].mxu0 }
 0xee4   :  { %7930 = vtanh.f32 %v7792_v43  ;;  %v6204_v57 = vmul.f32 -1.442695, %v7792_v43 }
 0xeee   :  { %v7931_v45 = vpop.eup %7930 }
 0xeef   :  { %1610 = vrot.lane.b32.xlu1 %v7931_v45, %s8225_s16 }
 0xf01   :  { %v1696_v46 = vpop.f32.mrb[16].mxu1 }
 0xf02   :  { %v6861_v48 = vpop.f32.mrb[17].mxu1 }
 0xf09   :  { %v1766_v50 = vpop.f32.mrb[18].mxu1 }
 0xf0a   :  { %v1767_v51 = vadd.f32 %v1766_v50, %v1696_v46  ;;  %v6872_v53 = vpop.f32.mrb[19].mxu1 }
 0xf0c   :  { %v1770_v54 = vadd.f32 %v8516_v63, %v1767_v51 }
 0xf0e   :  { %7932 = vtanh.f32 %v1770_v54  ;;  %v6207_v0 = vmul.f32 -1.442695, %v1770_v54 }
 0xf0f   :  { %7934 = vpow2.f32 %v6204_v57 }
 0xf18   :  { %v7933_v55 = vpop.eup %7932 }
 0xf19   :  { %1780 = vrot.lane.b32.xlu0 %v7933_v55, %s8225_s16  ;;  %v7935_v58 = vpop.eup %7934 }
 0xf1a   :  { %v1604_v59 = vadd.f32 1.0, %v7935_v58 }
 0xf1c   :  { %7936 = vrcp.f32 %v1604_v59 }
 0xf1d   :  { %7938 = vpow2.f32 %v6207_v0 }
 0xf26   :  { %v7937_v60 = vpop.eup %7936 }
 0xf27   :  { %v7939_v1 = vpop.eup %7938  ;;  %v1608_v9 = vmul.f32 %v7937_v60, %v8641_v29 }
 0xf28   :  { %v1774_v3 = vadd.f32 1.0, %v7939_v1 }
 0xf2a   :  { %7940 = vrcp.f32 %v1774_v3 }
 0xf34   :  { %v7941_v4 = vpop.eup %7940 }
 0xf35   :  { %v1778_v14 = vmul.f32 %v7941_v4, %v8646_v34 }
 0xf61   :  { %v1611_v61 = vpop.permute.xlu1 %1610 }
 0xf62   :  { %v1613_v62 = vmul.f32 %v7937_v60, %v1611_v61 }
 0xf64   :  { %1615 = vrot.lane.b32.xlu1 %v1613_v62, %s8225_s16 }
 0xf8b   :  { %v1781_v7 = vpop.permute.xlu0 %1780 }
 0xf8c   :  { %v1783_v8 = vmul.f32 %v7941_v4, %v1781_v7 }
 0xf8e   :  { %1785 = vrot.lane.b32.xlu0 %v1783_v8, %s8225_s16 }
 0xfd6   :  { %v1616_v11 = vpop.permute.xlu1 %1615 }
 0xfd7   :  { %v8680_v12 = vadd.f32 %v1616_v11, %v1608_v9 }
 0xfd9   :  { %7942 = vtanh.f32 %v8680_v12 }
 0xfe3   :  { %v7943_v13 = vpop.eup %7942 }
 0xfe4   :  { %1621 = vrot.lane.b32.xlu1 %v7943_v13, %s8225_s16 }
0x1000   :  { %v1786_v15 = vpop.permute.xlu0 %1785 }
0x1001   :  { %v8685_v16 = vadd.f32 %v1786_v15, %v1778_v14 }
0x1003   :  { %7944 = vtanh.f32 %v8685_v16 }
0x100d   :  { %v7945_v17 = vpop.eup %7944 }
0x100e   :  { %1791 = vrot.lane.b32.xlu0 %v7945_v17, %s8225_s16 }
0x1056   :  { %v1622_v18 = vpop.permute.xlu1 %1621 }
0x1057   :  { %v1624_v19 = vmul.f32 %v7937_v60, %v1622_v18 }
0x1059   :  { %1798 = vrot.lane.b32.xlu1 %v1624_v19, %s8226_s4 }
0x1080   :  { %v1792_v20 = vpop.permute.xlu0 %1791 }
0x1081   :  { %v1794_v21 = vmul.f32 %v7941_v4, %v1792_v20 }
0x1083   :  { %1898 = vrot.lane.b32.xlu0 %v1794_v21, %s8226_s4 }
0x10cb   :  { %v1799_v22 = vpop.permute.xlu1 %1798 }
0x10cc   :  { %6882 = vmatmul.mubr.msk.f32.vlgmr.msra.gmra.mrb[12].mxu0 %vm341_vm3, %v1799_v22 }
0x10cd   :  { %7517 = vmatpush3.bf16.msra.mxu0 %v8295_v5  ;;  %6914 = vmatprep.mubr.msk.f32.mxu0 %vm8223_vm1, %v8222_v2 }
0x10ce   :  { %7518 = vmatprep.subr.bf16.mxu0 %v8224_v6 }
0x10d1   :  { %7520 = vmatpush3.bf16.msra.mxu0 %v8315_v10 }
0x10d2   :  { %7533 = vmatprep.subr.bf16.mxu0 %v8224_v6 }
0x10f5   :  { %v1899_v23 = vpop.permute.xlu0 %1898 }
0x10f6   :  { %6893 = vmatmul.mubr.msk.f32.vlgmr.msra.gmra.mrb[20].mxu1 %vm341_vm3, %v1899_v23 }
0x10f7   :  { %7511 = vmatpush3.bf16.msra.mxu1 %v8479_v52  ;;  %6903 = vmatprep.mubr.msk.f32.mxu1 %vm8223_vm1, %v8222_v2 }
0x10f8   :  { %7512 = vmatprep.subr.bf16.mxu1 %v8224_v6 }
0x10fb   :  { %7514 = vmatpush3.bf16.msra.mxu1 %v8491_v56 }
0x10fc   :  { %7521 = vmatprep.subr.bf16.mxu1 %v8224_v6 }
0x10fe   :  { %6904 = vmatmul.mubr.msk.f32.vlgmr.msra.gmra.mrb[22].mxu1 %vm341_vm3, %v1799_v22 }
0x10ff   :  { %7523 = vmatpush3.bf16.msra.mxu1 %v8463_v47  ;;  %6925 = vmatprep.mubr.msk.f32.mxu1 %vm8223_vm1, %v8222_v2 }
0x1100   :  { %7524 = vmatprep.subr.bf16.mxu1 %v8224_v6 }
0x1103   :  { %7526 = vmatpush3.bf16.msra.mxu1 %v8469_v49 }
0x1104   :  { %7527 = vmatprep.subr.bf16.mxu1 %v8224_v6 }
0x119f   :  { %v1868_v24 = vpop.f32.mrb[12].mxu0 }
0x11a0   :  { %v7793_v25 = vadd.f32 %v8446_v30, %v1868_v24  ;;  %v6883_v26 = vpop.f32.mrb[13].mxu0 }
0x11a2   :  { %7946 = vtanh.f32 %v7793_v25  ;;  %v6209_v36 = vmul.f32 -1.442695, %v7793_v25 }
0x11ac   :  { %v7947_v27 = vpop.eup %7946 }
0x11ad   :  { %1882 = vrot.lane.b32.xlu1 %v7947_v27, %s8225_s16 }
0x11c9   :  { %v1968_v28 = vpop.f32.mrb[20].mxu1 }
0x11ca   :  { %v6894_v29 = vpop.f32.mrb[21].mxu1 }
0x11d1   :  { %v2038_v31 = vpop.f32.mrb[22].mxu1 }
0x11d2   :  { %v2039_v32 = vadd.f32 %v2038_v31, %v1968_v28  ;;  %v6905_v33 = vpop.f32.mrb[23].mxu1 }
0x11d4   :  { %v2042_v34 = vadd.f32 %v8516_v63, %v2039_v32 }
0x11d6   :  { %7948 = vtanh.f32 %v2042_v34  ;;  %v6212_v42 = vmul.f32 -1.442695, %v2042_v34 }
0x11d7   :  { %7950 = vpow2.f32 %v6209_v36 }
0x11e0   :  { %v7949_v35 = vpop.eup %7948 }
0x11e1   :  { %2052 = vrot.lane.b32.xlu0 %v7949_v35, %s8225_s16  ;;  %v7951_v37 = vpop.eup %7950 }
0x11e2   :  { %v1876_v38 = vadd.f32 1.0, %v7951_v37 }
0x11e4   :  { %7952 = vrcp.f32 %v1876_v38 }
0x11e5   :  { %7954 = vpow2.f32 %v6212_v42 }
0x11ee   :  { %v7953_v39 = vpop.eup %7952 }
0x11ef   :  { %v7955_v43 = vpop.eup %7954  ;;  %v1880_v50 = vmul.f32 %v7953_v39, %v8680_v12 }
0x11f0   :  { %v2046_v44 = vadd.f32 1.0, %v7955_v43 }
0x11f2   :  { %7956 = vrcp.f32 %v2046_v44 }
0x11fc   :  { %v7957_v45 = vpop.eup %7956 }
0x11fd   :  { %v2050_v55 = vmul.f32 %v7957_v45, %v8685_v16 }
0x121f   :  { %v1883_v40 = vpop.permute.xlu1 %1882 }
0x1220   :  { %v1885_v41 = vmul.f32 %v7953_v39, %v1883_v40 }
0x1222   :  { %1887 = vrot.lane.b32.xlu1 %v1885_v41, %s8225_s16 }
0x1253   :  { %v2053_v46 = vpop.permute.xlu0 %2052 }
0x1254   :  { %v2055_v48 = vmul.f32 %v7957_v45, %v2053_v46 }
0x1256   :  { %2057 = vrot.lane.b32.xlu0 %v2055_v48, %s8225_s16 }
0x1294   :  { %v1888_v51 = vpop.permute.xlu1 %1887 }
0x1295   :  { %v8719_v53 = vadd.f32 %v1888_v51, %v1880_v50 }
0x1297   :  { %7958 = vtanh.f32 %v8719_v53 }
0x12a1   :  { %v7959_v54 = vpop.eup %7958 }
0x12a2   :  { %1893 = vrot.lane.b32.xlu1 %v7959_v54, %s8225_s16 }
0x12c8   :  { %v2058_v57 = vpop.permute.xlu0 %2057 }
0x12c9   :  { %v8724_v58 = vadd.f32 %v2058_v57, %v2050_v55 }
0x12cb   :  { %7960 = vtanh.f32 %v8724_v58 }
0x12d5   :  { %v7961_v59 = vpop.eup %7960 }
0x12d6   :  { %2063 = vrot.lane.b32.xlu0 %v7961_v59, %s8225_s16 }
0x1314   :  { %v1894_v60 = vpop.permute.xlu1 %1893 }
0x1315   :  { %v1896_v61 = vmul.f32 %v7953_v39, %v1894_v60 }
0x1317   :  { %2070 = vrot.lane.b32.xlu1 %v1896_v61, %s8226_s4 }
0x1348   :  { %v2064_v62 = vpop.permute.xlu0 %2063 }
0x1349   :  { %v2066_v0 = vmul.f32 %v7957_v45, %v2064_v62  ;;  %v8793_v45 = vld [vmem:[%s9327_s3] ss:$0 sm:$0xff] }
0x134b   :  { %2170 = vrot.lane.b32.xlu0 %v2066_v0, %s8226_s4 }
0x1389   :  { %v2071_v1 = vpop.permute.xlu1 %2070 }
0x138a   :  { %6915 = vmatmul.mubr.msk.f32.vlgmr.msra.gmra.mrb[14].mxu0 %vm341_vm3, %v2071_v1 }
0x138b   :  { %7535 = vmatpush3.bf16.msra.mxu0 %v8295_v5  ;;  %6947 = vmatprep.mubr.msk.f32.mxu0 %vm8223_vm1, %v8222_v2 }
0x138c   :  { %7536 = vmatprep.subr.bf16.mxu0 %v8224_v6 }
0x138f   :  { %7538 = vmatpush3.bf16.msra.mxu0 %v8315_v10 }
0x1390   :  { %7551 = vmatprep.subr.bf16.mxu0 %v8224_v6 }
0x13bd   :  { %v2171_v3 = vpop.permute.xlu0 %2170 }
0x13be   :  { %6926 = vmatmul.mubr.msk.f32.vlgmr.msra.gmra.mrb[24].mxu1 %vm341_vm3, %v2171_v3 }
0x13bf   :  { %7529 = vmatpush3.bf16.msra.mxu1 %v8479_v52  ;;  %6936 = vmatprep.mubr.msk.f32.mxu1 %vm8223_vm1, %v8222_v2 }
0x13c0   :  { %7530 = vmatprep.subr.bf16.mxu1 %v8224_v6 }
0x13c3   :  { %7532 = vmatpush3.bf16.msra.mxu1 %v8491_v56 }
0x13c4   :  { %7539 = vmatprep.subr.bf16.mxu1 %v8224_v6 }
0x13c6   :  { %6937 = vmatmul.mubr.msk.f32.vlgmr.msra.gmra.mrb[26].mxu1 %vm341_vm3, %v2071_v1 }
0x13c7   :  { %7541 = vmatpush3.bf16.msra.mxu1 %v8463_v47  ;;  %6958 = vmatprep.mubr.msk.f32.mxu1 %vm8223_vm1, %v8222_v2 }
0x13c8   :  { %7542 = vmatprep.subr.bf16.mxu1 %v8224_v6 }
0x13cb   :  { %7544 = vmatpush3.bf16.msra.mxu1 %v8469_v49 }
0x13cc   :  { %7545 = vmatprep.subr.bf16.mxu1 %v8224_v6 }
0x145d   :  { %v2140_v4 = vpop.f32.mrb[14].mxu0 }
0x145e   :  { %v7794_v7 = vadd.f32 %v8446_v30, %v2140_v4  ;;  %v6916_v8 = vpop.f32.mrb[15].mxu0 }
0x1460   :  { %7962 = vtanh.f32 %v7794_v7  ;;  %v6214_v18 = vmul.f32 -1.442695, %v7794_v7 }
0x146a   :  { %v7963_v9 = vpop.eup %7962 }
0x146b   :  { %2154 = vrot.lane.b32.xlu1 %v7963_v9, %s8225_s16 }
0x1491   :  { %v2240_v11 = vpop.f32.mrb[24].mxu1 }
0x1492   :  { %v6927_v12 = vpop.f32.mrb[25].mxu1 }
0x1499   :  { %v2310_v13 = vpop.f32.mrb[26].mxu1 }
0x149a   :  { %v2311_v14 = vadd.f32 %v2310_v13, %v2240_v11  ;;  %v6938_v15 = vpop.f32.mrb[27].mxu1 }
0x149c   :  { %v2314_v16 = vadd.f32 %v8516_v63, %v2311_v14 }
0x149e   :  { %7964 = vtanh.f32 %v2314_v16  ;;  %v6217_v23 = vmul.f32 -1.442695, %v2314_v16 }
0x149f   :  { %7966 = vpow2.f32 %v6214_v18 }
0x14a8   :  { %v7965_v17 = vpop.eup %7964 }
0x14a9   :  { %2324 = vrot.lane.b32.xlu0 %v7965_v17, %s8225_s16  ;;  %v7967_v19 = vpop.eup %7966 }
0x14aa   :  { %v2148_v30 = vadd.f32 1.0, %v7967_v19 }
0x14ac   :  { %7968 = vrcp.f32 %v2148_v30 }
0x14ad   :  { %7970 = vpow2.f32 %v6217_v23 }
0x14b6   :  { %v7969_v20 = vpop.eup %7968 }
0x14b7   :  { %v7971_v24 = vpop.eup %7970  ;;  %v2152_v29 = vmul.f32 %v7969_v20, %v8719_v53 }
0x14b8   :  { %v2318_v25 = vadd.f32 1.0, %v7971_v24 }
0x14ba   :  { %7972 = vrcp.f32 %v2318_v25 }
0x14c4   :  { %v7973_v26 = vpop.eup %7972 }
0x14c5   :  { %v2322_v34 = vmul.f32 %v7973_v26, %v8724_v58 }
0x14dd   :  { %v2155_v21 = vpop.permute.xlu1 %2154 }
0x14de   :  { %v2157_v22 = vmul.f32 %v7969_v20, %v2155_v21 }
0x14e0   :  { %2159 = vrot.lane.b32.xlu1 %v2157_v22, %s8225_s16 }
0x151b   :  { %v2325_v27 = vpop.permute.xlu0 %2324 }
0x151c   :  { %v2327_v28 = vmul.f32 %v7973_v26, %v2325_v27 }
0x151e   :  { %2329 = vrot.lane.b32.xlu0 %v2327_v28, %s8225_s16 }
0x1552   :  { %v2160_v31 = vpop.permute.xlu1 %2159 }
0x1553   :  { %v8758_v32 = vadd.f32 %v2160_v31, %v2152_v29 }
0x1555   :  { %7974 = vtanh.f32 %v8758_v32 }
0x155f   :  { %v7975_v33 = vpop.eup %7974 }
0x1560   :  { %2165 = vrot.lane.b32.xlu1 %v7975_v33, %s8225_s16 }
0x1590   :  { %v2330_v35 = vpop.permute.xlu0 %2329 }
0x1591   :  { %v8763_v36 = vadd.f32 %v2330_v35, %v2322_v34  ;;  %v8839_v35 = vld [vmem:[%s9330_s6] ss:$0 sm:$0xff] }
0x1593   :  { %7976 = vtanh.f32 %v8763_v36 }
0x159d   :  { %v7977_v37 = vpop.eup %7976 }
0x159e   :  { %2335 = vrot.lane.b32.xlu0 %v7977_v37, %s8225_s16 }
0x15d2   :  { %v2166_v38 = vpop.permute.xlu1 %2165 }
0x15d3   :  { %v2168_v39 = vmul.f32 %v7969_v20, %v2166_v38 }
0x15d5   :  { %2342 = vrot.lane.b32.xlu1 %v2168_v39, %s8226_s4 }
0x1610   :  { %v2336_v40 = vpop.permute.xlu0 %2335 }
0x1611   :  { %v2338_v41 = vmul.f32 %v7973_v26, %v2336_v40 }
0x1613   :  { %2442 = vrot.lane.b32.xlu0 %v2338_v41, %s8226_s4 }
0x1647   :  { %v2343_v42 = vpop.permute.xlu1 %2342 }
0x1648   :  { %6948 = vmatmul.mubr.msk.f32.vlgmr.msra.gmra.mrb[16].mxu0 %vm341_vm3, %v2343_v42 }
0x1649   :  { %7553 = vmatpush3.bf16.msra.mxu0 %v8295_v5  ;;  %6980 = vmatprep.mubr.msk.f32.mxu0 %vm8223_vm1, %v8222_v2 }
0x164a   :  { %7554 = vmatprep.subr.bf16.mxu0 %v8224_v6 }
0x164d   :  { %7556 = vmatpush3.bf16.msra.mxu0 %v8315_v10 }
0x164e   :  { %7569 = vmatprep.subr.bf16.mxu0 %v8224_v6 }
0x1685   :  { %v2443_v43 = vpop.permute.xlu0 %2442 }
0x1686   :  { %6959 = vmatmul.mubr.msk.f32.vlgmr.msra.gmra.mrb[28].mxu1 %vm341_vm3, %v2443_v43 }
0x1687   :  { %7547 = vmatpush3.bf16.msra.mxu1 %v8479_v52  ;;  %6969 = vmatprep.mubr.msk.f32.mxu1 %vm8223_vm1, %v8222_v2 }
0x1688   :  { %7548 = vmatprep.subr.bf16.mxu1 %v8224_v6 }
0x168b   :  { %7550 = vmatpush3.bf16.msra.mxu1 %v8491_v56 }
0x168c   :  { %7557 = vmatprep.subr.bf16.mxu1 %v8224_v6 }
0x168e   :  { %6970 = vmatmul.mubr.msk.f32.vlgmr.msra.gmra.mrb[30].mxu1 %vm341_vm3, %v2343_v42 }
0x168f   :  { %7559 = vmatpush3.bf16.msra.mxu1 %v8463_v47  ;;  %6991 = vmatprep.mubr.msk.f32.mxu1 %vm8223_vm1, %v8222_v2 }
0x1690   :  { %7560 = vmatprep.subr.bf16.mxu1 %v8224_v6 }
0x1693   :  { %7562 = vmatpush3.bf16.msra.mxu1 %v8469_v49 }
0x1694   :  { %7563 = vmatprep.subr.bf16.mxu1 %v8224_v6 }
0x171b   :  { %v2412_v44 = vpop.f32.mrb[16].mxu0 }
0x171c   :  { %v7795_v46 = vadd.f32 %v8793_v45, %v2412_v44  ;;  %v6949_v48 = vpop.f32.mrb[17].mxu0 }
0x171e   :  { %7978 = vtanh.f32 %v7795_v46  ;;  %v6219_v60 = vmul.f32 -1.442695, %v7795_v46 }
0x1728   :  { %v7979_v50 = vpop.eup %7978 }
0x1729   :  { %2426 = vrot.lane.b32.xlu1 %v7979_v50, %s8225_s16 }
0x1759   :  { %v2512_v51 = vpop.f32.mrb[28].mxu1 }
0x175a   :  { %v6960_v53 = vpop.f32.mrb[29].mxu1 }
0x1761   :  { %v2582_v54 = vpop.f32.mrb[30].mxu1 }
0x1762   :  { %v2583_v55 = vadd.f32 %v2582_v54, %v2512_v51  ;;  %v6971_v57 = vpop.f32.mrb[31].mxu1 }
0x1764   :  { %v2586_v58 = vadd.f32 %v8516_v63, %v2583_v55 }
0x1766   :  { %7980 = vtanh.f32 %v2586_v58  ;;  %v6222_v4 = vmul.f32 -1.442695, %v2586_v58 }
0x1767   :  { %7982 = vpow2.f32 %v6219_v60 }
0x1770   :  { %v7981_v59 = vpop.eup %7980 }
0x1771   :  { %2596 = vrot.lane.b32.xlu0 %v7981_v59, %s8225_s16  ;;  %v7983_v61 = vpop.eup %7982 }
0x1772   :  { %v2420_v62 = vadd.f32 1.0, %v7983_v61 }
0x1774   :  { %7984 = vrcp.f32 %v2420_v62 }
0x1775   :  { %7986 = vpow2.f32 %v6222_v4 }
0x177e   :  { %v7985_v0 = vpop.eup %7984 }
0x177f   :  { %v7987_v7 = vpop.eup %7986  ;;  %v2424_v12 = vmul.f32 %v7985_v0, %v8758_v32 }
0x1780   :  { %v2590_v8 = vadd.f32 1.0, %v7987_v7 }
0x1782   :  { %7988 = vrcp.f32 %v2590_v8 }
0x178c   :  { %v7989_v63 = vpop.eup %7988 }
0x178d   :  { %v2594_v16 = vmul.f32 %v7989_v63, %v8763_v36 }
0x179b   :  { %v2427_v1 = vpop.permute.xlu1 %2426 }
0x179c   :  { %v2429_v3 = vmul.f32 %v7985_v0, %v2427_v1 }
0x179e   :  { %2431 = vrot.lane.b32.xlu1 %v2429_v3, %s8225_s16 }
0x17e3   :  { %v2597_v9 = vpop.permute.xlu0 %2596 }
0x17e4   :  { %v2599_v11 = vmul.f32 %v7989_v63, %v2597_v9 }
0x17e6   :  { %2601 = vrot.lane.b32.xlu0 %v2599_v11, %s8225_s16 }
0x1810   :  { %v2432_v13 = vpop.permute.xlu1 %2431 }
0x1811   :  { %v8802_v14 = vadd.f32 %v2432_v13, %v2424_v12 }
0x1813   :  { %7990 = vtanh.f32 %v8802_v14 }
0x181d   :  { %v7991_v15 = vpop.eup %7990 }
0x181e   :  { %2437 = vrot.lane.b32.xlu1 %v7991_v15, %s8225_s16 }
0x1858   :  { %v2602_v17 = vpop.permute.xlu0 %2601 }
0x1859   :  { %v8807_v18 = vadd.f32 %v2602_v17, %v2594_v16 }
0x185b   :  { %7992 = vtanh.f32 %v8807_v18 }
0x1865   :  { %v7993_v19 = vpop.eup %7992 }
0x1866   :  { %2607 = vrot.lane.b32.xlu0 %v7993_v19, %s8225_s16 }
0x1890   :  { %v2438_v30 = vpop.permute.xlu1 %2437 }
0x1891   :  { %v2440_v20 = vmul.f32 %v7985_v0, %v2438_v30 }
0x1893   :  { %2614 = vrot.lane.b32.xlu1 %v2440_v20, %s8226_s4 }
0x18d8   :  { %v2608_v21 = vpop.permute.xlu0 %2607 }
0x18d9   :  { %v2610_v22 = vmul.f32 %v7989_v63, %v2608_v21 }
0x18db   :  { %2714 = vrot.lane.b32.xlu0 %v2610_v22, %s8226_s4 }
0x1905   :  { %v2615_v23 = vpop.permute.xlu1 %2614 }
0x1906   :  { %6981 = vmatmul.mubr.msk.f32.vlgmr.msra.gmra.mrb[18].mxu0 %vm341_vm3, %v2615_v23 }
0x1907   :  { %7571 = vmatpush3.bf16.msra.mxu0 %v8295_v5  ;;  %7013 = vmatprep.mubr.msk.f32.mxu0 %vm8223_vm1, %v8222_v2 }
0x1908   :  { %7572 = vmatprep.subr.bf16.mxu0 %v8224_v6 }
0x190b   :  { %7574 = vmatpush3.bf16.msra.mxu0 %v8315_v10 }
0x190c   :  { %7587 = vmatprep.subr.bf16.mxu0 %v8224_v6 }
0x194d   :  { %v2715_v24 = vpop.permute.xlu0 %2714 }
0x194e   :  { %6992 = vmatmul.mubr.msk.f32.vlgmr.msra.gmra.mrb[32].mxu1 %vm341_vm3, %v2715_v24 }
0x194f   :  { %7565 = vmatpush3.bf16.msra.mxu1 %v8479_v52  ;;  %7002 = vmatprep.mubr.msk.f32.mxu1 %vm8223_vm1, %v8222_v2 }
0x1950   :  { %7566 = vmatprep.subr.bf16.mxu1 %v8224_v6 }
0x1953   :  { %7568 = vmatpush3.bf16.msra.mxu1 %v8491_v56 }
0x1954   :  { %7575 = vmatprep.subr.bf16.mxu1 %v8224_v6 }
0x1956   :  { %7003 = vmatmul.mubr.msk.f32.vlgmr.msra.gmra.mrb[34].mxu1 %vm341_vm3, %v2615_v23 }
0x1957   :  { %7577 = vmatpush3.bf16.msra.mxu1 %v8463_v47  ;;  %7024 = vmatprep.mubr.msk.f32.mxu1 %vm8223_vm1, %v8222_v2 }
0x1958   :  { %7578 = vmatprep.subr.bf16.mxu1 %v8224_v6 }
0x195b   :  { %7580 = vmatpush3.bf16.msra.mxu1 %v8469_v49 }
0x195c   :  { %7581 = vmatprep.subr.bf16.mxu1 %v8224_v6 }
0x19d9   :  { %v2684_v25 = vpop.f32.mrb[18].mxu0 }
0x19da   :  { %v7796_v26 = vadd.f32 %v8793_v45, %v2684_v25  ;;  %v6982_v27 = vpop.f32.mrb[19].mxu0 }
0x19dc   :  { %7994 = vtanh.f32 %v7796_v26  ;;  %v6224_v38 = vmul.f32 -1.442695, %v7796_v26 }
0x19e6   :  { %v7995_v28 = vpop.eup %7994 }
0x19e7   :  { %2698 = vrot.lane.b32.xlu1 %v7995_v28, %s8225_s16 }
0x1a21   :  { %v2784_v29 = vpop.f32.mrb[32].mxu1 }
0x1a22   :  { %v6993_v31 = vpop.f32.mrb[33].mxu1 }
0x1a29   :  { %v2854_v32 = vpop.f32.mrb[34].mxu1 }
0x1a2a   :  { %v2855_v33 = vadd.f32 %v2854_v32, %v2784_v29  ;;  %v7004_v34 = vpop.f32.mrb[35].mxu1 }
0x1a2c   :  { %v2858_v36 = vadd.f32 %v8839_v35, %v2855_v33 }
0x1a2e   :  { %7996 = vtanh.f32 %v2858_v36  ;;  %v6227_v44 = vmul.f32 -1.442695, %v2858_v36 }
0x1a2f   :  { %7998 = vpow2.f32 %v6224_v38 }
0x1a38   :  { %v7997_v37 = vpop.eup %7996 }
0x1a39   :  { %2868 = vrot.lane.b32.xlu0 %v7997_v37, %s8225_s16  ;;  %v7999_v39 = vpop.eup %7998 }
0x1a3a   :  { %v2692_v40 = vadd.f32 1.0, %v7999_v39 }
0x1a3c   :  { %8000 = vrcp.f32 %v2692_v40 }
0x1a3d   :  { %8002 = vpow2.f32 %v6227_v44 }
0x1a46   :  { %v8001_v41 = vpop.eup %8000 }
0x1a47   :  { %v8003_v46 = vpop.eup %8002  ;;  %v2696_v54 = vmul.f32 %v8001_v41, %v8802_v14 }
0x1a48   :  { %v2862_v48 = vadd.f32 1.0, %v8003_v46 }
0x1a4a   :  { %8004 = vrcp.f32 %v2862_v48 }
0x1a54   :  { %v8005_v50 = vpop.eup %8004 }
0x1a55   :  { %v2866_v59 = vmul.f32 %v8005_v50, %v8807_v18 }
0x1a59   :  { %v2699_v42 = vpop.permute.xlu1 %2698 }
0x1a5a   :  { %v2701_v43 = vmul.f32 %v8001_v41, %v2699_v42 }
0x1a5c   :  { %2703 = vrot.lane.b32.xlu1 %v2701_v43, %s8225_s16 }
0x1aab   :  { %v2869_v51 = vpop.permute.xlu0 %2868 }
0x1aac   :  { %v2871_v53 = vmul.f32 %v8005_v50, %v2869_v51 }
0x1aae   :  { %2873 = vrot.lane.b32.xlu0 %v2871_v53, %s8225_s16 }
0x1ace   :  { %v2704_v55 = vpop.permute.xlu1 %2703 }
0x1acf   :  { %v8846_v57 = vadd.f32 %v2704_v55, %v2696_v54 }
0x1ad1   :  { %8006 = vtanh.f32 %v8846_v57 }
0x1adb   :  { %v8007_v58 = vpop.eup %8006 }
0x1adc   :  { %2709 = vrot.lane.b32.xlu1 %v8007_v58, %s8225_s16 }
0x1b20   :  { %v2874_v60 = vpop.permute.xlu0 %2873 }
0x1b21   :  { %v8851_v61 = vadd.f32 %v2874_v60, %v2866_v59 }
0x1b23   :  { %8008 = vtanh.f32 %v8851_v61 }
0x1b2d   :  { %v8009_v62 = vpop.eup %8008 }
0x1b2e   :  { %2879 = vrot.lane.b32.xlu0 %v8009_v62, %s8225_s16 }
0x1b4e   :  { %v2710_v0 = vpop.permute.xlu1 %2709 }
0x1b4f   :  { %v2712_v1 = vmul.f32 %v8001_v41, %v2710_v0 }
0x1b51   :  { %2886 = vrot.lane.b32.xlu1 %v2712_v1, %s8226_s4 }
0x1ba0   :  { %v2880_v3 = vpop.permute.xlu0 %2879 }
0x1ba1   :  { %v2882_v4 = vmul.f32 %v8005_v50, %v2880_v3 }
0x1ba3   :  { %2986 = vrot.lane.b32.xlu0 %v2882_v4, %s8226_s4 }
0x1bc3   :  { %v2887_v7 = vpop.permute.xlu1 %2886 }
0x1bc4   :  { %7014 = vmatmul.mubr.msk.f32.vlgmr.msra.gmra.mrb[20].mxu0 %vm341_vm3, %v2887_v7 }
0x1bc5   :  { %7589 = vmatpush3.bf16.msra.mxu0 %v8295_v5  ;;  %7046 = vmatprep.mubr.msk.f32.mxu0 %vm8223_vm1, %v8222_v2 }
0x1bc6   :  { %7590 = vmatprep.subr.bf16.mxu0 %v8224_v6 }
0x1bc9   :  { %7592 = vmatpush3.bf16.msra.mxu0 %v8315_v10 }
0x1bca   :  { %7605 = vmatprep.subr.bf16.mxu0 %v8224_v6 }
0x1c15   :  { %v2987_v8 = vpop.permute.xlu0 %2986 }
0x1c16   :  { %7025 = vmatmul.mubr.msk.f32.vlgmr.msra.gmra.mrb[36].mxu1 %vm341_vm3, %v2987_v8 }
0x1c17   :  { %7583 = vmatpush3.bf16.msra.mxu1 %v8479_v52  ;;  %7035 = vmatprep.mubr.msk.f32.mxu1 %vm8223_vm1, %v8222_v2 }
0x1c18   :  { %7584 = vmatprep.subr.bf16.mxu1 %v8224_v6 }
0x1c1b   :  { %7586 = vmatpush3.bf16.msra.mxu1 %v8491_v56 }
0x1c1c   :  { %7593 = vmatprep.subr.bf16.mxu1 %v8224_v6 }
0x1c1e   :  { %7036 = vmatmul.mubr.msk.f32.vlgmr.msra.gmra.mrb[38].mxu1 %vm341_vm3, %v2887_v7 }
0x1c1f   :  { %7595 = vmatpush3.bf16.msra.mxu1 %v8463_v47  ;;  %7057 = vmatprep.mubr.msk.f32.mxu1 %vm8223_vm1, %v8222_v2 }
0x1c20   :  { %7596 = vmatprep.subr.bf16.mxu1 %v8224_v6 }
0x1c23   :  { %7598 = vmatpush3.bf16.msra.mxu1 %v8469_v49 }
0x1c24   :  { %7599 = vmatprep.subr.bf16.mxu1 %v8224_v6 }
0x1c97   :  { %v2956_v63 = vpop.f32.mrb[20].mxu0 }
0x1c98   :  { %v7797_v9 = vadd.f32 %v8793_v45, %v2956_v63  ;;  %v7015_v11 = vpop.f32.mrb[21].mxu0 }
0x1c9a   :  { %8010 = vtanh.f32 %v7797_v9  ;;  %v6229_v19 = vmul.f32 -1.442695, %v7797_v9 }
0x1ca4   :  { %v8011_v12 = vpop.eup %8010 }
0x1ca5   :  { %2970 = vrot.lane.b32.xlu1 %v8011_v12, %s8225_s16 }
0x1ce9   :  { %v3056_v13 = vpop.f32.mrb[36].mxu1 }
0x1cea   :  { %v7026_v14 = vpop.f32.mrb[37].mxu1 }
0x1cf1   :  { %v3126_v15 = vpop.f32.mrb[38].mxu1 }
0x1cf2   :  { %v3127_v16 = vadd.f32 %v3126_v15, %v3056_v13  ;;  %v7037_v17 = vpop.f32.mrb[39].mxu1 }
0x1cf4   :  { %v3130_v18 = vadd.f32 %v8839_v35, %v3127_v16 }
0x1cf6   :  { %8012 = vtanh.f32 %v3130_v18  ;;  %v6232_v25 = vmul.f32 -1.442695, %v3130_v18 }
0x1cf7   :  { %8014 = vpow2.f32 %v6229_v19 }
0x1d00   :  { %v8013_v30 = vpop.eup %8012 }
0x1d01   :  { %3140 = vrot.lane.b32.xlu0 %v8013_v30, %s8225_s16  ;;  %v8015_v20 = vpop.eup %8014 }
0x1d02   :  { %v2964_v21 = vadd.f32 1.0, %v8015_v20 }
0x1d04   :  { %8016 = vrcp.f32 %v2964_v21 }
0x1d05   :  { %8018 = vpow2.f32 %v6232_v25 }
0x1d0e   :  { %v8017_v22 = vpop.eup %8016 }
0x1d0f   :  { %v8019_v26 = vpop.eup %8018  ;;  %v2968_v32 = vmul.f32 %v8017_v22, %v8846_v57 }
0x1d10   :  { %v3134_v27 = vadd.f32 1.0, %v8019_v26 }
0x1d12   :  { %8020 = vrcp.f32 %v3134_v27 }
0x1d17   :  { %v2971_v23 = vpop.permute.xlu1 %2970 }
0x1d18   :  { %v2973_v24 = vmul.f32 %v8017_v22, %v2971_v23 }
0x1d1a   :  { %2975 = vrot.lane.b32.xlu1 %v2973_v24, %s8225_s16 }
0x1d1c   :  { %v8021_v28 = vpop.eup %8020 }
0x1d1d   :  { %v3138_v37 = vmul.f32 %v8021_v28, %v8851_v61 }
0x1d73   :  { %v3141_v29 = vpop.permute.xlu0 %3140 }
0x1d74   :  { %v3143_v31 = vmul.f32 %v8021_v28, %v3141_v29 }
0x1d76   :  { %3145 = vrot.lane.b32.xlu0 %v3143_v31, %s8225_s16 }
0x1d8c   :  { %v2976_v33 = vpop.permute.xlu1 %2975 }
0x1d8d   :  { %v8885_v34 = vadd.f32 %v2976_v33, %v2968_v32 }
0x1d8f   :  { %8022 = vtanh.f32 %v8885_v34 }
0x1d99   :  { %v8023_v36 = vpop.eup %8022 }
0x1d9a   :  { %2981 = vrot.lane.b32.xlu1 %v8023_v36, %s8225_s16 }
0x1de8   :  { %v3146_v38 = vpop.permute.xlu0 %3145 }
0x1de9   :  { %v8890_v39 = vadd.f32 %v3146_v38, %v3138_v37 }
0x1deb   :  { %8024 = vtanh.f32 %v8890_v39 }
0x1df5   :  { %v8025_v40 = vpop.eup %8024 }
0x1df6   :  { %3151 = vrot.lane.b32.xlu0 %v8025_v40, %s8225_s16 }
0x1e0c   :  { %v2982_v41 = vpop.permute.xlu1 %2981 }
0x1e0d   :  { %v2984_v42 = vmul.f32 %v8017_v22, %v2982_v41 }
0x1e0f   :  { %3158 = vrot.lane.b32.xlu1 %v2984_v42, %s8226_s4 }
0x1e68   :  { %v3152_v43 = vpop.permute.xlu0 %3151 }
0x1e69   :  { %v3154_v44 = vmul.f32 %v8021_v28, %v3152_v43 }
0x1e6b   :  { %3258 = vrot.lane.b32.xlu0 %v3154_v44, %s8226_s4 }
0x1e81   :  { %v3159_v46 = vpop.permute.xlu1 %3158 }
0x1e82   :  { %7047 = vmatmul.mubr.msk.f32.vlgmr.msra.gmra.mrb[22].mxu0 %vm341_vm3, %v3159_v46 }
0x1e83   :  { %7607 = vmatpush3.bf16.msra.mxu0 %v8295_v5  ;;  %7079 = vmatprep.mubr.msk.f32.mxu0 %vm8223_vm1, %v8222_v2 }
0x1e84   :  { %7608 = vmatprep.subr.bf16.mxu0 %v8224_v6 }
0x1e87   :  { %7610 = vmatpush3.bf16.msra.mxu0 %v8315_v10 }
0x1e88   :  { %7617 = vmatprep.subr.bf16.mxu0 %v8224_v6 }
0x1edd   :  { %v3259_v48 = vpop.permute.xlu0 %3258 }
0x1ede   :  { %7058 = vmatmul.mubr.msk.f32.vlgmr.msra.gmra.mrb[40].mxu1 %vm341_vm3, %v3259_v48 }
0x1edf   :  { %7601 = vmatpush3.bf16.msra.mxu1 %v8479_v52  ;;  %7068 = vmatprep.mubr.msk.f32.mxu1 %vm8223_vm1, %v8222_v2 }
0x1ee0   :  { %7602 = vmatprep.subr.bf16.mxu1 %v8224_v6 }
0x1ee3   :  { %7604 = vmatpush3.bf16.msra.mxu1 %v8491_v56 }
0x1ee4   :  { %7611 = vmatprep.subr.bf16.mxu1 %v8224_v6 }
0x1ee6   :  { %7069 = vmatmul.mubr.msk.f32.vlgmr.msra.gmra.mrb[42].mxu1 %vm341_vm3, %v3159_v46 }
0x1ee7   :  { %7613 = vmatpush3.bf16.msra.mxu1 %v8463_v47  ;;  %7090 = vmatprep.mubr.msk.f32.mxu1 %vm8223_vm1, %v8222_v2 }
0x1ee8   :  { %7614 = vmatprep.subr.bf16.mxu1 %v8224_v6 }
0x1eeb   :  { %7616 = vmatpush3.bf16.msra.mxu1 %v8469_v49 }
0x1eec   :  { %7629 = vmatprep.subr.bf16.mxu1 %v8224_v6 }
0x1f55   :  { %v3228_v50 = vpop.f32.mrb[22].mxu0 }
0x1f56   :  { %v7798_v51 = vadd.f32 %v8793_v45, %v3228_v50  ;;  %v7048_v53 = vpop.f32.mrb[23].mxu0 }
0x1f58   :  { %8026 = vtanh.f32 %v7798_v51  ;;  %v6234_v58 = vmul.f32 -1.442695, %v7798_v51 }
0x1f5a   :  { %8028 = vpow2.f32 %v6234_v58 }
0x1f62   :  { %v8027_v54 = vpop.eup %8026 }
0x1f63   :  { %3242 = vrot.lane.b32.xlu0 %v8027_v54, %s8225_s16 }
0x1f64   :  { %v8029_v0 = vpop.eup %8028 }
0x1f65   :  { %v3236_v1 = vadd.f32 1.0, %v8029_v0 }
0x1fb1   :  { %v3328_v55 = vpop.f32.mrb[40].mxu1 }
0x1fb2   :  { %v7059_v57 = vpop.f32.mrb[41].mxu1 }
0x1fb9   :  { %v3398_v59 = vpop.f32.mrb[42].mxu1 }
0x1fba   :  { %v3399_v60 = vadd.f32 %v3398_v59, %v3328_v55  ;;  %v7070_v61 = vpop.f32.mrb[43].mxu1 }
0x1fbc   :  { %v3402_v62 = vadd.f32 %v8839_v35, %v3399_v60 }
0x1fbe   :  { %8030 = vtanh.f32 %v3402_v62  ;;  %v6237_v63 = vmul.f32 -1.442695, %v3402_v62 }
0x1fbf   :  { %8032 = vrcp.f32 %v3236_v1 }
0x1fc0   :  { %8034 = vpow2.f32 %v6237_v63 }
0x1fc8   :  { %v8031_v3 = vpop.eup %8030 }
0x1fc9   :  { %3412 = vrot.lane.b32.xlu1 %v8031_v3, %s8225_s16  ;;  %v8033_v4 = vpop.eup %8032 }
0x1fca   :  { %v8035_v9 = vpop.eup %8034  ;;  %v3240_v15 = vmul.f32 %v8033_v4, %v8885_v34 }
0x1fcb   :  { %v3406_v11 = vadd.f32 1.0, %v8035_v9 }
0x1fcd   :  { %8036 = vrcp.f32 %v3406_v11 }
0x1fd5   :  { %v3243_v7 = vpop.permute.xlu0 %3242 }
0x1fd6   :  { %v3245_v8 = vmul.f32 %v8033_v4, %v3243_v7 }
0x1fd7   :  { %v8037_v12 = vpop.eup %8036 }
0x1fd8   :  { %3247 = vrot.lane.b32.xlu0 %v3245_v8, %s8225_s16  ;;  %v3410_v19 = vmul.f32 %v8037_v12, %v8890_v39 }
0x203b   :  { %v3413_v13 = vpop.permute.xlu1 %3412 }
0x203c   :  { %v3415_v14 = vmul.f32 %v8037_v12, %v3413_v13 }
0x203e   :  { %3417 = vrot.lane.b32.xlu1 %v3415_v14, %s8225_s16 }
0x204a   :  { %v3248_v16 = vpop.permute.xlu0 %3247 }
0x204b   :  { %v8924_v17 = vadd.f32 %v3248_v16, %v3240_v15 }
0x204d   :  { %8038 = vtanh.f32 %v8924_v17 }
0x2057   :  { %v8039_v18 = vpop.eup %8038 }
0x2058   :  { %3253 = vrot.lane.b32.xlu0 %v8039_v18, %s8225_s16 }
0x20b0   :  { %v3418_v30 = vpop.permute.xlu1 %3417 }
0x20b1   :  { %v8929_v20 = vadd.f32 %v3418_v30, %v3410_v19 }
0x20b3   :  { %8040 = vtanh.f32 %v8929_v20 }
0x20bd   :  { %v8041_v21 = vpop.eup %8040 }
0x20be   :  { %3423 = vrot.lane.b32.xlu1 %v8041_v21, %s8225_s16 }
0x20ca   :  { %v3254_v22 = vpop.permute.xlu0 %3253 }
0x20cb   :  { %v3256_v23 = vmul.f32 %v8033_v4, %v3254_v22 }
0x20cd   :  { %3430 = vrot.lane.b32.xlu0 %v3256_v23, %s8226_s4 }
0x2130   :  { %v3424_v24 = vpop.permute.xlu1 %3423 }
0x2131   :  { %v3426_v25 = vmul.f32 %v8037_v12, %v3424_v24 }
0x2133   :  { %3530 = vrot.lane.b32.xlu1 %v3426_v25, %s8226_s4 }
0x213f   :  { %v3431_v26 = vpop.permute.xlu0 %3430 }
0x2140   :  { %7080 = vmatmul.mubr.msk.f32.vlgmr.msra.gmra.mrb[24].mxu0 %vm341_vm3, %v3431_v26 }
0x2141   :  { %7619 = vmatpush3.bf16.msra.mxu0 %v8479_v52  ;;  %7101 = vmatprep.mubr.msk.f32.mxu0 %vm8223_vm1, %v8222_v2 }
0x2142   :  { %7620 = vmatprep.subr.bf16.mxu0 %v8224_v6 }
0x2145   :  { %7622 = vmatpush3.bf16.msra.mxu0 %v8491_v56 }
0x2146   :  { %7623 = vmatprep.subr.bf16.mxu0 %v8224_v6 }
0x2148   :  { %7102 = vmatmul.mubr.msk.f32.vlgmr.msra.gmra.mrb[42].mxu0 %vm341_vm3, %v3431_v26 }
0x2149   :  { %7625 = vmatpush3.bf16.msra.mxu0 %v8295_v5  ;;  %7112 = vmatprep.mubr.msk.f32.mxu0 %vm8223_vm1, %v8222_v2 }
0x214a   :  { %7626 = vmatprep.subr.bf16.mxu0 %v8224_v6 }
0x214d   :  { %7628 = vmatpush3.bf16.msra.mxu0 %v8315_v10 }
0x214e   :  { %7641 = vmatprep.subr.bf16.mxu0 %v8224_v6 }
0x21a5   :  { %v3531_v27 = vpop.permute.xlu1 %3530 }
0x21a6   :  { %7091 = vmatmul.mubr.msk.f32.vlgmr.msra.gmra.mrb[44].mxu1 %vm341_vm3, %v3531_v27 }
0x21a7   :  { %7631 = vmatpush3.bf16.msra.mxu1 %v8463_v47  ;;  %7123 = vmatprep.mubr.msk.f32.mxu1 %vm8223_vm1, %v8222_v2 }
0x21a8   :  { %7632 = vmatprep.subr.bf16.mxu1 %v8224_v6 }
0x21ab   :  { %7634 = vmatpush3.bf16.msra.mxu1 %v8469_v49 }
0x21ac   :  { %7635 = vmatprep.subr.bf16.mxu1 %v8224_v6 }
0x2213   :  { %v3500_v28 = vpop.f32.mrb[24].mxu0 }
0x2214   :  { %v7799_v29 = vadd.f32 %v8793_v45, %v3500_v28  ;;  %v7081_v31 = vpop.f32.mrb[25].mxu0 }
0x2216   :  { %8042 = vtanh.f32 %v7799_v29  ;;  %v6239_v36 = vmul.f32 -1.442695, %v7799_v29 }
0x2218   :  { %8044 = vpow2.f32 %v6239_v36 }
0x221b   :  { %v3670_v32 = vpop.f32.mrb[42].mxu0 }
0x221c   :  { %v7103_v33 = vpop.f32.mrb[43].mxu0 }
0x2220   :  { %v8043_v34 = vpop.eup %8042 }
0x2221   :  { %3514 = vrot.lane.b32.xlu1 %v8043_v34, %s8225_s16 }
0x2222   :  { %v8045_v41 = vpop.eup %8044 }
0x2223   :  { %v3508_v42 = vadd.f32 1.0, %v8045_v41 }
0x2279   :  { %v3600_v37 = vpop.f32.mrb[44].mxu1 }
0x227a   :  { %v3671_v38 = vadd.f32 %v3670_v32, %v3600_v37  ;;  %v7092_v39 = vpop.f32.mrb[45].mxu1 }
0x227c   :  { %v3674_v40 = vadd.f32 %v8839_v35, %v3671_v38 }
0x227e   :  { %8046 = vtanh.f32 %v3674_v40  ;;  %v6242_v50 = vmul.f32 -1.442695, %v3674_v40 }
0x227f   :  { %8048 = vrcp.f32 %v3508_v42 }
0x2280   :  { %8050 = vpow2.f32 %v6242_v50 }
0x2288   :  { %v8047_v43 = vpop.eup %8046 }
0x2289   :  { %3684 = vrot.lane.b32.xlu0 %v8047_v43, %s8225_s16  ;;  %v8049_v44 = vpop.eup %8048 }
0x228a   :  { %v8051_v51 = vpop.eup %8050  ;;  %v3512_v58 = vmul.f32 %v8049_v44, %v8924_v17 }
0x228b   :  { %v3678_v53 = vadd.f32 1.0, %v8051_v51 }
0x228d   :  { %8052 = vrcp.f32 %v3678_v53 }
0x2293   :  { %v3515_v46 = vpop.permute.xlu1 %3514 }
0x2294   :  { %v3517_v48 = vmul.f32 %v8049_v44, %v3515_v46 }
0x2296   :  { %3519 = vrot.lane.b32.xlu1 %v3517_v48, %s8225_s16 }
0x2297   :  { %v8053_v54 = vpop.eup %8052 }
0x2298   :  { %v3682_v62 = vmul.f32 %v8053_v54, %v8929_v20 }
0x22fb   :  { %v3685_v55 = vpop.permute.xlu0 %3684 }
0x22fc   :  { %v3687_v57 = vmul.f32 %v8053_v54, %v3685_v55 }
0x22fe   :  { %3689 = vrot.lane.b32.xlu0 %v3687_v57, %s8225_s16 }
0x2308   :  { %v3520_v59 = vpop.permute.xlu1 %3519 }
0x2309   :  { %v8963_v60 = vadd.f32 %v3520_v59, %v3512_v58 }
0x230b   :  { %8054 = vtanh.f32 %v8963_v60 }
0x2315   :  { %v8055_v61 = vpop.eup %8054 }
0x2316   :  { %3525 = vrot.lane.b32.xlu1 %v8055_v61, %s8225_s16 }
0x2370   :  { %v3690_v0 = vpop.permute.xlu0 %3689 }
0x2371   :  { %v8968_v1 = vadd.f32 %v3690_v0, %v3682_v62 }
0x2373   :  { %8056 = vtanh.f32 %v8968_v1 }
0x237d   :  { %v8057_v3 = vpop.eup %8056 }
0x237e   :  { %3695 = vrot.lane.b32.xlu0 %v8057_v3, %s8225_s16 }
0x2388   :  { %v3526_v4 = vpop.permute.xlu1 %3525 }
0x2389   :  { %v3528_v7 = vmul.f32 %v8049_v44, %v3526_v4 }
0x238b   :  { %3702 = vrot.lane.b32.xlu1 %v3528_v7, %s8226_s4 }
0x23f0   :  { %v3696_v8 = vpop.permute.xlu0 %3695 }
0x23f1   :  { %v3698_v63 = vmul.f32 %v8053_v54, %v3696_v8 }
0x23f3   :  { %3802 = vrot.lane.b32.xlu0 %v3698_v63, %s8226_s4 }
0x23fd   :  { %v3703_v9 = vpop.permute.xlu1 %3702 }
0x23fe   :  { %7113 = vmatmul.mubr.msk.f32.vlgmr.msra.gmra.mrb[26].mxu0 %vm341_vm3, %v3703_v9 }
0x23ff   :  { %7643 = vmatpush3.bf16.msra.mxu0 %v8295_v5  ;;  %7145 = vmatprep.mubr.msk.f32.mxu0 %vm8223_vm1, %v8222_v2 }
0x2400   :  { %7644 = vmatprep.subr.bf16.mxu0 %v8224_v6 }
0x2403   :  { %7646 = vmatpush3.bf16.msra.mxu0 %v8315_v10 }
0x2404   :  { %7653 = vmatprep.subr.bf16.mxu0 %v8224_v6 }
0x2465   :  { %v3803_v11 = vpop.permute.xlu0 %3802 }
0x2466   :  { %7124 = vmatmul.mubr.msk.f32.vlgmr.msra.gmra.mrb[46].mxu1 %vm341_vm3, %v3803_v11 }
0x2467   :  { %7637 = vmatpush3.bf16.msra.mxu1 %v8479_v52  ;;  %7134 = vmatprep.mubr.msk.f32.mxu1 %vm8223_vm1, %v8222_v2 }
0x2468   :  { %7638 = vmatprep.subr.bf16.mxu1 %v8224_v6 }
0x246b   :  { %7640 = vmatpush3.bf16.msra.mxu1 %v8491_v56 }
0x246c   :  { %7647 = vmatprep.subr.bf16.mxu1 %v8224_v6 }
0x246e   :  { %7135 = vmatmul.mubr.msk.f32.vlgmr.msra.gmra.mrb[48].mxu1 %vm341_vm3, %v3703_v9 }
0x246f   :  { %7649 = vmatpush3.bf16.msra.mxu1 %v8463_v47  ;;  %7156 = vmatprep.mubr.msk.f32.mxu1 %vm8223_vm1, %v8222_v2 }
0x2470   :  { %7650 = vmatprep.subr.bf16.mxu1 %v8224_v6 }
0x2473   :  { %7652 = vmatpush3.bf16.msra.mxu1 %v8469_v49 }
0x2474   :  { %7665 = vmatprep.subr.bf16.mxu1 %v8224_v6 }
0x24d1   :  { %v3772_v12 = vpop.f32.mrb[26].mxu0 }
0x24d2   :  { %v7800_v13 = vadd.f32 %v8793_v45, %v3772_v12  ;;  %v7114_v14 = vpop.f32.mrb[27].mxu0 }
0x24d4   :  { %8058 = vtanh.f32 %v7800_v13  ;;  %v6244_v16 = vmul.f32 -1.442695, %v7800_v13 }
0x24d6   :  { %8060 = vpow2.f32 %v6244_v16 }
0x24de   :  { %v8059_v15 = vpop.eup %8058 }
0x24df   :  { %3786 = vrot.lane.b32.xlu0 %v8059_v15, %s8225_s16 }
0x24e0   :  { %v8061_v19 = vpop.eup %8060 }
0x24e1   :  { %v3780_v30 = vadd.f32 1.0, %v8061_v19 }
0x24e3   :  { %8062 = vrcp.f32 %v3780_v30 }
0x24ed   :  { %v8063_v24 = vpop.eup %8062 }
0x24ee   :  { %v3784_v36 = vmul.f32 %v8063_v24, %v8963_v60 }
0x2539   :  { %v3872_v17 = vpop.f32.mrb[46].mxu1 }
0x253a   :  { %v7125_v18 = vpop.f32.mrb[47].mxu1 }
0x2541   :  { %v3942_v20 = vpop.f32.mrb[48].mxu1 }
0x2542   :  { %v3943_v21 = vadd.f32 %v3942_v20, %v3872_v17  ;;  %v7136_v22 = vpop.f32.mrb[49].mxu1 }
0x2544   :  { %v3946_v23 = vadd.f32 %v8839_v35, %v3943_v21 }
0x2546   :  { %8064 = vtanh.f32 %v3946_v23  ;;  %v6247_v28 = vmul.f32 -1.442695, %v3946_v23 }
0x2548   :  { %8066 = vpow2.f32 %v6247_v28 }
0x2550   :  { %v8065_v25 = vpop.eup %8064 }
0x2551   :  { %v3787_v26 = vpop.permute.xlu0 %3786  ;;  %3956 = vrot.lane.b32.xlu1 %v8065_v25, %s8225_s16 }
0x2552   :  { %v3789_v27 = vmul.f32 %v8063_v24, %v3787_v26  ;;  %v8067_v29 = vpop.eup %8066 }
0x2553   :  { %v3950_v31 = vadd.f32 1.0, %v8067_v29 }
0x2554   :  { %3791 = vrot.lane.b32.xlu0 %v3789_v27, %s8225_s16 }
0x2555   :  { %8068 = vrcp.f32 %v3950_v31 }
0x255f   :  { %v8069_v32 = vpop.eup %8068 }
0x2560   :  { %v3954_v40 = vmul.f32 %v8069_v32, %v8968_v1 }
0x25c3   :  { %v3957_v33 = vpop.permute.xlu1 %3956 }
0x25c4   :  { %v3959_v34 = vmul.f32 %v8069_v32, %v3957_v33 }
0x25c6   :  { %v3792_v37 = vpop.permute.xlu0 %3791  ;;  %3961 = vrot.lane.b32.xlu1 %v3959_v34, %s8225_s16 }
0x25c7   :  { %v9002_v38 = vadd.f32 %v3792_v37, %v3784_v36 }
0x25c9   :  { %8070 = vtanh.f32 %v9002_v38 }
0x25d3   :  { %v8071_v39 = vpop.eup %8070 }
0x25d4   :  { %3797 = vrot.lane.b32.xlu0 %v8071_v39, %s8225_s16 }
0x2638   :  { %v3962_v41 = vpop.permute.xlu1 %3961 }
0x2639   :  { %v9007_v42 = vadd.f32 %v3962_v41, %v3954_v40 }
0x263b   :  { %8072 = vtanh.f32 %v9007_v42 }
0x2645   :  { %v8073_v43 = vpop.eup %8072 }
0x2646   :  { %v3798_v44 = vpop.permute.xlu0 %3797  ;;  %3967 = vrot.lane.b32.xlu1 %v8073_v43, %s8225_s16 }
0x2647   :  { %v3800_v46 = vmul.f32 %v8063_v24, %v3798_v44 }
0x2649   :  { %3974 = vrot.lane.b32.xlu0 %v3800_v46, %s8226_s4 }
0x26b8   :  { %v3968_v48 = vpop.permute.xlu1 %3967 }
0x26b9   :  { %v3970_v50 = vmul.f32 %v8069_v32, %v3968_v48 }
0x26bb   :  { %v3975_v51 = vpop.permute.xlu0 %3974  ;;  %4074 = vrot.lane.b32.xlu1 %v3970_v50, %s8226_s4 }
0x26bc   :  { %7146 = vmatmul.mubr.msk.f32.vlgmr.msra.gmra.mrb[28].mxu0 %vm341_vm3, %v3975_v51 }
0x26bd   :  { %7655 = vmatpush3.bf16.msra.mxu0 %v8479_v52  ;;  %7167 = vmatprep.mubr.msk.f32.mxu0 %vm8223_vm1, %v8222_v2 }
0x26be   :  { %7656 = vmatprep.subr.bf16.mxu0 %v8224_v6 }
0x26c1   :  { %7658 = vmatpush3.bf16.msra.mxu0 %v8491_v56 }
0x26c2   :  { %7659 = vmatprep.subr.bf16.mxu0 %v8224_v6 }
0x26c4   :  { %7168 = vmatmul.mubr.msk.f32.vlgmr.msra.gmra.mrb[44].mxu0 %vm341_vm3, %v3975_v51 }
0x26c5   :  { %7661 = vmatpush3.bf16.msra.mxu0 %v8295_v5  ;;  %7178 = vmatprep.mubr.msk.f32.mxu0 %vm8223_vm1, %v8222_v2 }
0x26c6   :  { %7662 = vmatprep.subr.bf16.mxu0 %v8224_v6 }
0x26c9   :  { %7664 = vmatpush3.bf16.msra.mxu0 %v8315_v10 }
0x26ca   :  { %7677 = vmatprep.subr.bf16.mxu0 %v8224_v6 }
0x272d   :  { %v4075_v53 = vpop.permute.xlu1 %4074 }
0x272e   :  { %7157 = vmatmul.mubr.msk.f32.vlgmr.msra.gmra.mrb[50].mxu1 %vm341_vm3, %v4075_v53 }
0x272f   :  { %7667 = vmatpush3.bf16.msra.mxu1 %v8463_v47  ;;  %7189 = vmatprep.mubr.msk.f32.mxu1 %vm8223_vm1, %v8222_v2 }
0x2730   :  { %7668 = vmatprep.subr.bf16.mxu1 %v8224_v6 }
0x2733   :  { %7670 = vmatpush3.bf16.msra.mxu1 %v8469_v49 }
0x2734   :  { %7671 = vmatprep.subr.bf16.mxu1 %v8224_v6 }
0x278f   :  { %v4044_v54 = vpop.f32.mrb[28].mxu0 }
0x2790   :  { %v7801_v55 = vadd.f32 %v8793_v45, %v4044_v54  ;;  %v7147_v57 = vpop.f32.mrb[29].mxu0 }
0x2792   :  { %8074 = vtanh.f32 %v7801_v55  ;;  %v6249_v61 = vmul.f32 -1.442695, %v7801_v55 }
0x2794   :  { %8076 = vpow2.f32 %v6249_v61 }
0x2797   :  { %v4214_v58 = vpop.f32.mrb[44].mxu0 }
0x2798   :  { %v7169_v59 = vpop.f32.mrb[45].mxu0 }
0x279c   :  { %v8075_v60 = vpop.eup %8074 }
0x279d   :  { %4058 = vrot.lane.b32.xlu1 %v8075_v60, %s8225_s16 }
0x279e   :  { %v8077_v62 = vpop.eup %8076 }
0x279f   :  { %v4052_v0 = vadd.f32 1.0, %v8077_v62 }
0x27a1   :  { %8078 = vrcp.f32 %v4052_v0 }
0x27ab   :  { %v8079_v8 = vpop.eup %8078 }
0x27ac   :  { %v4056_v15 = vmul.f32 %v8079_v8, %v9002_v38 }
0x2801   :  { %v4144_v1 = vpop.f32.mrb[50].mxu1 }
0x2802   :  { %v4215_v3 = vadd.f32 %v4214_v58, %v4144_v1  ;;  %v7158_v4 = vpop.f32.mrb[51].mxu1 }
0x2804   :  { %v4218_v7 = vadd.f32 %v8839_v35, %v4215_v3 }
0x2806   :  { %8080 = vtanh.f32 %v4218_v7  ;;  %v6252_v12 = vmul.f32 -1.442695, %v4218_v7 }
0x2808   :  { %8082 = vpow2.f32 %v6252_v12 }
0x280f   :  { %v4059_v63 = vpop.permute.xlu1 %4058 }
0x2810   :  { %v4061_v9 = vmul.f32 %v8079_v8, %v4059_v63  ;;  %v8081_v11 = vpop.eup %8080 }
0x2811   :  { %4228 = vrot.lane.b32.xlu0 %v8081_v11, %s8225_s16 }
0x2812   :  { %4063 = vrot.lane.b32.xlu1 %v4061_v9, %s8225_s16  ;;  %v8083_v13 = vpop.eup %8082 }
0x2813   :  { %v4222_v14 = vadd.f32 1.0, %v8083_v13 }
0x2815   :  { %8084 = vrcp.f32 %v4222_v14 }
0x281f   :  { %v8085_v16 = vpop.eup %8084 }
0x2820   :  { %v4226_v21 = vmul.f32 %v8085_v16, %v9007_v42 }
0x2883   :  { %v4229_v17 = vpop.permute.xlu0 %4228 }
0x2884   :  { %v4064_v18 = vpop.permute.xlu1 %4063  ;;  %v4231_v19 = vmul.f32 %v8085_v16, %v4229_v17 }
0x2885   :  { %v9040_v30 = vadd.f32 %v4064_v18, %v4056_v15  ;;  %v9115_v15 = vld [vmem:[%s9327_s3] ss:$0 sm:$0xff] }
0x2886   :  { %4233 = vrot.lane.b32.xlu0 %v4231_v19, %s8225_s16 }
0x2887   :  { %8086 = vtanh.f32 %v9040_v30 }
0x2891   :  { %v8087_v20 = vpop.eup %8086 }
0x2892   :  { %4069 = vrot.lane.b32.xlu1 %v8087_v20, %s8225_s16 }
0x28f8   :  { %v4234_v22 = vpop.permute.xlu0 %4233 }
0x28f9   :  { %v9046_v23 = vadd.f32 %v4234_v22, %v4226_v21 }
0x28fb   :  { %8088 = vtanh.f32 %v9046_v23 }
0x2904   :  { %v4070_v24 = vpop.permute.xlu1 %4069 }
0x2905   :  { %v4072_v25 = vmul.f32 %v8079_v8, %v4070_v24  ;;  %v8089_v26 = vpop.eup %8088 }
0x2906   :  { %4239 = vrot.lane.b32.xlu0 %v8089_v26, %s8225_s16 }
0x2907   :  { %4246 = vrot.lane.b32.xlu1 %v4072_v25, %s8226_s4 }
0x2978   :  { %v4240_v27 = vpop.permute.xlu0 %4239 }
0x2979   :  { %v4247_v28 = vpop.permute.xlu1 %4246  ;;  %v4242_v29 = vmul.f32 %v8085_v16, %v4240_v27 }
0x297a   :  { %7179 = vmatmul.mubr.msk.f32.vlgmr.msra.gmra.mrb[30].mxu0 %vm341_vm3, %v4247_v28 }
0x297b   :  { %7679 = vmatpush3.bf16.msra.mxu0 %v8295_v5  ;;  %7211 = vmatprep.mubr.msk.f32.mxu0 %vm8223_vm1, %v8222_v2 }
0x297c   :  { %4346 = vrot.lane.b32.xlu0 %v4242_v29, %s8226_s4  ;;  %7680 = vmatprep.subr.bf16.mxu0 %v8224_v6 }
0x297f   :  { %7682 = vmatpush3.bf16.msra.mxu0 %v8315_v10 }
0x2980   :  { %7689 = vmatprep.subr.bf16.mxu0 %v8224_v6 }
0x29ee   :  { %v4347_v31 = vpop.permute.xlu0 %4346 }
0x29ef   :  { %7190 = vmatmul.mubr.msk.f32.vlgmr.msra.gmra.mrb[52].mxu1 %vm341_vm3, %v4347_v31 }
0x29f0   :  { %7673 = vmatpush3.bf16.msra.mxu1 %v8479_v52  ;;  %7200 = vmatprep.mubr.msk.f32.mxu1 %vm8223_vm1, %v8222_v2 }
0x29f1   :  { %7674 = vmatprep.subr.bf16.mxu1 %v8224_v6 }
0x29f4   :  { %7676 = vmatpush3.bf16.msra.mxu1 %v8491_v56 }
0x29f5   :  { %7683 = vmatprep.subr.bf16.mxu1 %v8224_v6 }
0x29f7   :  { %7201 = vmatmul.mubr.msk.f32.vlgmr.msra.gmra.mrb[54].mxu1 %vm341_vm3, %v4247_v28 }
0x29f8   :  { %7685 = vmatpush3.bf16.msra.mxu1 %v8463_v47  ;;  %7222 = vmatprep.mubr.msk.f32.mxu1 %vm8223_vm1, %v8222_v2 }
0x29f9   :  { %7686 = vmatprep.subr.bf16.mxu1 %v8224_v6 }
0x29fc   :  { %7688 = vmatpush3.bf16.msra.mxu1 %v8469_v49 }
0x29fd   :  { %7701 = vmatprep.subr.bf16.mxu1 %v8224_v6 }
0x2a4d   :  { %v4316_v32 = vpop.f32.mrb[30].mxu0 }
0x2a4e   :  { %v7802_v33 = vadd.f32 %v8793_v45, %v4316_v32  ;;  %v7180_v34 = vpop.f32.mrb[31].mxu0 }
0x2a50   :  { %8090 = vtanh.f32 %v7802_v33  ;;  %v6254_v37 = vmul.f32 -1.442695, %v7802_v33 }
0x2a52   :  { %8092 = vpow2.f32 %v6254_v37 }
0x2a5a   :  { %v8091_v36 = vpop.eup %8090 }
0x2a5b   :  { %4330 = vrot.lane.b32.xlu0 %v8091_v36, %s8225_s16 }
0x2a5c   :  { %v8093_v38 = vpop.eup %8092 }
0x2a5d   :  { %v4324_v39 = vadd.f32 1.0, %v8093_v38 }
0x2a5f   :  { %8094 = vrcp.f32 %v4324_v39 }
0x2a69   :  { %v8095_v46 = vpop.eup %8094 }
0x2a6a   :  { %v4328_v57 = vmul.f32 %v8095_v46, %v9040_v30 }
0x2ac2   :  { %v4416_v40 = vpop.f32.mrb[52].mxu1 }
0x2ac3   :  { %v7191_v41 = vpop.f32.mrb[53].mxu1 }
0x2aca   :  { %v4486_v42 = vpop.f32.mrb[54].mxu1 }
0x2acb   :  { %v4487_v43 = vadd.f32 %v4486_v42, %v4416_v40  ;;  %v7202_v44 = vpop.f32.mrb[55].mxu1 }
0x2acd   :  { %v4490_v48 = vadd.f32 %v8839_v35, %v4487_v43  ;;  %v4331_v50 = vpop.permute.xlu0 %4330 }
0x2ace   :  { %v4333_v45 = vmul.f32 %v8095_v46, %v4331_v50 }
0x2acf   :  { %8096 = vtanh.f32 %v4490_v48  ;;  %v6257_v53 = vmul.f32 -1.442695, %v4490_v48 }
0x2ad0   :  { %4335 = vrot.lane.b32.xlu0 %v4333_v45, %s8225_s16 }
0x2ad1   :  { %8098 = vpow2.f32 %v6257_v53 }
0x2ad9   :  { %v8097_v51 = vpop.eup %8096 }
0x2ada   :  { %4500 = vrot.lane.b32.xlu1 %v8097_v51, %s8225_s16 }
0x2adb   :  { %v8099_v54 = vpop.eup %8098 }
0x2adc   :  { %v4494_v55 = vadd.f32 1.0, %v8099_v54 }
0x2ade   :  { %8100 = vrcp.f32 %v4494_v55 }
0x2ae8   :  { %v8101_v60 = vpop.eup %8100 }
0x2ae9   :  { %v4498_v1 = vmul.f32 %v8101_v60, %v9046_v23 }
0x2b42   :  { %v4336_v58 = vpop.permute.xlu0 %4335 }
0x2b43   :  { %v9079_v59 = vadd.f32 %v4336_v58, %v4328_v57 }
0x2b45   :  { %8102 = vtanh.f32 %v9079_v59 }
0x2b4c   :  { %v4501_v61 = vpop.permute.xlu1 %4500 }
0x2b4d   :  { %v4503_v62 = vmul.f32 %v8101_v60, %v4501_v61 }
0x2b4f   :  { %v8103_v0 = vpop.eup %8102  ;;  %4505 = vrot.lane.b32.xlu1 %v4503_v62, %s8225_s16 }
0x2b50   :  { %4341 = vrot.lane.b32.xlu0 %v8103_v0, %s8225_s16 }
0x2bc1   :  { %v4506_v3 = vpop.permute.xlu1 %4505 }
0x2bc2   :  { %v9085_v4 = vadd.f32 %v4506_v3, %v4498_v1  ;;  %v4342_v7 = vpop.permute.xlu0 %4341 }
0x2bc3   :  { %v4344_v8 = vmul.f32 %v8095_v46, %v4342_v7 }
0x2bc4   :  { %8104 = vtanh.f32 %v9085_v4 }
0x2bc5   :  { %4518 = vrot.lane.b32.xlu0 %v4344_v8, %s8226_s4 }
0x2bce   :  { %v8105_v63 = vpop.eup %8104 }
0x2bcf   :  { %4511 = vrot.lane.b32.xlu1 %v8105_v63, %s8225_s16 }
0x2c37   :  { %v4519_v9 = vpop.permute.xlu0 %4518 }
0x2c38   :  { %7212 = vmatmul.mubr.msk.f32.vlgmr.msra.gmra.mrb[32].mxu0 %vm341_vm3, %v4519_v9 }
0x2c39   :  { %7691 = vmatpush3.bf16.msra.mxu0 %v8479_v52  ;;  %7233 = vmatprep.mubr.msk.f32.mxu0 %vm8223_vm1, %v8222_v2 }
0x2c3a   :  { %7692 = vmatprep.subr.bf16.mxu0 %v8224_v6 }
0x2c3d   :  { %7694 = vmatpush3.bf16.msra.mxu0 %v8491_v56 }
0x2c3e   :  { %7695 = vmatprep.subr.bf16.mxu0 %v8224_v6 }
0x2c40   :  { %7234 = vmatmul.mubr.msk.f32.vlgmr.msra.gmra.mrb[46].mxu0 %vm341_vm3, %v4519_v9 }
0x2c41   :  { %v4512_v11 = vpop.permute.xlu1 %4511  ;;  %7697 = vmatpush3.bf16.msra.mxu0 %v8295_v5  ;;  %7244 = vmatprep.mubr.msk.f32.mxu0 %vm8223_vm1, %v8222_v2 }
0x2c42   :  { %v4514_v12 = vmul.f32 %v8101_v60, %v4512_v11  ;;  %7698 = vmatprep.subr.bf16.mxu0 %v8224_v6  ;;  %v9162_v11 = vld [vmem:[%s9330_s6] ss:$0 sm:$0xff] }
0x2c44   :  { %4618 = vrot.lane.b32.xlu1 %v4514_v12, %s8226_s4 }
0x2c45   :  { %7700 = vmatpush3.bf16.msra.mxu0 %v8315_v10 }
0x2c46   :  { %7713 = vmatprep.subr.bf16.mxu0 %v8224_v6 }
0x2cb6   :  { %v4619_v13 = vpop.permute.xlu1 %4618 }
0x2cb7   :  { %7223 = vmatmul.mubr.msk.f32.vlgmr.msra.gmra.mrb[56].mxu1 %vm341_vm3, %v4619_v13 }
0x2cb8   :  { %7703 = vmatpush3.bf16.msra.mxu1 %v8463_v47  ;;  %7255 = vmatprep.mubr.msk.f32.mxu1 %vm8223_vm1, %v8222_v2 }
0x2cb9   :  { %7704 = vmatprep.subr.bf16.mxu1 %v8224_v6 }
0x2cbc   :  { %7706 = vmatpush3.bf16.msra.mxu1 %v8469_v49 }
0x2cbd   :  { %7707 = vmatprep.subr.bf16.mxu1 %v8224_v6 }
0x2d0b   :  { %v4588_v14 = vpop.f32.mrb[32].mxu0 }
0x2d0c   :  { %v7803_v16 = vadd.f32 %v9115_v15, %v4588_v14  ;;  %v7213_v17 = vpop.f32.mrb[33].mxu0 }
0x2d0e   :  { %8106 = vtanh.f32 %v7803_v16  ;;  %v6259_v20 = vmul.f32 -1.442695, %v7803_v16 }
0x2d10   :  { %8108 = vpow2.f32 %v6259_v20 }
0x2d13   :  { %v4758_v18 = vpop.f32.mrb[46].mxu0 }
0x2d14   :  { %v7235_v19 = vpop.f32.mrb[47].mxu0 }
0x2d18   :  { %v8107_v30 = vpop.eup %8106 }
0x2d19   :  { %4602 = vrot.lane.b32.xlu1 %v8107_v30, %s8225_s16 }
0x2d1a   :  { %v8109_v21 = vpop.eup %8108 }
0x2d1b   :  { %v4596_v22 = vadd.f32 1.0, %v8109_v21 }
0x2d1d   :  { %8110 = vrcp.f32 %v4596_v22 }
0x2d27   :  { %v8111_v24 = vpop.eup %8110 }
0x2d28   :  { %v4600_v36 = vmul.f32 %v8111_v24, %v9079_v59 }
0x2d8a   :  { %v4688_v23 = vpop.f32.mrb[56].mxu1 }
0x2d8b   :  { %v4759_v25 = vadd.f32 %v4758_v18, %v4688_v23  ;;  %v7224_v26 = vpop.f32.mrb[57].mxu1  ;;  %v4603_v27 = vpop.permute.xlu1 %4602 }
0x2d8c   :  { %v4605_v28 = vmul.f32 %v8111_v24, %v4603_v27 }
0x2d8d   :  { %v4762_v29 = vadd.f32 %v8839_v35, %v4759_v25 }
0x2d8e   :  { %4607 = vrot.lane.b32.xlu1 %v4605_v28, %s8225_s16 }
0x2d8f   :  { %8112 = vtanh.f32 %v4762_v29  ;;  %v6262_v32 = vmul.f32 -1.442695, %v4762_v29 }
0x2d91   :  { %8114 = vpow2.f32 %v6262_v32 }
0x2d99   :  { %v8113_v31 = vpop.eup %8112 }
0x2d9a   :  { %4772 = vrot.lane.b32.xlu0 %v8113_v31, %s8225_s16 }
0x2d9b   :  { %v8115_v33 = vpop.eup %8114 }
0x2d9c   :  { %v4766_v34 = vadd.f32 1.0, %v8115_v33 }
0x2d9e   :  { %8116 = vrcp.f32 %v4766_v34 }
0x2da8   :  { %v8117_v39 = vpop.eup %8116 }
0x2da9   :  { %v4770_v42 = vmul.f32 %v8117_v39, %v9085_v4 }
0x2e00   :  { %v4608_v37 = vpop.permute.xlu1 %4607 }
0x2e01   :  { %v9123_v38 = vadd.f32 %v4608_v37, %v4600_v36 }
0x2e03   :  { %8118 = vtanh.f32 %v9123_v38 }
0x2e0c   :  { %v4773_v35 = vpop.permute.xlu0 %4772 }
0x2e0d   :  { %v8119_v40 = vpop.eup %8118  ;;  %v4775_v41 = vmul.f32 %v8117_v39, %v4773_v35 }
0x2e0e   :  { %4613 = vrot.lane.b32.xlu1 %v8119_v40, %s8225_s16 }
0x2e0f   :  { %4777 = vrot.lane.b32.xlu0 %v4775_v41, %s8225_s16 }
0x2e80   :  { %v4614_v43 = vpop.permute.xlu1 %4613 }
0x2e81   :  { %v4778_v44 = vpop.permute.xlu0 %4777  ;;  %v4616_v46 = vmul.f32 %v8111_v24, %v4614_v43 }
0x2e82   :  { %v9129_v48 = vadd.f32 %v4778_v44, %v4770_v42 }
0x2e83   :  { %4790 = vrot.lane.b32.xlu1 %v4616_v46, %s8226_s4 }
0x2e84   :  { %8120 = vtanh.f32 %v9129_v48 }
0x2e8e   :  { %v8121_v50 = vpop.eup %8120 }
0x2e8f   :  { %4783 = vrot.lane.b32.xlu0 %v8121_v50, %s8225_s16 }
0x2ef5   :  { %v4791_v45 = vpop.permute.xlu1 %4790 }
0x2ef6   :  { %7245 = vmatmul.mubr.msk.f32.vlgmr.msra.gmra.mrb[34].mxu0 %vm341_vm3, %v4791_v45 }
0x2ef7   :  { %7715 = vmatpush3.bf16.msra.mxu0 %v8295_v5  ;;  %7277 = vmatprep.mubr.msk.f32.mxu0 %vm8223_vm1, %v8222_v2 }
0x2ef8   :  { %7716 = vmatprep.subr.bf16.mxu0 %v8224_v6 }
0x2efb   :  { %7718 = vmatpush3.bf16.msra.mxu0 %v8315_v10 }
0x2efc   :  { %7725 = vmatprep.subr.bf16.mxu0 %v8224_v6 }
0x2f01   :  { %v4784_v51 = vpop.permute.xlu0 %4783 }
0x2f02   :  { %v4786_v53 = vmul.f32 %v8117_v39, %v4784_v51 }
0x2f04   :  { %4890 = vrot.lane.b32.xlu0 %v4786_v53, %s8226_s4 }
0x2f76   :  { %v4891_v54 = vpop.permute.xlu0 %4890 }
0x2f77   :  { %7256 = vmatmul.mubr.msk.f32.vlgmr.msra.gmra.mrb[58].mxu1 %vm341_vm3, %v4891_v54 }
0x2f78   :  { %7709 = vmatpush3.bf16.msra.mxu1 %v8479_v52  ;;  %7266 = vmatprep.mubr.msk.f32.mxu1 %vm8223_vm1, %v8222_v2 }
0x2f79   :  { %7710 = vmatprep.subr.bf16.mxu1 %v8224_v6 }
0x2f7c   :  { %7712 = vmatpush3.bf16.msra.mxu1 %v8491_v56 }
0x2f7d   :  { %7719 = vmatprep.subr.bf16.mxu1 %v8224_v6 }
0x2f7f   :  { %7267 = vmatmul.mubr.msk.f32.vlgmr.msra.gmra.mrb[60].mxu1 %vm341_vm3, %v4791_v45 }
0x2f80   :  { %7721 = vmatpush3.bf16.msra.mxu1 %v8463_v47  ;;  %7288 = vmatprep.mubr.msk.f32.mxu1 %vm8223_vm1, %v8222_v2 }
0x2f81   :  { %7722 = vmatprep.subr.bf16.mxu1 %v8224_v6 }
0x2f84   :  { %7724 = vmatpush3.bf16.msra.mxu1 %v8469_v49 }
0x2f85   :  { %7737 = vmatprep.subr.bf16.mxu1 %v8224_v6 }
0x2fc9   :  { %v4860_v55 = vpop.f32.mrb[34].mxu0 }
0x2fca   :  { %v7804_v57 = vadd.f32 %v9115_v15, %v4860_v55  ;;  %v7246_v58 = vpop.f32.mrb[35].mxu0 }
0x2fcc   :  { %8122 = vtanh.f32 %v7804_v57  ;;  %v6264_v60 = vmul.f32 -1.442695, %v7804_v57 }
0x2fce   :  { %8124 = vpow2.f32 %v6264_v60 }
0x2fd6   :  { %v8123_v59 = vpop.eup %8122 }
0x2fd7   :  { %4874 = vrot.lane.b32.xlu0 %v8123_v59, %s8225_s16 }
0x2fd8   :  { %v8125_v61 = vpop.eup %8124 }
0x2fd9   :  { %v4868_v62 = vadd.f32 1.0, %v8125_v61 }
0x2fdb   :  { %8126 = vrcp.f32 %v4868_v62 }
0x2fe5   :  { %v8127_v0 = vpop.eup %8126 }
0x2fe6   :  { %v4872_v16 = vmul.f32 %v8127_v0, %v9123_v38 }
0x3049   :  { %v4875_v1 = vpop.permute.xlu0 %4874 }
0x304a   :  { %v4960_v3 = vpop.f32.mrb[58].mxu1  ;;  %v4877_v4 = vmul.f32 %v8127_v0, %v4875_v1 }
0x304b   :  { %v7257_v7 = vpop.f32.mrb[59].mxu1 }
0x304c   :  { %4879 = vrot.lane.b32.xlu0 %v4877_v4, %s8225_s16 }
0x3052   :  { %v5030_v8 = vpop.f32.mrb[60].mxu1 }
0x3053   :  { %v5031_v63 = vadd.f32 %v5030_v8, %v4960_v3  ;;  %v7268_v9 = vpop.f32.mrb[61].mxu1 }
0x3055   :  { %v5034_v12 = vadd.f32 %v9162_v11, %v5031_v63 }
0x3057   :  { %8128 = vtanh.f32 %v5034_v12  ;;  %v6267_v14 = vmul.f32 -1.442695, %v5034_v12 }
0x3059   :  { %8130 = vpow2.f32 %v6267_v14 }
0x3061   :  { %v8129_v13 = vpop.eup %8128 }
0x3062   :  { %5044 = vrot.lane.b32.xlu1 %v8129_v13, %s8225_s16 }
0x3063   :  { %v8131_v19 = vpop.eup %8130 }
0x3064   :  { %v5038_v30 = vadd.f32 1.0, %v8131_v19 }
0x30be   :  { %v4880_v17 = vpop.permute.xlu0 %4879 }
0x30bf   :  { %v9167_v18 = vadd.f32 %v4880_v17, %v4872_v16 }
0x30c1   :  { %8132 = vtanh.f32 %v9167_v18 }
0x30c2   :  { %8134 = vrcp.f32 %v5038_v30 }
0x30cb   :  { %v8133_v20 = vpop.eup %8132 }
0x30cc   :  { %4885 = vrot.lane.b32.xlu0 %v8133_v20, %s8225_s16  ;;  %v8135_v21 = vpop.eup %8134 }
0x30cd   :  { %v5042_v26 = vmul.f32 %v8135_v21, %v9129_v48 }
0x30d4   :  { %v5045_v22 = vpop.permute.xlu1 %5044 }
0x30d5   :  { %v5047_v23 = vmul.f32 %v8135_v21, %v5045_v22 }
0x30d7   :  { %5049 = vrot.lane.b32.xlu1 %v5047_v23, %s8225_s16 }
0x313e   :  { %v4886_v24 = vpop.permute.xlu0 %4885 }
0x313f   :  { %v4888_v25 = vmul.f32 %v8127_v0, %v4886_v24 }
0x3141   :  { %5062 = vrot.lane.b32.xlu0 %v4888_v25, %s8226_s4 }
0x3149   :  { %v5050_v27 = vpop.permute.xlu1 %5049 }
0x314a   :  { %v9174_v28 = vadd.f32 %v5050_v27, %v5042_v26 }
0x314c   :  { %8136 = vtanh.f32 %v9174_v28 }
0x3156   :  { %v8137_v29 = vpop.eup %8136 }
0x3157   :  { %5055 = vrot.lane.b32.xlu1 %v8137_v29, %s8225_s16 }
0x31b3   :  { %v5063_v31 = vpop.permute.xlu0 %5062 }
0x31b4   :  { %7278 = vmatmul.mubr.msk.f32.vlgmr.msra.gmra.mrb[36].mxu0 %vm341_vm3, %v5063_v31 }
0x31b5   :  { %7727 = vmatpush3.bf16.msra.mxu0 %v8479_v52  ;;  %7299 = vmatprep.mubr.msk.f32.mxu0 %vm8223_vm1, %v8222_v2 }
0x31b6   :  { %7728 = vmatprep.subr.bf16.mxu0 %v8224_v6 }
0x31b9   :  { %7730 = vmatpush3.bf16.msra.mxu0 %v8491_v56 }
0x31ba   :  { %7731 = vmatprep.subr.bf16.mxu0 %v8224_v6 }
0x31bc   :  { %7300 = vmatmul.mubr.msk.f32.vlgmr.msra.gmra.mrb[48].mxu0 %vm341_vm3, %v5063_v31 }
0x31bd   :  { %7733 = vmatpush3.bf16.msra.mxu0 %v8295_v5  ;;  %7310 = vmatprep.mubr.msk.f32.mxu0 %vm8223_vm1, %v8222_v2 }
0x31be   :  { %7734 = vmatprep.subr.bf16.mxu0 %v8224_v6 }
0x31c1   :  { %7736 = vmatpush3.bf16.msra.mxu0 %v8315_v10 }
0x31c2   :  { %7749 = vmatprep.subr.bf16.mxu0 %v8224_v6 }
0x31c9   :  { %v5056_v32 = vpop.permute.xlu1 %5055 }
0x31ca   :  { %v5058_v33 = vmul.f32 %v8135_v21, %v5056_v32 }
0x31cc   :  { %5162 = vrot.lane.b32.xlu1 %v5058_v33, %s8226_s4 }
0x323e   :  { %v5163_v34 = vpop.permute.xlu1 %5162 }
0x323f   :  { %7289 = vmatmul.mubr.msk.f32.vlgmr.msra.gmra.mrb[62].mxu1 %vm341_vm3, %v5163_v34 }
0x3240   :  { %7739 = vmatpush3.bf16.msra.mxu1 %v8463_v47  ;;  %7321 = vmatprep.mubr.msk.f32.mxu1 %vm8223_vm1, %v8222_v2 }
0x3241   :  { %7740 = vmatprep.subr.bf16.mxu1 %v8224_v6 }
0x3244   :  { %7742 = vmatpush3.bf16.msra.mxu1 %v8469_v49 }
0x3245   :  { %7743 = vmatprep.subr.bf16.mxu1 %v8224_v6 }
0x3287   :  { %v5132_v36 = vpop.f32.mrb[36].mxu0 }
0x3288   :  { %v7805_v37 = vadd.f32 %v9115_v15, %v5132_v36  ;;  %v7279_v38 = vpop.f32.mrb[37].mxu0 }
0x328a   :  { %8138 = vtanh.f32 %v7805_v37  ;;  %v6269_v41 = vmul.f32 -1.442695, %v7805_v37 }
0x328c   :  { %8140 = vpow2.f32 %v6269_v41 }
0x328f   :  { %v5302_v39 = vpop.f32.mrb[48].mxu0 }
0x3290   :  { %v7301_v35 = vpop.f32.mrb[49].mxu0 }
0x3294   :  { %v8139_v40 = vpop.eup %8138 }
0x3295   :  { %5146 = vrot.lane.b32.xlu1 %v8139_v40, %s8225_s16 }
0x3296   :  { %v8141_v42 = vpop.eup %8140 }
0x3297   :  { %v5140_v43 = vadd.f32 1.0, %v8141_v42 }
0x3299   :  { %8142 = vrcp.f32 %v5140_v43 }
0x32a3   :  { %v8143_v44 = vpop.eup %8142 }
0x32a4   :  { %v5144_v57 = vmul.f32 %v8143_v44, %v9167_v18 }
0x3307   :  { %v5147_v46 = vpop.permute.xlu1 %5146 }
0x3308   :  { %v5149_v48 = vmul.f32 %v8143_v44, %v5147_v46 }
0x330a   :  { %5151 = vrot.lane.b32.xlu1 %v5149_v48, %s8225_s16 }
0x3312   :  { %v5232_v50 = vpop.f32.mrb[62].mxu1 }
0x3313   :  { %v5303_v45 = vadd.f32 %v5302_v39, %v5232_v50  ;;  %v7290_v51 = vpop.f32.mrb[63].mxu1 }
0x3315   :  { %v5306_v53 = vadd.f32 %v9162_v11, %v5303_v45 }
0x3317   :  { %8144 = vtanh.f32 %v5306_v53  ;;  %v6272_v55 = vmul.f32 -1.442695, %v5306_v53 }
0x3319   :  { %8146 = vpow2.f32 %v6272_v55 }
0x3321   :  { %v8145_v54 = vpop.eup %8144 }
0x3322   :  { %5316 = vrot.lane.b32.xlu0 %v8145_v54, %s8225_s16 }
0x3323   :  { %v8147_v60 = vpop.eup %8146 }
0x3324   :  { %v5310_v61 = vadd.f32 1.0, %v8147_v60 }
0x337c   :  { %v5152_v58 = vpop.permute.xlu1 %5151 }
0x337d   :  { %v9206_v59 = vadd.f32 %v5152_v58, %v5144_v57 }
0x337f   :  { %8148 = vtanh.f32 %v9206_v59 }
0x3380   :  { %8150 = vrcp.f32 %v5310_v61 }
0x3389   :  { %v8149_v62 = vpop.eup %8148 }
0x338a   :  { %5157 = vrot.lane.b32.xlu1 %v8149_v62, %s8225_s16  ;;  %v8151_v0 = vpop.eup %8150 }
0x338b   :  { %v5314_v8 = vmul.f32 %v8151_v0, %v9174_v28 }
0x3394   :  { %v5317_v1 = vpop.permute.xlu0 %5316 }
0x3395   :  { %v5319_v3 = vmul.f32 %v8151_v0, %v5317_v1 }
0x3397   :  { %5321 = vrot.lane.b32.xlu0 %v5319_v3, %s8225_s16 }
0x33fc   :  { %v5158_v4 = vpop.permute.xlu1 %5157 }
0x33fd   :  { %v5160_v7 = vmul.f32 %v8143_v44, %v5158_v4 }
0x33ff   :  { %5334 = vrot.lane.b32.xlu1 %v5160_v7, %s8226_s4 }
0x3409   :  { %v5322_v63 = vpop.permute.xlu0 %5321 }
0x340a   :  { %v9213_v9 = vadd.f32 %v5322_v63, %v5314_v8 }
0x340c   :  { %8152 = vtanh.f32 %v9213_v9 }
0x3416   :  { %v8153_v12 = vpop.eup %8152 }
0x3417   :  { %5327 = vrot.lane.b32.xlu0 %v8153_v12, %s8225_s16 }
0x3471   :  { %v5335_v13 = vpop.permute.xlu1 %5334 }
0x3472   :  { %7311 = vmatmul.mubr.msk.f32.vlgmr.msra.gmra.mrb[38].mxu0 %vm341_vm3, %v5335_v13 }
0x3473   :  { %7751 = vmatpush3.bf16.msra.mxu0 %v8295_v5  ;;  %7343 = vmatprep.mubr.msk.f32.mxu0 %vm8223_vm1, %v8222_v2 }
0x3474   :  { %7752 = vmatprep.subr.bf16.mxu0 %v8224_v6 }
0x3477   :  { %7754 = vmatpush3.bf16.msra.mxu0 %v8315_v10 }
0x3478   :  { %7761 = vmatprep.subr.bf16.mxu0 %v8224_v6 }
0x3489   :  { %v5328_v14 = vpop.permute.xlu0 %5327 }
0x348a   :  { %v5330_v16 = vmul.f32 %v8151_v0, %v5328_v14 }
0x348c   :  { %5434 = vrot.lane.b32.xlu0 %v5330_v16, %s8226_s4 }
0x34fe   :  { %v5435_v17 = vpop.permute.xlu0 %5434 }
0x34ff   :  { %7322 = vmatmul.mubr.msk.f32.vlgmr.msra.gmra.mrb[64].mxu1 %vm341_vm3, %v5435_v17 }
0x3500   :  { %7745 = vmatpush3.bf16.msra.mxu1 %v8479_v52  ;;  %7332 = vmatprep.mubr.msk.f32.mxu1 %vm8223_vm1, %v8222_v2 }
0x3501   :  { %7746 = vmatprep.subr.bf16.mxu1 %v8224_v6 }
0x3504   :  { %7748 = vmatpush3.bf16.msra.mxu1 %v8491_v56 }
0x3505   :  { %7755 = vmatprep.subr.bf16.mxu1 %v8224_v6 }
0x3507   :  { %7333 = vmatmul.mubr.msk.f32.vlgmr.msra.gmra.mrb[66].mxu1 %vm341_vm3, %v5335_v13 }
0x3508   :  { %7757 = vmatpush3.bf16.msra.mxu1 %v8463_v47  ;;  %7354 = vmatprep.mubr.msk.f32.mxu1 %vm8223_vm1, %v8222_v2 }
0x3509   :  { %7758 = vmatprep.subr.bf16.mxu1 %v8224_v6 }
0x350c   :  { %7760 = vmatpush3.bf16.msra.mxu1 %v8469_v49 }
0x350d   :  { %7767 = vmatprep.subr.bf16.mxu1 %v8224_v6 }
0x3545   :  { %v5404_v5 = vpop.f32.mrb[38].mxu0 }
0x3546   :  { %v7806_v10 = vadd.f32 %v9115_v15, %v5404_v5  ;;  %v7312_v18 = vpop.f32.mrb[39].mxu0 }
0x3548   :  { %8154 = vtanh.f32 %v7806_v10  ;;  %v6274_v30 = vmul.f32 -1.442695, %v7806_v10 }
0x354a   :  { %8156 = vpow2.f32 %v6274_v30 }
0x3552   :  { %v8155_v19 = vpop.eup %8154 }
0x3553   :  { %5418 = vrot.lane.b32.xlu0 %v8155_v19, %s8225_s16 }
0x3554   :  { %v8157_v20 = vpop.eup %8156 }
0x3555   :  { %v5412_v21 = vadd.f32 1.0, %v8157_v20 }
0x3557   :  { %8158 = vrcp.f32 %v5412_v21 }
0x3561   :  { %v8159_v22 = vpop.eup %8158 }
0x3562   :  { %v5416_v33 = vmul.f32 %v8159_v22, %v9206_v59 }
0x35c5   :  { %v5419_v23 = vpop.permute.xlu0 %5418 }
0x35c6   :  { %v5421_v24 = vmul.f32 %v8159_v22, %v5419_v23 }
0x35c8   :  { %5423 = vrot.lane.b32.xlu0 %v5421_v24, %s8225_s16 }
0x35d2   :  { %v5504_v25 = vpop.f32.mrb[64].mxu1 }
0x35d3   :  { %v7323_v26 = vpop.f32.mrb[65].mxu1 }
0x35da   :  { %v5574_v27 = vpop.f32.mrb[66].mxu1 }
0x35db   :  { %v5575_v28 = vadd.f32 %v5574_v27, %v5504_v25  ;;  %v7334_v29 = vpop.f32.mrb[67].mxu1 }
0x35dd   :  { %v5578_v31 = vadd.f32 %v9162_v11, %v5575_v28 }
0x35df   :  { %8160 = vtanh.f32 %v5578_v31  ;;  %v6277_v37 = vmul.f32 -1.442695, %v5578_v31 }
0x35e9   :  { %v8161_v32 = vpop.eup %8160 }
0x35ea   :  { %5588 = vrot.lane.b32.xlu1 %v8161_v32, %s8225_s16 }
0x363a   :  { %v5424_v34 = vpop.permute.xlu0 %5423 }
0x363b   :  { %v9245_v36 = vadd.f32 %v5424_v34, %v5416_v33 }
0x363d   :  { %8162 = vtanh.f32 %v9245_v36 }
0x363e   :  { %8164 = vpow2.f32 %v6277_v37 }
0x3647   :  { %v8163_v38 = vpop.eup %8162 }
0x3648   :  { %5429 = vrot.lane.b32.xlu0 %v8163_v38, %s8225_s16  ;;  %v8165_v39 = vpop.eup %8164 }
0x3649   :  { %v5582_v35 = vadd.f32 1.0, %v8165_v39 }
0x364b   :  { %8166 = vrcp.f32 %v5582_v35 }
0x3655   :  { %v8167_v40 = vpop.eup %8166 }
0x3656   :  { %v5586_v46 = vmul.f32 %v8167_v40, %v9213_v9 }
0x365c   :  { %v5589_v41 = vpop.permute.xlu1 %5588 }
0x365d   :  { %v5591_v42 = vmul.f32 %v8167_v40, %v5589_v41 }
0x365f   :  { %5593 = vrot.lane.b32.xlu1 %v5591_v42, %s8225_s16 }
0x36ba   :  { %v5430_v43 = vpop.permute.xlu0 %5429 }
0x36bb   :  { %v5432_v44 = vmul.f32 %v8159_v22, %v5430_v43  ;;  %v6051_v43 = vld [vmem:[%s9331_s7 + $0x8] sm:$0xff] }
0x36bd   :  { %5606 = vrot.lane.b32.xlu0 %v5432_v44, %s8226_s4  ;;  %v6052_v44 = vld [vmem:[%s9331_s7 + $0x10] sm:$0xff] }
0x36d1   :  { %v5594_v48 = vpop.permute.xlu1 %5593 }
0x36d2   :  { %v9252_v50 = vadd.f32 %v5594_v48, %v5586_v46  ;;  %v6053_v48 = vld [vmem:[%s9331_s7 + $0x18] sm:$0xff] }
0x36d4   :  { %8168 = vtanh.f32 %v9252_v50 }
0x36de   :  { %v8169_v45 = vpop.eup %8168 }
0x36df   :  { %5599 = vrot.lane.b32.xlu1 %v8169_v45, %s8225_s16 }
0x372f   :  { %v5607_v51 = vpop.permute.xlu0 %5606 }
0x3730   :  { %7344 = vmatmul.mubr.msk.f32.vlgmr.msra.gmra.mrb[40].mxu0 %vm341_vm3, %v5607_v51 }
0x3731   :  { %7763 = vmatpush3.bf16.msra.mxu0 %v8479_v52  ;;  %7365 = vmatprep.mubr.msk.f32.mxu0 %vm8223_vm1, %v8222_v2 }
0x3732   :  { %7764 = vmatprep.subr.bf16.mxu0 %v8224_v6 }
0x3735   :  { %7766 = vmatpush3.bf16.msra.mxu0 %v8491_v56 }
0x3736   :  { %7773 = vmatprep.subr.bf16.mxu0 %v8224_v6 }
0x3738   :  { %7366 = vmatmul.mubr.msk.f32.vlgmr.msra.gmra.mrb[50].mxu0 %vm341_vm3, %v5607_v51 }
0x3739   :  { %7775 = vmatpush3.bf16.msra.mxu0 %v8479_v52  ;;  %7387 = vmatprep.mubr.msk.f32.mxu0 %vm8223_vm1, %v8222_v2 }
0x373a   :  { %7776 = vmatprep.subr.bf16.mxu0 %v8224_v6 }
0x373d   :  { %7778 = vmatpush3.bf16.msra.mxu0 %v8491_v56 }
0x3751   :  { %v5600_v53 = vpop.permute.xlu1 %5599 }
0x3752   :  { %v5602_v54 = vmul.f32 %v8167_v40, %v5600_v53 }
0x3754   :  { %5706 = vrot.lane.b32.xlu1 %v5602_v54, %s8226_s4 }
0x37c6   :  { %v5707_v55 = vpop.permute.xlu1 %5706 }
0x37c7   :  { %7355 = vmatmul.mubr.msk.f32.vlgmr.msra.gmra.mrb[68].mxu1 %vm341_vm3, %v5707_v55  ;;  %v6286_v55 = vld [vmem:[%s9332_s8] ss:$0 sm:$0xff] }
0x37c8   :  { %7769 = vmatpush3.bf16.msra.mxu1 %v8463_v47  ;;  %7376 = vmatprep.mubr.msk.f32.mxu1 %vm8223_vm1, %v8222_v2 }
0x37c9   :  { %7770 = vmatprep.subr.bf16.mxu1 %v8224_v6 }
0x37cc   :  { %7772 = vmatpush3.bf16.msra.mxu1 %v8469_v49 }
0x3803   :  { %v5676_v52 = vpop.f32.mrb[40].mxu0 }
0x3804   :  { %v7807_v57 = vadd.f32 %v9115_v15, %v5676_v52  ;;  %v7345_v56 = vpop.f32.mrb[41].mxu0 }
0x3806   :  { %8170 = vtanh.f32 %v7807_v57  ;;  %v6279_v61 = vmul.f32 -1.442695, %v7807_v57 }
0x3808   :  { %8172 = vpow2.f32 %v6279_v61 }
0x380b   :  { %v5846_v58 = vpop.f32.mrb[50].mxu0 }
0x380c   :  { %v7367_v59 = vpop.f32.mrb[51].mxu0 }
0x3810   :  { %v8171_v60 = vpop.eup %8170 }
0x3811   :  { %5690 = vrot.lane.b32.xlu0 %v8171_v60, %s8225_s16 }
0x3812   :  { %v8173_v47 = vpop.eup %8172 }
0x3813   :  { %v5684_v62 = vadd.f32 1.0, %v8173_v47 }
0x3815   :  { %8174 = vrcp.f32 %v5684_v62 }
0x381f   :  { %v8175_v2 = vpop.eup %8174 }
0x3820   :  { %v5688_v7 = vmul.f32 %v8175_v2, %v9245_v36 }
0x3883   :  { %v5691_v0 = vpop.permute.xlu0 %5690 }
0x3884   :  { %v5693_v6 = vmul.f32 %v8175_v2, %v5691_v0 }
0x3886   :  { %5695 = vrot.lane.b32.xlu0 %v5693_v6, %s8225_s16 }
0x389a   :  { %v5776_v49 = vpop.f32.mrb[68].mxu1 }
0x389b   :  { %v5847_v1 = vadd.f32 %v5846_v58, %v5776_v49  ;;  %v7356_v15 = vpop.f32.mrb[69].mxu1 }
0x389d   :  { %v5850_v3 = vadd.f32 %v9162_v11, %v5847_v1 }
0x389f   :  { %8176 = vtanh.f32 %v5850_v3  ;;  %v6282_v9 = vmul.f32 -1.442695, %v5850_v3 }
0x38a9   :  { %v8177_v4 = vpop.eup %8176 }
0x38aa   :  { %5860 = vrot.lane.b32.xlu1 %v8177_v4, %s8225_s16 }
0x38f8   :  { %v5696_v8 = vpop.permute.xlu0 %5695 }
0x38f9   :  { %v5698_v63 = vadd.f32 %v5696_v8, %v5688_v7 }
0x38fb   :  { %8178 = vtanh.f32 %v5698_v63 }
0x38fc   :  { %8180 = vpow2.f32 %v6282_v9 }
0x3905   :  { %v8179_v12 = vpop.eup %8178 }
0x3906   :  { %5701 = vrot.lane.b32.xlu0 %v8179_v12, %s8225_s16  ;;  %v8181_v13 = vpop.eup %8180 }
0x3907   :  { %v5854_v14 = vadd.f32 1.0, %v8181_v13 }
0x3909   :  { %8182 = vrcp.f32 %v5854_v14 }
0x3913   :  { %v8183_v16 = vpop.eup %8182 }
0x3914   :  { %v5858_v10 = vmul.f32 %v8183_v16, %v9252_v50  ;;  %v7783_v50 = vpack.c.bf16 %v6053_v48, %v6052_v44 }
0x391c   :  { %v5861_v17 = vpop.permute.xlu1 %5860 }
0x391d   :  { %v5863_v5 = vmul.f32 %v8183_v16, %v5861_v17 }
0x391f   :  { %5865 = vrot.lane.b32.xlu1 %v5863_v5, %s8225_s16 }
0x3978   :  { %v5702_v20 = vpop.permute.xlu0 %5701 }
0x3979   :  { %v5704_v21 = vmul.f32 %v8175_v2, %v5702_v20 }
0x3991   :  { %v5866_v18 = vpop.permute.xlu1 %5865 }
0x3992   :  { %v5868_v19 = vadd.f32 %v5866_v18, %v5858_v10 }
0x3994   :  { %8184 = vtanh.f32 %v5868_v19 }
0x399e   :  { %v8185_v30 = vpop.eup %8184 }
0x399f   :  { %5871 = vrot.lane.b32.xlu1 %v8185_v30, %s8225_s16 }
0x39a3   :  { %5951 = vrot.lane.b32.xlu1 %v5704_v21, %s8226_s4 }
0x3a11   :  { %v5872_v22 = vpop.permute.xlu1 %5871 }
0x3a12   :  { %v5874_v23 = vmul.f32 %v8183_v16, %v5872_v22 }
0x3a14   :  { %5876 = vrot.lane.b32.xlu0 %v5874_v23, %s8226_s4 }
0x3a15   :  { %v5952_v24 = vpop.permute.xlu1 %5951 }
0x3a16   :  { %7388 = vmatmul.mubr.msk.f32.vlgmr.msra.gmra.mrb[52].mxu0 %vm341_vm3, %v5952_v24 }
0x3a86   :  { %v5877_v25 = vpop.permute.xlu0 %5876 }
0x3a87   :  { %7377 = vmatmul.mubr.msk.f32.vlgmr.msra.gmra.mrb[70].mxu1 %vm341_vm3, %v5877_v25 }
0x3a88   :  { %7398 = vmatprep.mubr.msk.f32.mxu1 %vm341_vm3, %v5952_v24 }
0x3ae9   :  { %v6021_v26 = vpop.f32.mrb[52].mxu0 }
0x3aea   :  { %v7389_v27 = vpop.f32.mrb[53].mxu0 }
0x3b5a   :  { %v5946_v28 = vpop.f32.mrb[70].mxu1 }
0x3b5b   :  { %v6022_v29 = vadd.f32 %v6021_v26, %v5946_v28  ;;  %v7378_v31 = vpop.f32.mrb[71].mxu1 }
0x3b5d   :  { %v6025_v32 = vadd.f32 %v9162_v11, %v6022_v29  ;;  %v6050_v11 = vld [vmem:[%s9331_s7] sm:$0xff]  ;;  %s8227_s7 = smov [#allocation3]  }
0x3b5e   :  { %v7779_v46 = vpack.c.bf16 %v6051_v43, %v6050_v11  ;;  %s6148_s25 = sshll.u32 %s8227_s7, 4  ;;  %s6149_s25 = int_to_ptr.vmem [resolvable:$true] %s6148_s25 }
0x3b5f   :  { %8186 = vtanh.f32 %v6025_v32  ;;  %v6285_v34 = vmul.f32 -1.442695, %v6025_v32  ;;  %p8203_p1 = scmp.lt.s32.totalorder %s6149_s25, %s6149_s25 }
0x3b60   :  { %7780 = vmatprep.subr.bf16.mxu1 %v7779_v46 }
0x3b61   :  { %8188 = vpow2.f32 %v6285_v34  ;;  %7782 = vmatpush3.bf16.msra.mxu1 %v7779_v46 }
0x3b62   :  { %7784 = vmatprep.subr.bf16.mxu1 %v7783_v50 }
0x3b65   :  { %7786 = vmatpush3.bf16.msra.mxu1 %v7783_v50 }
0x3b69   :  { %v8187_v33 = vpop.eup %8186 }
0x3b6a   :  { %6035 = vrot.lane.b32.xlu0 %v8187_v33, %s8225_s16 }
0x3b6b   :  { %v8189_v36 = vpop.eup %8188 }
0x3b6c   :  { %v6029_v37 = vadd.f32 1.0, %v8189_v36 }
0x3b6e   :  { %8190 = vrcp.f32 %v6029_v37 }
0x3b78   :  { %v8191_v38 = vpop.eup %8190 }
0x3b79   :  { %v6033_v40 = vmul.f32 %v8191_v38, %v5868_v19 }
0x3bdc   :  { %v6036_v39 = vpop.permute.xlu0 %6035 }
0x3bdd   :  { %v6038_v35 = vmul.f32 %v8191_v38, %v6036_v39 }
0x3bdf   :  { %6040 = vrot.lane.b32.xlu1 %v6038_v35, %s8225_s16 }
0x3c51   :  { %v6041_v41 = vpop.permute.xlu1 %6040 }
0x3c52   :  { %v6043_v42 = vadd.f32 %v6041_v41, %v6033_v40 }
0x3c54   :  { %8192 = vtanh.f32 %v6043_v42 }
0x3c5e   :  { %v8193_v45 = vpop.eup %8192 }
0x3c5f   :  { %6046 = vrot.lane.b32.xlu0 %v8193_v45, %s8225_s16  ;;  %s8198_s16 = scalar_lea.vmem %s6149_s25, 256 }
0x3c60   :  { %p8199_p0 = scmp.ne.s32.totalorder %s6149_s25, %s8198_s16  ;;  %p8204_p2 = scmp.lt.s32.totalorder %s8198_s16, %s8198_s16 }
0x3c62   :  { %p8205_p3 = por %p8204_p2, %p8203_p1 }
0x3c64   :  { %p8206_p4 = pnand %p8205_p3, %p8199_p0 }
0x3cd1   :  { %v6047_v51 = vpop.permute.xlu0 %6046 }
0x3cd2   :  { %v6049_v53 = vmul.f32 %v8191_v38, %v6047_v51 }
0x3cd4   :  { %6062 = vrot.lane.b32.xlu1 %v6049_v53, %s8226_s4 }
0x3d46   :  { %v6063_v54 = vpop.permute.xlu1 %6062 }
0x3d47   :  { %7399 = vmatmul.mubr.msk.f32.vlgmr.msra.gmra.mrb[72].mxu1 %vm341_vm3, %v6063_v54 }
0x3e1a   :  { %v7400_v52 = vpop.f32.mrb[72].mxu1 }
0x3e1b   :  { %v6138_v57 = vadd.f32 %v7400_v52, %v6286_v55  ;;  %v6132_v56 = vpop.f32.mrb[73].mxu1 }
0x3e1c   :  { %v6133_v58 = vadd.f32 %v6286_v55, %v6132_v56 }
0x3e1d   :  { %6142 = vst [vmem:[#allocation3 + $0x8] sm:$0xff] %v6138_v57 }
0x3e1e   :  { %6141 = vst [vmem:[#allocation3] sm:$0xff] %v6133_v58 }
0x3e1f   :  { %8209 = shalt.err (!%p8206_p4)
}
0x3e20   :  { %s8210_s8 = scalar_lea.hbm %s9333_s9, 256 }
0x3e21   :  { %p8211_p5 = scmp.ne.s32.totalorder %s9333_s9, %s8210_s8  ;;  %p8214_p6 = scmp.lt.u32.totalorder %s8210_s8, %s9333_s9 }
0x3e23   :  { %p8216_p7 = pnand %p8214_p6, %p8211_p5 }
0x3e25   :  { %8219 = shalt.err (!%p8216_p7)
}
0x3e26   :  { %s8228_s30 = smov 128   ;;  %s8229_s10 = smov 8  }
0x3e27   :  { %6154 = dma.vmem_to_hbm [thread:$0]  %s6149_s25, 256, %s9333_s9, [#allocation4], %s8228_s30, %s8228_s30, %s8229_s10  }
0x3e28   :  { %8220 = dma.done.wait [#allocation4], 256  }
0x3e29   :  { %8221 = vsyncadd [#allocation4], 4294967040 }
0x3e2a   :  { %6158 = vsyncpa [#allocation4], 1 }

</bundles_post_ra>
